<compile_context>
chip_gen: v6e
topology: v6e:2x2x1
jax: 0.10.0
libtpu: 0.0.40
codegen_flags: <defaults>
</compile_context>

<pallas_src>
import functools

import jax
import jax.numpy as jnp
import numpy as np
from jax.experimental import pallas as pl
from jax.experimental.pallas import tpu as pltpu


_BN_EPS = 1e-5
_NEG_INF = -1e30


# ----------------------------------------------------------------------------
# Pallas kernel: full EncoderCluster forward for nb images (channels-first).
# ----------------------------------------------------------------------------
def _encoder_cluster_kernel(x_ref,
                            wqkv_ref, wm_ref, bqkv_ref, bm_ref,
                            mloc_ref, mcross_ref,
                            o_ref, *, nb, ip):
    wqkv = wqkv_ref[...]          # (3*ip, C)  fused phi/theta/g weights (BN folded)
    wm = wm_ref[...]              # (C, ip)
    bqkv = bqkv_ref[...]          # (3*ip, 1)
    bm = bm_ref[...]              # (C, 1)
    mloc = mloc_ref[...]          # (HW, HW) additive mask, pass 1 (same patch)
    mcross = mcross_ref[...]      # (HW, HW) additive mask, pass 2 (same offset)

    def non_local(feat, add_mask):
        # feat: (C, HW) channels-first; add_mask: (HW, HW) with 0 / -1e30.
        # One fused projection matmul instead of three tiny ones.
        proj = jnp.maximum(
            jnp.dot(wqkv, feat, preferred_element_type=jnp.float32) + bqkv, 0.0)
        phi = proj[0 * ip:1 * ip, :].astype(jnp.bfloat16)
        theta = proj[1 * ip:2 * ip, :].astype(jnp.bfloat16)
        g = proj[2 * ip:3 * ip, :].astype(jnp.bfloat16)

        # logits[p, t] = <phi[:, p], theta[:, t]>; contract channel axis 0 of
        # both operands directly (no phi.T materialization), bf16 in / f32 acc.
        logits = jax.lax.dot_general(
            phi, theta, dimension_numbers=(((0,), (0,)), ((), ())),
            preferred_element_type=jnp.float32)
        logits = logits + add_mask        # block-diagonal restriction

        # PyTorch nn.Softmax(dim=1) normalizes over the theta index t (lanes).
        mx = jnp.max(logits, axis=1, keepdims=True)
        e = jnp.exp(logits - mx)
        attn = e / jnp.sum(e, axis=1, keepdims=True)   # exact reciprocal

        # y[i, t] = sum_p g[i, p] * attn[p, t]   (bf16 operands, f32 acc)
        y = jnp.dot(g, attn.astype(jnp.bfloat16),
                    preferred_element_type=jnp.float32)
        out = jnp.maximum(
            jnp.dot(wm, y, preferred_element_type=jnp.float32) + bm, 0.0)
        return out + feat                                  # residual

    # nb images per grid step (static, small) -> unrolled loop; masks and
    # weights are loaded once per step and shared by all nb images.
    for i in range(nb):
        x = x_ref[i]                          # (C, HW) lane-dense tile
        h1 = non_local(x, mloc)               # NLB over local patches
        h2 = non_local(h1, mcross)            # shared-weight NLB over patch grid
        o_ref[i] = h2.astype(o_ref.dtype)


# ----------------------------------------------------------------------------
# Parameter folding / padding / fusing
# ----------------------------------------------------------------------------
def _fold_bn_into_conv(w, bn):
    # 1x1 conv (bias=False) followed by BatchNorm2d (eval):
    #   BN(W @ x) == (scale * W) @ x + (beta - mean * scale)
    scale = bn["gamma"] / jnp.sqrt(bn["var"] + _BN_EPS)
    return w * scale[:, None], bn["beta"] - bn["mean"] * scale


def _prepare_kernel_params(params):
    """Fold BN, zero-pad inter-channels to a multiple of 8, fuse phi/theta/g."""
    inter = params["phi"]["w"].shape[0]
    ip = max(8, ((inter + 7) // 8) * 8)

    def branch(name):
        w, b = _fold_bn_into_conv(params[name]["w"], params[name])
        w = jnp.pad(w, ((0, ip - inter), (0, 0))).astype(jnp.float32)   # (ip, C)
        b = jnp.pad(b, (0, ip - inter))[:, None].astype(jnp.float32)    # (ip, 1)
        return w, b

    wphi, bphi = branch("phi")
    wth, bth = branch("theta")
    wg, bg = branch("g")
    wqkv = jnp.concatenate([wphi, wth, wg], axis=0)                     # (3*ip, C)
    bqkv = jnp.concatenate([bphi, bth, bg], axis=0)                     # (3*ip, 1)

    wm, bm = _fold_bn_into_conv(params["mask"]["w"], params["mask"])
    wm = jnp.pad(wm, ((0, 0), (0, ip - inter))).astype(jnp.float32)     # (C, ip)
    bm = bm[:, None].astype(jnp.float32)                                # (C, 1)
    return (wqkv, wm, bqkv, bm), ip


# ----------------------------------------------------------------------------
# Wrapper: one pallas_call for the whole module.
# ----------------------------------------------------------------------------
@functools.partial(jax.jit, static_argnames=("P_h", "P_w"))
def encoder_cluster_forward(x, params, *, P_h, P_w):
    N, C, H, W = x.shape
    assert H % P_h == 0 and W % P_w == 0
    HW = H * W
    (wqkv, wm, bqkv, bm), ip = _prepare_kernel_params(params)

    # Free reshape (channels stay leading): each image is a lane-dense (C, HW) tile.
    x2 = x.reshape(N, C, HW).astype(jnp.float32)

    # Precomputed additive attention masks (0 allowed / -1e30 forbidden):
    #   pass 1 -> pixels in the same P_h x P_w patch
    #   pass 2 -> pixels with the same intra-patch offset (across patches)
    r = jnp.arange(HW, dtype=jnp.int32)
    h, w = r // W, r % W
    bid_local = (h // P_h) * (W // P_w) + (w // P_w)    # which patch
    bid_cross = (h % P_h) * P_w + (w % P_w)             # intra-patch offset
    mloc = jnp.where(bid_local[:, None] == bid_local[None, :],
                     0.0, _NEG_INF).astype(jnp.float32)
    mcross = jnp.where(bid_cross[:, None] == bid_cross[None, :],
                       0.0, _NEG_INF).astype(jnp.float32)

    # Images per grid step: keep >=2 parallel steps when possible (2 TCs on
    # v7x), fold the rest into each step to amortize per-step overhead.
    nb = N // 2 if (N >= 2 and N % 2 == 0) else 1
    grid = (N // nb,)

    rep = lambda n: (0, 0)   # replicated whole-array blocks (fetched once)

    kernel = functools.partial(_encoder_cluster_kernel, nb=nb, ip=ip)

    out = pl.pallas_call(
        kernel,
        out_shape=jax.ShapeDtypeStruct((N, C, HW), jnp.float32),
        grid=grid,
        in_specs=[
            pl.BlockSpec((nb, C, HW), lambda n: (n, 0, 0)),
            pl.BlockSpec((3 * ip, C), rep),
            pl.BlockSpec((C, ip), rep),
            pl.BlockSpec((3 * ip, 1), rep),
            pl.BlockSpec((C, 1), rep),
            pl.BlockSpec((HW, HW), rep),
            pl.BlockSpec((HW, HW), rep),
        ],
        out_specs=pl.BlockSpec((nb, C, HW), lambda n: (n, 0, 0)),
        compiler_params=pltpu.CompilerParams(dimension_semantics=("parallel",)),
    )(x2, wqkv, wm, bqkv, bm, mloc, mcross)

    return out.reshape(N, C, H, W)


# ----------------------------------------------------------------------------
# Pure-JAX reference (mirrors the PyTorch code literally, BN in eval mode)
# ----------------------------------------------------------------------------
def _conv_bn_relu_ref(x, w, bn):
    hp = jax.lax.Precision.HIGHEST
    y = jnp.einsum("oc,bchw->bohw", w, x, precision=hp)
    scale = bn["gamma"] / jnp.sqrt(bn["var"] + _BN_EPS)
    shift = bn["beta"] - bn["mean"] * scale
    return jnp.maximum(y * scale[None, :, None, None] + shift[None, :, None, None], 0.0)


def _non_local_block_ref(x, params):
    b, c, h, w = x.shape
    inter = params["phi"]["w"].shape[0]
    hp = jax.lax.Precision.HIGHEST
    x_phi = _conv_bn_relu_ref(x, params["phi"]["w"], params["phi"]).reshape(b, inter, h * w)
    x_theta = _conv_bn_relu_ref(x, params["theta"]["w"], params["theta"]).reshape(
        b, inter, h * w).transpose(0, 2, 1)
    x_g = _conv_bn_relu_ref(x, params["g"]["w"], params["g"]).reshape(
        b, inter, h * w).transpose(0, 2, 1)
    mul = jnp.einsum("bti,bip->btp", x_theta, x_phi, precision=hp)
    mul = jax.nn.softmax(mul, axis=1)
    y = jnp.einsum("btp,bpi->bti", mul, x_g, precision=hp)
    y = y.transpose(0, 2, 1).reshape(b, inter, h, w)
    mask = _conv_bn_relu_ref(y, params["mask"]["w"], params["mask"])
    return mask + x


def encoder_cluster_ref(x, params, P_h, P_w):
    N, C, H, W = x.shape
    Q_h, Q_w = H // P_h, W // P_w
    z = x.reshape(N, C, Q_h, P_h, Q_w, P_w).transpose(0, 2, 4, 1, 3, 5)
    z = z.reshape(N * Q_h * Q_w, C, P_h, P_w)
    z = _non_local_block_ref(z, params)
    z = z.reshape(N, Q_h, Q_w, C, P_h, P_w).transpose(0, 4, 5, 3, 1, 2)
    z = z.reshape(N * P_h * P_w, C, Q_h, Q_w)
    z = _non_local_block_ref(z, params)
    z = z.reshape(N, P_h, P_w, C, Q_h, Q_w).transpose(0, 3, 4, 1, 5, 2)
    return z.reshape(N, C, H, W)


# ----------------------------------------------------------------------------
# Deterministic init + smoke test
# ----------------------------------------------------------------------------
def init_params(key, C):
    inter = C // 2
    keys = jax.random.split(key, 4)

    def branch(k, c_out, c_in):
        kw, kg, kb, km, kv = jax.random.split(k, 5)
        return dict(
            w=0.3 * jax.random.normal(kw, (c_out, c_in), jnp.float32),
            gamma=jax.random.uniform(kg, (c_out,), jnp.float32, minval=0.8, maxval=1.2),
            beta=0.1 * jax.random.normal(kb, (c_out,), jnp.float32),
            mean=0.1 * jax.random.normal(km, (c_out,), jnp.float32),
            var=jax.random.uniform(kv, (c_out,), jnp.float32, minval=0.8, maxval=1.2),
        )

    return dict(
        phi=branch(keys[0], inter, C),
        theta=branch(keys[1], inter, C),
        g=branch(keys[2], inter, C),
        mask=branch(keys[3], C, inter),
    )


if __name__ == "__main__":
    N, C, H, W = 2, 8, 16, 16
    P_h, P_w = 4, 4

    key = jax.random.PRNGKey(0)
    kx, kp = jax.random.split(key)
    x = jax.random.normal(kx, (N, C, H, W), jnp.float32)
    params = init_params(kp, C)

    out = jax.block_until_ready(encoder_cluster_forward(x, params, P_h=P_h, P_w=P_w))
    ref = jax.block_until_ready(encoder_cluster_ref(x, params, P_h, P_w))

    np.testing.assert_allclose(np.asarray(out), np.asarray(ref), rtol=5e-2, atol=5e-2)
    print("KERNEL_OK")
</pallas_src>

<mosaic_0001>
module attributes {stable_mosaic.version = 11 : i64} {
  func.func @_encoder_cluster_kernel(%arg0: i32, %arg1: memref<1x8x256xf32, #tpu.memory_space<vmem>>, %arg2: memref<24x8xf32, #tpu.memory_space<vmem>>, %arg3: memref<8x8xf32, #tpu.memory_space<vmem>>, %arg4: memref<24x1xf32, #tpu.memory_space<vmem>>, %arg5: memref<8x1xf32, #tpu.memory_space<vmem>>, %arg6: memref<256x256xf32, #tpu.memory_space<vmem>>, %arg7: memref<256x256xf32, #tpu.memory_space<vmem>>, %arg8: memref<1x8x256xf32, #tpu.memory_space<vmem>>) attributes {dimension_semantics = [#tpu.dimension_semantics<parallel>], iteration_bounds = array<i64: 2>, scalar_prefetch = 0 : i64, scratch_operands = 0 : i64, tpu.core_type = #tpu.core_type<tc>, window_params = [{transform_indices = @transform_0, window_bounds = array<i64: 1, 8, 256>}, {pipeline_mode = #tpu.pipeline_mode<synchronous>, transform_indices = @transform_1, window_bounds = array<i64: 24, 8>}, {pipeline_mode = #tpu.pipeline_mode<synchronous>, transform_indices = @transform_2, window_bounds = array<i64: 8, 8>}, {pipeline_mode = #tpu.pipeline_mode<synchronous>, transform_indices = @transform_3, window_bounds = array<i64: 24, 1>}, {pipeline_mode = #tpu.pipeline_mode<synchronous>, transform_indices = @transform_4, window_bounds = array<i64: 8, 1>}, {pipeline_mode = #tpu.pipeline_mode<synchronous>, transform_indices = @transform_5, window_bounds = array<i64: 256, 256>}, {pipeline_mode = #tpu.pipeline_mode<synchronous>, transform_indices = @transform_6, window_bounds = array<i64: 256, 256>}, {transform_indices = @transform_7, window_bounds = array<i64: 1, 8, 256>}]} {
    %c0 = arith.constant 0 : index
    %c0_0 = arith.constant 0 : index
    %0 = vector.load %arg2[%c0, %c0_0] : memref<24x8xf32, #tpu.memory_space<vmem>>, vector<24x8xf32>
    %c0_1 = arith.constant 0 : index
    %c0_2 = arith.constant 0 : index
    %1 = vector.load %arg3[%c0_1, %c0_2] : memref<8x8xf32, #tpu.memory_space<vmem>>, vector<8x8xf32>
    %c0_3 = arith.constant 0 : index
    %c0_4 = arith.constant 0 : index
    %2 = vector.load %arg4[%c0_3, %c0_4] : memref<24x1xf32, #tpu.memory_space<vmem>>, vector<24x1xf32>
    %c0_5 = arith.constant 0 : index
    %c0_6 = arith.constant 0 : index
    %3 = vector.load %arg5[%c0_5, %c0_6] : memref<8x1xf32, #tpu.memory_space<vmem>>, vector<8x1xf32>
    %c0_7 = arith.constant 0 : index
    %c0_8 = arith.constant 0 : index
    %4 = vector.load %arg6[%c0_7, %c0_8] : memref<256x256xf32, #tpu.memory_space<vmem>>, vector<256x256xf32>
    %c0_9 = arith.constant 0 : index
    %c0_10 = arith.constant 0 : index
    %5 = vector.load %arg7[%c0_9, %c0_10] : memref<256x256xf32, #tpu.memory_space<vmem>>, vector<256x256xf32>
    %c0_11 = arith.constant 0 : index
    %c0_12 = arith.constant 0 : index
    %c0_13 = arith.constant 0 : index
    %6 = vector.load %arg1[%c0_11, %c0_12, %c0_13] : memref<1x8x256xf32, #tpu.memory_space<vmem>>, vector<1x8x256xf32>
    %7 = vector.shape_cast %6 : vector<1x8x256xf32> to vector<8x256xf32>
    %cst = arith.constant dense<0.000000e+00> : vector<24x256xf32>
    %8 = tpu.matmul %0, %7, %cst {dimension_numbers = #tpu.dot_dimension_numbers<[1], [0], [0], [1], [0, 0, 1, 1], [], []>} : vector<24x8xf32>, vector<8x256xf32>, vector<24x256xf32> -> vector<24x256xf32>
    %9 = vector.broadcast %2 : vector<24x1xf32> to vector<24x256xf32>
    %10 = arith.addf %8, %9 : vector<24x256xf32>
    %cst_14 = arith.constant 0.000000e+00 : f32
    %11 = vector.broadcast %cst_14 : f32 to vector<24x256xf32>
    %12 = arith.maximumf %10, %11 : vector<24x256xf32>
    %13 = vector.extract_strided_slice %12 {offsets = [0, 0], sizes = [8, 256], strides = [1, 1]} : vector<24x256xf32> to vector<8x256xf32>
    %14 = arith.truncf %13 : vector<8x256xf32> to vector<8x256xbf16>
    %15 = vector.extract_strided_slice %12 {offsets = [8, 0], sizes = [8, 256], strides = [1, 1]} : vector<24x256xf32> to vector<8x256xf32>
    %16 = arith.truncf %15 : vector<8x256xf32> to vector<8x256xbf16>
    %17 = vector.extract_strided_slice %12 {offsets = [16, 0], sizes = [8, 256], strides = [1, 1]} : vector<24x256xf32> to vector<8x256xf32>
    %18 = arith.truncf %17 : vector<8x256xf32> to vector<8x256xbf16>
    %cst_15 = arith.constant dense<0.000000e+00> : vector<256x256xf32>
    %19 = tpu.matmul %14, %16, %cst_15 {dimension_numbers = #tpu.dot_dimension_numbers<[0], [0], [1], [1], [0, 1, 1, 1], [], []>} : vector<8x256xbf16>, vector<8x256xbf16>, vector<256x256xf32> -> vector<256x256xf32>
    %20 = arith.addf %19, %4 : vector<256x256xf32>
    %cst_16 = arith.constant dense<0xFF800000> : vector<256xf32>
    %21 = vector.multi_reduction <maximumf>, %20, %cst_16 [1] : vector<256x256xf32> to vector<256xf32>
    %22 = vector.shape_cast %21 : vector<256xf32> to vector<256x1xf32>
    %23 = vector.broadcast %22 : vector<256x1xf32> to vector<256x256xf32>
    %24 = arith.subf %20, %23 : vector<256x256xf32>
    %25 = math.exp %24 : vector<256x256xf32>
    %cst_17 = arith.constant dense<0.000000e+00> : vector<256xf32>
    %26 = vector.multi_reduction <add>, %25, %cst_17 [1] : vector<256x256xf32> to vector<256xf32>
    %27 = vector.shape_cast %26 : vector<256xf32> to vector<256x1xf32>
    %28 = vector.broadcast %27 : vector<256x1xf32> to vector<256x256xf32>
    %29 = arith.divf %25, %28 : vector<256x256xf32>
    %30 = arith.truncf %29 : vector<256x256xf32> to vector<256x256xbf16>
    %cst_18 = arith.constant dense<0.000000e+00> : vector<8x256xf32>
    %31 = tpu.matmul %18, %30, %cst_18 {dimension_numbers = #tpu.dot_dimension_numbers<[1], [0], [0], [1], [0, 0, 1, 1], [], []>} : vector<8x256xbf16>, vector<256x256xbf16>, vector<8x256xf32> -> vector<8x256xf32>
    %cst_19 = arith.constant dense<0.000000e+00> : vector<8x256xf32>
    %32 = tpu.matmul %1, %31, %cst_19 {dimension_numbers = #tpu.dot_dimension_numbers<[1], [0], [0], [1], [0, 0, 1, 1], [], []>} : vector<8x8xf32>, vector<8x256xf32>, vector<8x256xf32> -> vector<8x256xf32>
    %33 = vector.broadcast %3 : vector<8x1xf32> to vector<8x256xf32>
    %34 = arith.addf %32, %33 : vector<8x256xf32>
    %cst_20 = arith.constant 0.000000e+00 : f32
    %35 = vector.broadcast %cst_20 : f32 to vector<8x256xf32>
    %36 = arith.maximumf %34, %35 : vector<8x256xf32>
    %37 = arith.addf %36, %7 : vector<8x256xf32>
    %cst_21 = arith.constant dense<0.000000e+00> : vector<24x256xf32>
    %38 = tpu.matmul %0, %37, %cst_21 {dimension_numbers = #tpu.dot_dimension_numbers<[1], [0], [0], [1], [0, 0, 1, 1], [], []>} : vector<24x8xf32>, vector<8x256xf32>, vector<24x256xf32> -> vector<24x256xf32>
    %39 = vector.broadcast %2 : vector<24x1xf32> to vector<24x256xf32>
    %40 = arith.addf %38, %39 : vector<24x256xf32>
    %cst_22 = arith.constant 0.000000e+00 : f32
    %41 = vector.broadcast %cst_22 : f32 to vector<24x256xf32>
    %42 = arith.maximumf %40, %41 : vector<24x256xf32>
    %43 = vector.extract_strided_slice %42 {offsets = [0, 0], sizes = [8, 256], strides = [1, 1]} : vector<24x256xf32> to vector<8x256xf32>
    %44 = arith.truncf %43 : vector<8x256xf32> to vector<8x256xbf16>
    %45 = vector.extract_strided_slice %42 {offsets = [8, 0], sizes = [8, 256], strides = [1, 1]} : vector<24x256xf32> to vector<8x256xf32>
    %46 = arith.truncf %45 : vector<8x256xf32> to vector<8x256xbf16>
    %47 = vector.extract_strided_slice %42 {offsets = [16, 0], sizes = [8, 256], strides = [1, 1]} : vector<24x256xf32> to vector<8x256xf32>
    %48 = arith.truncf %47 : vector<8x256xf32> to vector<8x256xbf16>
    %cst_23 = arith.constant dense<0.000000e+00> : vector<256x256xf32>
    %49 = tpu.matmul %44, %46, %cst_23 {dimension_numbers = #tpu.dot_dimension_numbers<[0], [0], [1], [1], [0, 1, 1, 1], [], []>} : vector<8x256xbf16>, vector<8x256xbf16>, vector<256x256xf32> -> vector<256x256xf32>
    %50 = arith.addf %49, %5 : vector<256x256xf32>
    %cst_24 = arith.constant dense<0xFF800000> : vector<256xf32>
    %51 = vector.multi_reduction <maximumf>, %50, %cst_24 [1] : vector<256x256xf32> to vector<256xf32>
    %52 = vector.shape_cast %51 : vector<256xf32> to vector<256x1xf32>
    %53 = vector.broadcast %52 : vector<256x1xf32> to vector<256x256xf32>
    %54 = arith.subf %50, %53 : vector<256x256xf32>
    %55 = math.exp %54 : vector<256x256xf32>
    %cst_25 = arith.constant dense<0.000000e+00> : vector<256xf32>
    %56 = vector.multi_reduction <add>, %55, %cst_25 [1] : vector<256x256xf32> to vector<256xf32>
    %57 = vector.shape_cast %56 : vector<256xf32> to vector<256x1xf32>
    %58 = vector.broadcast %57 : vector<256x1xf32> to vector<256x256xf32>
    %59 = arith.divf %55, %58 : vector<256x256xf32>
    %60 = arith.truncf %59 : vector<256x256xf32> to vector<256x256xbf16>
    %cst_26 = arith.constant dense<0.000000e+00> : vector<8x256xf32>
    %61 = tpu.matmul %48, %60, %cst_26 {dimension_numbers = #tpu.dot_dimension_numbers<[1], [0], [0], [1], [0, 0, 1, 1], [], []>} : vector<8x256xbf16>, vector<256x256xbf16>, vector<8x256xf32> -> vector<8x256xf32>
    %cst_27 = arith.constant dense<0.000000e+00> : vector<8x256xf32>
    %62 = tpu.matmul %1, %61, %cst_27 {dimension_numbers = #tpu.dot_dimension_numbers<[1], [0], [0], [1], [0, 0, 1, 1], [], []>} : vector<8x8xf32>, vector<8x256xf32>, vector<8x256xf32> -> vector<8x256xf32>
    %63 = vector.broadcast %3 : vector<8x1xf32> to vector<8x256xf32>
    %64 = arith.addf %62, %63 : vector<8x256xf32>
    %cst_28 = arith.constant 0.000000e+00 : f32
    %65 = vector.broadcast %cst_28 : f32 to vector<8x256xf32>
    %66 = arith.maximumf %64, %65 : vector<8x256xf32>
    %67 = arith.addf %66, %37 : vector<8x256xf32>
    %c0_29 = arith.constant 0 : index
    %c0_30 = arith.constant 0 : index
    %c0_31 = arith.constant 0 : index
    %68 = vector.load %arg8[%c0_29, %c0_30, %c0_31] : memref<1x8x256xf32, #tpu.memory_space<vmem>>, vector<1x8x256xf32>
    %69 = vector.shape_cast %68 : vector<1x8x256xf32> to vector<8x256xf32>
    %70 = vector.shape_cast %67 : vector<8x256xf32> to vector<1x8x256xf32>
    tpu.vector_store %arg8[%c0_29, %c0_30, %c0_31], %70 {strides = array<i32>} : memref<1x8x256xf32, #tpu.memory_space<vmem>>, vector<1x8x256xf32>,
    return
  }
  func.func @transform_0(%arg0: i32) -> (i32, i32, i32) {
    %c0_i32 = arith.constant 0 : i32
    %c0_i32_0 = arith.constant 0 : i32
    %c0_i32_1 = arith.constant 0 : i32
    return %arg0, %c0_i32, %c0_i32_0 : i32, i32, i32
  }
  func.func @transform_1(%arg0: i32) -> (i32, i32) {
    %c0_i32 = arith.constant 0 : i32
    %c0_i32_0 = arith.constant 0 : i32
    %c0_i32_1 = arith.constant 0 : i32
    return %c0_i32, %c0_i32_0 : i32, i32
  }
  func.func @transform_2(%arg0: i32) -> (i32, i32) {
    %c0_i32 = arith.constant 0 : i32
    %c0_i32_0 = arith.constant 0 : i32
    %c0_i32_1 = arith.constant 0 : i32
    return %c0_i32, %c0_i32_0 : i32, i32
  }
  func.func @transform_3(%arg0: i32) -> (i32, i32) {
    %c0_i32 = arith.constant 0 : i32
    %c0_i32_0 = arith.constant 0 : i32
    %c0_i32_1 = arith.constant 0 : i32
    return %c0_i32, %c0_i32_0 : i32, i32
  }
  func.func @transform_4(%arg0: i32) -> (i32, i32) {
    %c0_i32 = arith.constant 0 : i32
    %c0_i32_0 = arith.constant 0 : i32
    %c0_i32_1 = arith.constant 0 : i32
    return %c0_i32, %c0_i32_0 : i32, i32
  }
  func.func @transform_5(%arg0: i32) -> (i32, i32) {
    %c0_i32 = arith.constant 0 : i32
    %c0_i32_0 = arith.constant 0 : i32
    %c0_i32_1 = arith.constant 0 : i32
    return %c0_i32, %c0_i32_0 : i32, i32
  }
  func.func @transform_6(%arg0: i32) -> (i32, i32) {
    %c0_i32 = arith.constant 0 : i32
    %c0_i32_0 = arith.constant 0 : i32
    %c0_i32_1 = arith.constant 0 : i32
    return %c0_i32, %c0_i32_0 : i32, i32
  }
  func.func @transform_7(%arg0: i32) -> (i32, i32, i32) {
    %c0_i32 = arith.constant 0 : i32
    %c0_i32_0 = arith.constant 0 : i32
    %c0_i32_1 = arith.constant 0 : i32
    return %arg0, %c0_i32, %c0_i32_0 : i32, i32, i32
  }
}

</mosaic_0001>

<bundles_post_ra>
// kernel: encoder_cluster_forward.1
= control target key start
LH: loop header
LB: loop body
LE: loop exit
PB: predicated region body
PF: predicated region fallthrough
CT: control target
= control target key end

     0   :  { %s3020_s24 = smov 0   ;;  %s4831_s0 = inlined_call_operand.vmem [shape: f32[2,8,256], index: 0, kind: input, shape index: {}]   ;;  %s4832_s1 = inlined_call_operand.vmem [shape: f32[24,8], index: 1, kind: input, shape index: {}]   ;;  %s4833_s2 = inlined_call_operand.vmem [shape: f32[8,8], index: 2, kind: input, shape index: {}]   ;;  %s4834_s3 = inlined_call_operand.vmem [shape: f32[24,1], index: 3, kind: input, shape index: {}]   ;;  %s4835_s4 = inlined_call_operand.vmem [shape: f32[8,1], index: 4, kind: input, shape index: {}]   ;;  %s4836_s5 = inlined_call_operand.vmem [shape: f32[256,256], index: 5, kind: input, shape index: {}]   ;;  %s4837_s6 = inlined_call_operand.vmem [shape: f32[256,256], index: 6, kind: input, shape index: {}]   ;;  %s4838_s7 = inlined_call_operand.vmem [shape: f32[2,8,256], index: 7, kind: output, shape index: {}]  }
   0x1 LB: > { %s2513_s25 = sadd.s32 4294967295, %s2976_s24   ;;  %p2517_p0 = scmp.ge.s32.totalorder %s2976_s24, 1  ;;  %s2976_s24 = sphi %s3020_s24, %s17_s24  }
   0x2   : > { %p237_p1 = scmp.lt.s32.totalorder %s2976_s24, 3 }
   0x4   : > { %p238_p2 = pnand %p2517_p0, %p237_p1 }
   0x6   : > { %241 = sbr.rel (%p238_p2) target bundleno = 2758 (0xac6), region = 48 }
   0xb   : > { %p269_p3 = scmp.lt.s32.totalorder %s2513_s25, 1  ;;  %v4841_v0 = vmov 0.0   ;;  %v4839_v1 = vmov 0   ;;  %v284_v2 = vld [vmem:[%s4834_s3] sm:$0xff]  ;;  %v285_v3 = vld [vmem:[%s4834_s3 + $0x8] sm:$0xff]  ;;  %vm433_vm0 = vcmask 64512  }
   0xc   : > { %507 = vmatprep.mubr.f32.mxu1 %v4841_v0  ;;  %2578 = vset.pattern.permute.xlu0 %v4839_v1  ;;  %v280_v6 = vld [vmem:[%s4832_s1] sm:$0xff]  ;;  %v281_v7 = vld [vmem:[%s4832_s1 + $0x8] sm:$0xff]  ;;  %v282_v8 = vld [vmem:[%s4832_s1 + $0x10] sm:$0xff]  ;;  %vm618_vm1 = vcmask 1043456  }
   0xd   : > { %s5053_s25 = smov (!%p269_p3, %s2513_s25), 1  ;;  %420 = vperm.xlu0 %2578, %v284_v2   ;;  %1443 = vmatprep.mubr.f32.mxu0 %v4841_v0 }
   0xe   : > { %s2566_s30 = sshll.u32 %s5053_s25, 4 }
   0xf   : > { %s3045_s10 = scalar_lea.vmem %s4831_s0, %s2566_s30  ;;  %s278_s16 = scalar_lea.vmem %s4838_s7, %s2566_s30 }
  0x10   : > { %v417_v4 = vld [vmem:[%s3045_s10 + $0x8] sm:$0xff]  ;;  %v416_v5 = vld [vmem:[%s3045_s10] sm:$0xff] }
  0x11   : > { %425 = vperm.xlu0 %2578, %v285_v3   ;;  %473 = vmatprep.subr.mxu1 %v417_v4 }
  0x12   : > { %474 = vmatpush1.msra.mxu1 %v416_v5 }
  0x13   : > { %2522 = vmatmul.mubr.msk.f32.vlgmr.msra.gmra.mxu1 %vm433_vm0, %v280_v6 }
  0x14   : > { %513 = vmatprep.mubr.f32.mxu1 %v4841_v0 }
  0x17   : > { %2523 = vmatmul.mubr.msk.f32.gmra.mxu1 %vm433_vm0, %v281_v7 }
  0x18   : > { %519 = vmatprep.mubr.f32.mxu1 %v4841_v0 }
  0x1b   : > { %2524 = vmatmul.mubr.msk.f32.gmra.mxu1 %vm433_vm0, %v282_v8 }
  0x1c   : > { %657 = vmatprep.mubr.bf16.mxu1 %v4839_v1 }
  0x88   : > { %v3064_v9 = vpop.permute.xlu0 %420 }
  0x89   : > { %4912 = vst [vmem:[#allocation2_spill] sm:$0xff] %v3064_v9 }
  0x8c   : > { %v3067_v14 = vpop.permute.xlu0 %425 }
  0x8d   : > { %4913 = vst [vmem:[#allocation3_spill] sm:$0xff] %v3067_v14 }
  0xd3   : > { %v509_v10 = vpop.f32.mrf.mxu1 }
  0xd4   : > { %v510_v11 = vadd.f32 %v509_v10, %v3064_v9 }
  0xd5   : > { %v511_v12 = vpop.f32.mrf.mxu1 }
  0xd6   : > { %v526_v13 = vmax.f32 %v510_v11, 0.0  ;;  %v512_v25 = vadd.f32 %v511_v12, %v3064_v9 }
  0xd7   : > { %v515_v15 = vpop.f32.mrf.mxu1 }
  0xd8   : > { %v516_v16 = vadd.f32 %v515_v15, %v3067_v14  ;;  %v532_v17 = vpack.c.bf16 %v526_v13, %v526_v13  ;;  %v527_v26 = vmax.f32 %v512_v25, 0.0  ;;  %v316_v13 = vld [vmem:[%s4836_s5 + $0xe0] sm:$0xff] }
  0xd9   : > { %v517_v18 = vpop.f32.mrf.mxu1 }
  0xda   : > { %v528_v19 = vmax.f32 %v516_v16, 0.0  ;;  %v518_v20 = vadd.f32 %v517_v18, %v3067_v14  ;;  %538 = vxpose.xlu1.c.b16.start.end [1/1] (short) %v532_v17, 128  ;;  %v533_v27 = vpack.c.bf16 %v527_v26, %v527_v26  ;;  %v317_v16 = vld [vmem:[%s4836_s5 + $0xe8] sm:$0xff] }
  0xdb   : > { %v3106_v44 = vpop.f32.mrf.mxu1  ;;  %v313_v17 = vld [vmem:[%s4836_s5 + $0xc8] sm:$0xff] }
  0xdc   : > { %v534_v21 = vpack.c.bf16 %v528_v19, %v528_v19  ;;  %v529_v22 = vmax.f32 %v518_v20, 0.0  ;;  %4914 = vst [vmem:[#allocation4_spill] sm:$0xff] %v3106_v44 }
  0xdd   : > { %v3108_v45 = vpop.f32.mrf.mxu1 }
  0xde   : > { %v535_v23 = vpack.c.bf16 %v529_v22, %v529_v22  ;;  %v620_v24 = vsel %vm618_vm1, %v534_v21, 0  ;;  %4915 = vst [vmem:[#allocation5_spill] sm:$0xff] %v3108_v45  ;;  %v312_v21 = vld [vmem:[%s4836_s5 + $0xc0] sm:$0xff]  ;;  %v318_v22 = vld [vmem:[%s4836_s5 + $0xf0] sm:$0xff] }
  0xe0   : > { %2525 = vmatprep.subr.msk.bf16.mxu1 %vm618_vm1, %v535_v23 }
  0xe1   : > { %640 = vmatpush1.bf16.msra.mxu1 %v620_v24  ;;  %v319_v24 = vld [vmem:[%s4836_s5 + $0xf8] sm:$0xff] }
  0xf7   : > { %554 = vxpose.xlu1.c.b16.start.end [1/1] (short) %v533_v27, 128  ;;  %v299_v27 = vld [vmem:[%s4836_s5 + $0x58] sm:$0xff] }
  0xfb   : > { %2579 = vset.pattern.permute.xlu1 %v4839_v1 }
 0x13c   : > { %v546_v28 = vpop.trf.xlu1 }
 0x13d   : > { %2526 = vmatmul.mubr.msk.bf16.vlgmr.msra.gmra.mxu1 %vm433_vm0, %v546_v28  ;;  %v315_v28 = vld [vmem:[%s4836_s5 + $0xd8] sm:$0xff] }
 0x13e   : > { %667 = vmatprep.mubr.bf16.mxu1 %v4839_v1 }
 0x140   : > { %v547_v29 = vpop.trf.xlu1 }
 0x144   : > { %v548_v30 = vpop.trf.xlu1 }
 0x145   : > { %2527 = vmatmul.mubr.msk.bf16.gmra.mxu1 %vm433_vm0, %v547_v29 }
 0x146   : > { %677 = vmatprep.mubr.bf16.mxu1 %v4839_v1 }
 0x148   : > { %v549_v31 = vpop.trf.xlu1 }
 0x14c   : > { %v550_v32 = vpop.trf.xlu1 }
 0x14d   : > { %2528 = vmatmul.mubr.msk.bf16.gmra.mxu1 %vm433_vm0, %v548_v30 }
 0x14e   : > { %687 = vmatprep.mubr.bf16.mxu1 %v4839_v1 }
 0x150   : > { %v551_v33 = vpop.trf.xlu1 }
 0x154   : > { %v552_v34 = vpop.trf.xlu1 }
 0x155   : > { %2529 = vmatmul.mubr.msk.bf16.gmra.mxu1 %vm433_vm0, %v549_v31 }
 0x156   : > { %697 = vmatprep.mubr.bf16.mxu1 %v4839_v1 }
 0x158   : > { %v553_v35 = vpop.trf.xlu1 }
 0x15c   : > { %v562_v36 = vpop.trf.xlu1 }
 0x15d   : > { %2530 = vmatmul.mubr.msk.bf16.gmra.mxu1 %vm433_vm0, %v550_v32 }
 0x15e   : > { %707 = vmatprep.mubr.bf16.mxu1 %v4839_v1 }
 0x160   : > { %v563_v37 = vpop.trf.xlu1 }
 0x164   : > { %v564_v38 = vpop.trf.xlu1 }
 0x165   : > { %2531 = vmatmul.mubr.msk.bf16.gmra.mxu1 %vm433_vm0, %v551_v33  ;;  %v298_v33 = vld [vmem:[%s4836_s5 + $0x50] sm:$0xff] }
 0x166   : > { %717 = vmatprep.mubr.bf16.mxu1 %v4839_v1 }
 0x168   : > { %v565_v39 = vpop.trf.xlu1 }
 0x16c   : > { %v566_v40 = vpop.trf.xlu1 }
 0x16d   : > { %2532 = vmatmul.mubr.msk.bf16.gmra.mxu1 %vm433_vm0, %v552_v34  ;;  %v314_v34 = vld [vmem:[%s4836_s5 + $0xd0] sm:$0xff] }
 0x16e   : > { %727 = vmatprep.mubr.bf16.mxu1 %v4839_v1 }
 0x170   : > { %v567_v41 = vpop.trf.xlu1 }
 0x174   : > { %v568_v42 = vpop.trf.xlu1 }
 0x175   : > { %2533 = vmatmul.mubr.msk.bf16.gmra.mxu1 %vm433_vm0, %v553_v35 }
 0x176   : > { %737 = vmatprep.mubr.bf16.mxu1 %v4839_v1 }
 0x178   : > { %v569_v43 = vpop.trf.xlu1 }
 0x17d   : > { %2534 = vmatmul.mubr.msk.bf16.gmra.mxu1 %vm433_vm0, %v562_v36 }
 0x17e   : > { %747 = vmatprep.mubr.bf16.mxu1 %v4839_v1 }
 0x185   : > { %2535 = vmatmul.mubr.msk.bf16.gmra.mxu1 %vm433_vm0, %v563_v37 }
 0x186   : > { %757 = vmatprep.mubr.bf16.mxu1 %v4839_v1 }
 0x18d   : > { %2536 = vmatmul.mubr.msk.bf16.gmra.mxu1 %vm433_vm0, %v564_v38 }
 0x18e   : > { %767 = vmatprep.mubr.bf16.mxu1 %v4839_v1 }
 0x195   : > { %2537 = vmatmul.mubr.msk.bf16.gmra.mxu1 %vm433_vm0, %v565_v39 }
 0x196   : > { %777 = vmatprep.mubr.bf16.mxu1 %v4839_v1 }
 0x19d   : > { %2538 = vmatmul.mubr.msk.bf16.gmra.mxu1 %vm433_vm0, %v566_v40  ;;  %v295_v40 = vld [vmem:[%s4836_s5 + $0x38] sm:$0xff] }
 0x19e   : > { %787 = vmatprep.mubr.bf16.mxu1 %v4839_v1 }
 0x1a5   : > { %2539 = vmatmul.mubr.msk.bf16.gmra.mxu1 %vm433_vm0, %v567_v41  ;;  %v309_v41 = vld [vmem:[%s4836_s5 + $0xa8] sm:$0xff] }
 0x1a6   : > { %797 = vmatprep.mubr.bf16.mxu1 %v4839_v1 }
 0x1ad   : > { %2540 = vmatmul.mubr.msk.bf16.gmra.mxu1 %vm433_vm0, %v568_v42 }
 0x1ae   : > { %807 = vmatprep.mubr.bf16.mxu1 %v4839_v1 }
 0x1b5   : > { %2541 = vmatmul.mubr.msk.bf16.gmra.mxu1 %vm433_vm0, %v569_v43 }
 0x1fd   : > { %v3110_v46 = vpop.f32.mrf.mxu1 }
 0x1ff   : > { %v3112_v47 = vpop.f32.mrf.mxu1 }
 0x201   : > { %v3114_v48 = vpop.f32.mrf.mxu1 }
 0x203   : > { %v3116_v49 = vpop.f32.mrf.mxu1 }
 0x205   : > { %v3118_v50 = vpop.f32.mrf.mxu1 }
 0x207   : > { %v3120_v51 = vpop.f32.mrf.mxu1 }
 0x209   : > { %v3122_v52 = vpop.f32.mrf.mxu1 }
 0x20b   : > { %v675_v53 = vpop.f32.mrf.mxu1 }
 0x20d   : > { %v3124_v54 = vpop.f32.mrf.mxu1 }
 0x20f   : > { %v3126_v55 = vpop.f32.mrf.mxu1 }
 0x211   : > { %v683_v56 = vpop.f32.mrf.mxu1 }
 0x212   : > { %v3208_v43 = vadd.f32 %v683_v56, %v298_v33 }
 0x213   : > { %v685_v57 = vpop.f32.mrf.mxu1 }
 0x214   : > { %v3192_v36 = vadd.f32 %v685_v57, %v299_v27  ;;  %v305_v27 = vld [vmem:[%s4836_s5 + $0x88] sm:$0xff] }
 0x215   : > { %v3128_v58 = vpop.f32.mrf.mxu1 }
 0x216   : > { %v833_v56 = vmax.f32 %v3208_v43, %v3192_v36 }
 0x217   : > { %v3130_v59 = vpop.f32.mrf.mxu1 }
 0x219   : > { %v3132_v60 = vpop.f32.mrf.mxu1 }
 0x21b   : > { %v3134_v61 = vpop.f32.mrf.mxu1 }
 0x21d   : > { %v3136_v62 = vpop.f32.mrf.mxu1 }
 0x21f   : > { %v3138_v63 = vpop.f32.mrf.mxu1 }
 0x221   : > { %v3140_v2 = vpop.f32.mrf.mxu1 }
 0x223   : > { %v3142_v3 = vpop.f32.mrf.mxu1 }
 0x225   : > { %v709_v4 = vpop.f32.mrf.mxu1 }
 0x227   : > { %v711_v5 = vpop.f32.mrf.mxu1 }
 0x229   : > { %v3144_v6 = vpop.f32.mrf.mxu1 }
 0x22b   : > { %v715_v7 = vpop.f32.mrf.mxu1 }
 0x22d   : > { %v719_v8 = vpop.f32.mrf.mxu1 }
 0x22e   : > { %v3178_v30 = vadd.f32 %v719_v8, %v312_v21  ;;  %v294_v8 = vld [vmem:[%s4836_s5 + $0x30] sm:$0xff] }
 0x22f   : > { %v721_v10 = vpop.f32.mrf.mxu1  ;;  %v290_v21 = vld [vmem:[%s4836_s5 + $0x10] sm:$0xff] }
 0x230   : > { %v3168_v25 = vadd.f32 %v721_v10, %v313_v17  ;;  %v308_v10 = vld [vmem:[%s4836_s5 + $0xa0] sm:$0xff]  ;;  %v311_v17 = vld [vmem:[%s4836_s5 + $0xb8] sm:$0xff] }
 0x231   : > { %v723_v11 = vpop.f32.mrf.mxu1 }
 0x232   : > { %v854_v39 = vmax.f32 %v3178_v30, %v3168_v25  ;;  %v3210_v57 = vadd.f32 %v723_v11, %v314_v34  ;;  %v3275_v34 = vadd.f32 %v3138_v63, %v305_v27  ;;  %v306_v63 = vld [vmem:[%s4836_s5 + $0x90] sm:$0xff] }
 0x233   : > { %v725_v12 = vpop.f32.mrf.mxu1 }
 0x234   : > { %v3194_v37 = vadd.f32 %v725_v12, %v315_v28 }
 0x235   : > { %v729_v15 = vpop.f32.mrf.mxu1 }
 0x236   : > { %v3155_v19 = vadd.f32 %v729_v15, %v316_v13  ;;  %v3220_v13 = vadd.f32 %v675_v53, %v295_v40  ;;  %v3222_v15 = vadd.f32 %v711_v5, %v309_v41  ;;  %v857_v11 = vmax.f32 %v3210_v57, %v3194_v37 }
 0x237   : > { %v731_v18 = vpop.f32.mrf.mxu1  ;;  %v3237_v53 = vadd.f32 %v3122_v52, %v294_v8  ;;  %v3239_v5 = vadd.f32 %v709_v4, %v308_v10 }
 0x238   : > { %v3157_v20 = vadd.f32 %v731_v18, %v317_v16  ;;  %4916 = vst [vmem:[#allocation6_spill] sm:$0xff] %v3220_v13  ;;  %v291_v16 = vld [vmem:[%s4836_s5 + $0x18] sm:$0xff] }
 0x239   : > { %v733_v23 = vpop.f32.mrf.mxu1  ;;  %4917 = vst [vmem:[#allocation7_spill] sm:$0xff] %v3237_v53  ;;  %v827_v52 = vmax.f32 %v3237_v53, %v3220_v13  ;;  %v848_v4 = vmax.f32 %v3239_v5, %v3222_v15 }
 0x23a   : > { %v860_v26 = vmax.f32 %v3155_v19, %v3157_v20  ;;  %v3180_v31 = vadd.f32 %v733_v23, %v318_v22  ;;  %v310_v22 = vld [vmem:[%s4836_s5 + $0xb0] sm:$0xff] }
 0x23b   : > { %v735_v29 = vpop.f32.mrf.mxu1 }
 0x23c   : > { %v3182_v32 = vadd.f32 %v735_v29, %v319_v24  ;;  %861 = vmax.xlane.f32.xlu0 %v860_v26  ;;  %v3250_v24 = vadd.f32 %v3116_v49, %v291_v16  ;;  %v3252_v26 = vadd.f32 %v715_v7, %v311_v17  ;;  %v3264_v29 = vadd.f32 %v3114_v48, %v290_v21  ;;  %v304_v7 = vld [vmem:[%s4836_s5 + $0x80] sm:$0xff] }
 0x23d   : > { %v3190_v35 = vpop.f32.mrf.mxu1  ;;  %v3267_v49 = vadd.f32 %v3144_v6, %v310_v22  ;;  %v307_v6 = vld [vmem:[%s4836_s5 + $0x98] sm:$0xff]  ;;  %v3287_v40 = vadd.f32 %v3136_v62, %v304_v7  ;;  %v300_v16 = vld [vmem:[%s4836_s5 + $0x60] sm:$0xff] }
 0x23e   : > { %v863_v38 = vmax.f32 %v3180_v31, %v3182_v32  ;;  %4918 = vst [vmem:[#allocation8_spill] sm:$0xff] %v3250_v24  ;;  %4919 = vst [vmem:[#allocation9_spill] sm:$0xff] %v3264_v29  ;;  %v3295_v8 = vadd.f32 %v3142_v3, %v307_v6  ;;  %v303_v22 = vld [vmem:[%s4836_s5 + $0x78] sm:$0xff]  ;;  %v296_v6 = vld [vmem:[%s4836_s5 + $0x40] sm:$0xff] }
 0x23f   : > { %v3206_v42 = vpop.f32.mrf.mxu1  ;;  %v851_v48 = vmax.f32 %v3267_v49, %v3252_v26  ;;  %v842_v10 = vmax.f32 %v3287_v40, %v3275_v34 }
 0x240   : > { %864 = vmax.xlane.f32.xlu1 %v863_v38  ;;  %855 = vmax.xlane.f32.xlu0 %v854_v39  ;;  %v821_v38 = vmax.f32 %v3264_v29, %v3250_v24  ;;  %v350_v24 = vld [vmem:[%s4836_s5 + $0x1f0] sm:$0xff] }
 0x241   : > { %v3218_v12 = vpop.f32.mrf.mxu1 }
 0x243   : > { %v3234_v18 = vpop.f32.mrf.mxu1 }
 0x244   : > { %834 = vmax.xlane.f32.xlu1 %v833_v56  ;;  %858 = vmax.xlane.f32.xlu0 %v857_v11  ;;  %v301_v56 = vld [vmem:[%s4836_s5 + $0x68] sm:$0xff]  ;;  %v3305_v11 = vadd.f32 %v3140_v2, %v306_v63  ;;  %v3323_v2 = vadd.f32 %v3128_v58, %v300_v16 }
 0x245   : > { %v3247_v23 = vpop.f32.mrf.mxu1  ;;  %v3313_v3 = vadd.f32 %v3130_v59, %v301_v56  ;;  %v3331_v59 = vadd.f32 %v3134_v61, %v303_v22  ;;  %v293_v56 = vld [vmem:[%s4836_s5 + $0x28] sm:$0xff] }
 0x246   : > { %v845_v21 = vmax.f32 %v3305_v11, %v3295_v8 }
 0x247   : > { %v3261_v28 = vpop.f32.mrf.mxu1  ;;  %4920 = vst [vmem:[#allocation10_spill] sm:$0xff] %v3331_v59  ;;  %v836_v7 = vmax.f32 %v3323_v2, %v3313_v3 }
 0x248   : > { %828 = vmax.xlane.f32.xlu1 %v827_v52  ;;  %849 = vmax.xlane.f32.xlu0 %v848_v4  ;;  %v302_v4 = vld [vmem:[%s4836_s5 + $0x70] sm:$0xff] }
 0x249   : > { %v3272_v33 = vpop.f32.mrf.mxu1  ;;  %v3341_v58 = vadd.f32 %v3132_v60, %v302_v4  ;;  %v3359_v60 = vadd.f32 %v3124_v54, %v296_v6  ;;  %v288_v6 = vld [vmem:[%s4836_s5] sm:$0xff] }
 0x24a   : > { %v3388_v0 = vadd.f32 %v3110_v46, %v288_v6  ;;  %v349_v46 = vld [vmem:[%s4836_s5 + $0x1e8] sm:$0xff] }
 0x24b   : > { %v3284_v39 = vpop.f32.mrf.mxu1  ;;  %4922 = vst [vmem:[#allocation12_spill] sm:$0xff] %v3359_v60  ;;  %v345_v6 = vld [vmem:[%s4836_s5 + $0x1c8] sm:$0xff] }
 0x24c   : > { %822 = vmax.xlane.f32.xlu1 %v821_v38  ;;  %852 = vmax.xlane.f32.xlu0 %v851_v48  ;;  %v297_v38 = vld [vmem:[%s4836_s5 + $0x48] sm:$0xff]  ;;  %4926 = vst [vmem:[#allocation16_spill] sm:$0xff] %v3388_v0 }
 0x24d   : > { %v3292_v41 = vpop.f32.mrf.mxu1  ;;  %v3349_v61 = vadd.f32 %v3126_v55, %v297_v38  ;;  %v3367_v55 = vadd.f32 %v3120_v51, %v293_v56 }
 0x24f   : > { %v3302_v62 = vpop.f32.mrf.mxu1  ;;  %4921 = vst [vmem:[#allocation11_spill] sm:$0xff] %v3349_v61  ;;  %4923 = vst [vmem:[#allocation13_spill] sm:$0xff] %v3367_v55  ;;  %v830_v4 = vmax.f32 %v3359_v60, %v3349_v61  ;;  %v351_v61 = vld [vmem:[%s4836_s5 + $0x1f8] sm:$0xff] }
 0x250   : > { %843 = vmax.xlane.f32.xlu0 %v842_v10  ;;  %v839_v10 = vmax.f32 %v3341_v58, %v3331_v59 }
 0x251   : > { %v3310_v17 = vpop.f32.mrf.mxu1 }
 0x253   : > { %v3320_v52 = vpop.f32.mrf.mxu1 }
 0x254   : > { %846 = vmax.xlane.f32.xlu0 %v845_v21  ;;  %v292_v21 = vld [vmem:[%s4836_s5 + $0x20] sm:$0xff] }
 0x255   : > { %v3328_v27 = vpop.f32.mrf.mxu1  ;;  %v3375_v54 = vadd.f32 %v3118_v50, %v292_v21 }
 0x257   : > { %v3338_v48 = vpop.f32.mrf.mxu1  ;;  %4924 = vst [vmem:[#allocation14_spill] sm:$0xff] %v3375_v54  ;;  %v824_v56 = vmax.f32 %v3375_v54, %v3367_v55  ;;  %v348_v55 = vld [vmem:[%s4836_s5 + $0x1e0] sm:$0xff] }
 0x258   : > { %837 = vmax.xlane.f32.xlu0 %v836_v7  ;;  %v289_v7 = vld [vmem:[%s4836_s5 + $0x8] sm:$0xff] }
 0x259   : > { %v3346_v63 = vpop.f32.mrf.mxu1  ;;  %v3383_v51 = vadd.f32 %v3112_v47, %v289_v7 }
 0x25b   : > { %v3356_v16 = vpop.f32.mrf.mxu1  ;;  %4925 = vst [vmem:[#allocation15_spill] sm:$0xff] %v3383_v51  ;;  %v818_v21 = vmax.f32 %v3388_v0, %v3383_v51  ;;  %v344_v0 = vld [vmem:[%s4836_s5 + $0x1c0] sm:$0xff] }
 0x25c   : > { %840 = vmax.xlane.f32.xlu0 %v839_v10 }
 0x25d   : > { %v3364_v22 = vpop.f32.mrf.mxu1 }
 0x25f   : > { %v781_v38 = vpop.f32.mrf.mxu1 }
 0x260   : > { %831 = vmax.xlane.f32.xlu0 %v830_v4 }
 0x261   : > { %v3380_v10 = vpop.f32.mrf.mxu1 }
 0x263   : > { %v785_v1 = vpop.f32.mrf.mxu1 }
 0x264   : > { %825 = vmax.xlane.f32.xlu0 %v824_v56 }
 0x265   : > { %v789_v50 = vpop.f32.mrf.mxu1 }
 0x267   : > { %v791_v4 = vpop.f32.mrf.mxu1 }
 0x268   : > { %819 = vmax.xlane.f32.xlu0 %v818_v21 }
 0x269   : > { %v793_v14 = vpop.f32.mrf.mxu1 }
 0x26b   : > { %v795_v9 = vpop.f32.mrf.mxu1 }
 0x26d   : > { %v799_v44 = vpop.f32.mrf.mxu1 }
 0x26e   : > { %v3424_v13 = vadd.f32 %v799_v44, %v344_v0 }
 0x26f   : > { %v801_v45 = vpop.f32.mrf.mxu1 }
 0x270   : > { %v3414_v60 = vadd.f32 %v801_v45, %v345_v6  ;;  %v340_v45 = vld [vmem:[%s4836_s5 + $0x1a0] sm:$0xff]  ;;  %v346_v6 = vld [vmem:[%s4836_s5 + $0x1d0] sm:$0xff] }
 0x271   : > { %v803_v47 = vpop.f32.mrf.mxu1 }
 0x272   : > { %v902_v44 = vmax.f32 %v3424_v13, %v3414_v60 }
 0x273   : > { %v805_v7 = vpop.f32.mrf.mxu1 }
 0x275   : > { %v809_v54 = vpop.f32.mrf.mxu1 }
 0x276   : > { %v3401_v21 = vadd.f32 %v809_v54, %v348_v55  ;;  %v341_v54 = vld [vmem:[%s4836_s5 + $0x1a8] sm:$0xff] }
 0x277   : > { %v811_v56 = vpop.f32.mrf.mxu1 }
 0x278   : > { %4927 = vst [vmem:[#allocation17_spill] sm:$0xff] %v3401_v21  ;;  %v3403_v51 = vadd.f32 %v811_v56, %v349_v46  ;;  %v347_v46 = vld [vmem:[%s4836_s5 + $0x1d8] sm:$0xff] }
 0x279   : > { %v813_v29 = vpop.f32.mrf.mxu1 }
 0x27a   : > { %4928 = vst [vmem:[#allocation18_spill] sm:$0xff] %v3403_v51  ;;  %v908_v55 = vmax.f32 %v3401_v21, %v3403_v51  ;;  %v3426_v53 = vadd.f32 %v813_v29, %v350_v24  ;;  %v3436_v51 = vadd.f32 %v791_v4, %v341_v54  ;;  %v3438_v21 = vadd.f32 %v805_v7, %v347_v46  ;;  %v337_v24 = vld [vmem:[%s4836_s5 + $0x188] sm:$0xff]  ;;  %v343_v29 = vld [vmem:[%s4836_s5 + $0x1b8] sm:$0xff]  ;;  %v336_v7 = vld [vmem:[%s4836_s5 + $0x180] sm:$0xff] }
 0x27b   : > { %v815_v56 = vpop.f32.mrf.mxu1  ;;  %v3452_v4 = vadd.f32 %v803_v47, %v346_v6  ;;  %v3460_v54 = vadd.f32 %v781_v38, %v337_v24  ;;  %v3462_v46 = vadd.f32 %v795_v9, %v343_v29  ;;  %v3475_v6 = vadd.f32 %v3364_v22, %v336_v7  ;;  %v332_v9 = vld [vmem:[%s4836_s5 + $0x160] sm:$0xff]  ;;  %v329_v29 = vld [vmem:[%s4836_s5 + $0x148] sm:$0xff]  ;;  %v335_v7 = vld [vmem:[%s4836_s5 + $0x178] sm:$0xff] }
 0x27c   : > { %v3428_v59 = vadd.f32 %v815_v56, %v351_v61  ;;  %909 = vmax.xlane.f32.xlu0 %v908_v55  ;;  %v3450_v61 = vadd.f32 %v789_v50, %v340_v45  ;;  %v342_v55 = vld [vmem:[%s4836_s5 + $0x1b0] sm:$0xff]  ;;  %v333_v56 = vld [vmem:[%s4836_s5 + $0x168] sm:$0xff]  ;;  %v339_v45 = vld [vmem:[%s4836_s5 + $0x198] sm:$0xff] }
 0x27d   : > { %v905_v50 = vmax.f32 %v3452_v4, %v3438_v21  ;;  %v3477_v38 = vadd.f32 %v793_v14, %v342_v55  ;;  %v3488_v24 = vadd.f32 %v785_v1, %v339_v45  ;;  %v890_v14 = vmax.f32 %v3475_v6, %v3460_v54  ;;  %v325_v45 = vld [vmem:[%s4836_s5 + $0x128] sm:$0xff] }
 0x27e   : > { %v911_v0 = vmax.f32 %v3426_v53, %v3428_v59  ;;  %v896_v47 = vmax.f32 %v3450_v61, %v3436_v51  ;;  %v3501_v55 = vadd.f32 %v3328_v27, %v332_v9  ;;  %v331_v9 = vld [vmem:[%s4836_s5 + $0x158] sm:$0xff] }
 0x27f   : > { %v899_v22 = vmax.f32 %v3477_v38, %v3462_v46 }
 0x280   : > { %912 = vmax.xlane.f32.xlu1 %v911_v0  ;;  %903 = vmax.xlane.f32.xlu0 %v902_v44  ;;  %v338_v0 = vld [vmem:[%s4836_s5 + $0x190] sm:$0xff]  ;;  %v3486_v44 = vadd.f32 %v3338_v48, %v333_v56  ;;  %v328_v48 = vld [vmem:[%s4836_s5 + $0x140] sm:$0xff]  ;;  %v3516_v56 = vadd.f32 %v3356_v16, %v335_v7  ;;  %v321_v7 = vld [vmem:[%s4836_s5 + $0x108] sm:$0xff] }
 0x281   : > { %v3504_v1 = vadd.f32 %v3380_v10, %v338_v0  ;;  %v324_v0 = vld [vmem:[%s4836_s5 + $0x120] sm:$0xff] }
 0x282   : > { %v884_v10 = vmax.f32 %v3501_v55, %v3486_v44 }
 0x283   : > { %v893_v27 = vmax.f32 %v3504_v1, %v3488_v24 }
 0x284   : > { %906 = vmax.xlane.f32.xlu1 %v905_v50  ;;  %897 = vmax.xlane.f32.xlu0 %v896_v47  ;;  %v334_v50 = vld [vmem:[%s4836_s5 + $0x170] sm:$0xff]  ;;  %v3513_v47 = vadd.f32 %v3302_v62, %v329_v29  ;;  %v3529_v62 = vadd.f32 %v3292_v41, %v328_v48  ;;  %v3544_v29 = vadd.f32 %v3320_v52, %v331_v9  ;;  %v327_v48 = vld [vmem:[%s4836_s5 + $0x138] sm:$0xff] }
 0x285   : > { %v3532_v16 = vadd.f32 %v3346_v63, %v334_v50  ;;  %v320_v50 = vld [vmem:[%s4836_s5 + $0x100] sm:$0xff]  ;;  %v323_v9 = vld [vmem:[%s4836_s5 + $0x118] sm:$0xff] }
 0x286   : > { %v878_v63 = vmax.f32 %v3529_v62, %v3513_v47 }
 0x287   : > { %v887_v41 = vmax.f32 %v3532_v16, %v3516_v56 }
 0x288   : > { %900 = vmax.xlane.f32.xlu1 %v899_v22  ;;  %891 = vmax.xlane.f32.xlu0 %v890_v14  ;;  %v330_v22 = vld [vmem:[%s4836_s5 + $0x150] sm:$0xff]  ;;  %v3541_v14 = vadd.f32 %v3261_v28, %v325_v45  ;;  %v3557_v28 = vadd.f32 %v3247_v23, %v324_v0  ;;  %v3572_v45 = vadd.f32 %v3284_v39, %v327_v48 }
 0x289   : > { %v3560_v52 = vadd.f32 %v3310_v17, %v330_v22  ;;  %v3582_v0 = vadd.f32 %v3190_v35, %v320_v50  ;;  %v3591_v39 = vadd.f32 %v3234_v18, %v323_v9 }
 0x28a   : > { %v872_v17 = vmax.f32 %v3557_v28, %v3541_v14 }
 0x28b   : > { %v881_v23 = vmax.f32 %v3560_v52, %v3544_v29  ;;  %4929 = vst [vmem:[#allocation19_spill] sm:$0xff] %v3591_v39 }
 0x28c   : > { %894 = vmax.xlane.f32.xlu1 %v893_v27  ;;  %885 = vmax.xlane.f32.xlu0 %v884_v10  ;;  %v326_v27 = vld [vmem:[%s4836_s5 + $0x130] sm:$0xff]  ;;  %v3569_v10 = vadd.f32 %v3206_v42, %v321_v7 }
 0x28d   : > { %v3585_v22 = vadd.f32 %v3272_v33, %v326_v27  ;;  %v322_v42 = vld [vmem:[%s4836_s5 + $0x110] sm:$0xff] }
 0x28e   : > { %v3598_v35 = vadd.f32 %v3218_v12, %v322_v42 }
 0x290   : > { %888 = vmax.xlane.f32.xlu1 %v887_v41  ;;  %879 = vmax.xlane.f32.xlu0 %v878_v63  ;;  %v875_v41 = vmax.f32 %v3585_v22, %v3572_v45  ;;  %v866_v63 = vmax.f32 %v3582_v0, %v3569_v10  ;;  %4930 = vst [vmem:[#allocation20_spill] sm:$0xff] %v3598_v35 }
 0x291   : > { %v869_v33 = vmax.f32 %v3598_v35, %v3591_v39 }
 0x294   : > { %882 = vmax.xlane.f32.xlu1 %v881_v23  ;;  %873 = vmax.xlane.f32.xlu0 %v872_v17 }
 0x298   : > { %876 = vmax.xlane.f32.xlu1 %v875_v41  ;;  %867 = vmax.xlane.f32.xlu0 %v866_v63 }
 0x29c   : > { %870 = vmax.xlane.f32.xlu1 %v869_v33 }
 0x2c5   : > { %v862_v7 = vpop.xlane.xlu0 %861 }
 0x2c6   : > { %v942_v48 = vsub.f32 %v3155_v19, %v862_v7  ;;  %v943_v18 = vsub.f32 %v3157_v20, %v862_v7 }
 0x2c8   : > { %v1034_v50 = vmul.f32 1.442695, %v942_v48  ;;  %v1036_v27 = vmul.f32 1.442695, %v943_v18 }
 0x2c9   : > { %v856_v23 = vpop.xlane.xlu0 %855  ;;  %v865_v17 = vpop.xlane.xlu1 %864 }
 0x2ca   : > { %v938_v9 = vsub.f32 %v3178_v30, %v856_v23  ;;  %v939_v12 = vsub.f32 %v3168_v25, %v856_v23  ;;  %v944_v42 = vsub.f32 %v3180_v31, %v865_v17  ;;  %v945_v41 = vsub.f32 %v3182_v32, %v865_v17 }
 0x2cb   : > { %2580 = vpow2.f32 %v1034_v50 }
 0x2cc   : > { %v1026_v63 = vmul.f32 1.442695, %v938_v9  ;;  %v1028_v33 = vmul.f32 1.442695, %v939_v12  ;;  %v1038_v39 = vmul.f32 1.442695, %v944_v42  ;;  %2582 = vpow2.f32 %v1036_v27 }
 0x2cd   : > { %v1040_v19 = vmul.f32 1.442695, %v945_v41  ;;  %v859_v35 = vpop.xlane.xlu0 %858 }
 0x2ce   : > { %2584 = vpow2.f32 %v1026_v63  ;;  %v940_v20 = vsub.f32 %v3210_v57, %v859_v35  ;;  %v941_v7 = vsub.f32 %v3194_v37, %v859_v35  ;;  %v835_v63 = vpop.xlane.xlu1 %834 }
 0x2cf   : > { %2586 = vpow2.f32 %v1028_v33 }
 0x2d0   : > { %2588 = vpow2.f32 %v1038_v39  ;;  %v1030_v30 = vmul.f32 1.442695, %v940_v20  ;;  %v1032_v25 = vmul.f32 1.442695, %v941_v7 }
 0x2d1   : > { %2590 = vpow2.f32 %v1040_v19  ;;  %v850_v31 = vpop.xlane.xlu0 %849 }
 0x2d2   : > { %2592 = vpow2.f32 %v1030_v30  ;;  %v934_v32 = vsub.f32 %v3239_v5, %v850_v31  ;;  %v935_v48 = vsub.f32 %v3222_v15, %v850_v31 }
 0x2d3   : > { %2594 = vpow2.f32 %v1032_v25 }
 0x2d4   : > { %v1018_v18 = vmul.f32 1.442695, %v934_v32  ;;  %v1020_v50 = vmul.f32 1.442695, %v935_v48  ;;  %v924_v48 = vsub.f32 %v3208_v43, %v835_v63 }
 0x2d5   : > { %v853_v27 = vpop.xlane.xlu0 %852 }
 0x2d6   : > { %2596 = vpow2.f32 %v1018_v18  ;;  %v936_v57 = vsub.f32 %v3267_v49, %v853_v27  ;;  %v937_v37 = vsub.f32 %v3252_v26, %v853_v27 }
 0x2d7   : > { %2598 = vpow2.f32 %v1020_v50 }
 0x2d8   : > { %v1022_v39 = vmul.f32 1.442695, %v936_v57  ;;  %v1024_v35 = vmul.f32 1.442695, %v937_v37  ;;  %v3614_v23 = vpop.eup %2580  ;;  %v829_v37 = vpop.xlane.xlu1 %828 }
 0x2d9   : > { %v844_v17 = vpop.xlane.xlu0 %843  ;;  %v3616_v9 = vpop.eup %2582 }
 0x2da   : > { %2600 = vpow2.f32 %v1022_v39  ;;  %v930_v15 = vsub.f32 %v3287_v40, %v844_v17  ;;  %v931_v5 = vsub.f32 %v3275_v34, %v844_v17  ;;  %v925_v17 = vsub.f32 %v3192_v36, %v835_v63 }
 0x2db   : > { %v3620_v12 = vpop.eup %2584  ;;  %2602 = vpow2.f32 %v1024_v35 }
 0x2dc   : > { %v3622_v42 = vpop.eup %2586  ;;  %v1010_v49 = vmul.f32 1.442695, %v930_v15  ;;  %v1012_v26 = vmul.f32 1.442695, %v931_v5  ;;  %v998_v15 = vmul.f32 1.442695, %v924_v48  ;;  %v823_v48 = vpop.xlane.xlu1 %822 }
 0x2dd   : > { %v3624_v41 = vpop.eup %2588  ;;  %v847_v33 = vpop.xlane.xlu0 %846  ;;  %v1142_v19 = vadd.f32 %v3622_v42, %v3620_v12 }
 0x2de   : > { %v3628_v20 = vpop.eup %2590  ;;  %2604 = vpow2.f32 %v1010_v49  ;;  %v932_v40 = vsub.f32 %v3305_v11, %v847_v33  ;;  %v933_v34 = vsub.f32 %v3295_v8, %v847_v33  ;;  %v1148_v11 = vadd.f32 %v3616_v9, %v3614_v23 }
 0x2df   : > { %v3632_v7 = vpop.eup %2592  ;;  %2606 = vpow2.f32 %v1012_v26  ;;  %1143 = vadd.xlane.f32.xlu0 %v1142_v19  ;;  %v1151_v30 = vadd.f32 %v3628_v20, %v3624_v41 }
 0x2e0   : > { %v3636_v25 = vpop.eup %2594  ;;  %v1014_v31 = vmul.f32 1.442695, %v932_v40  ;;  %v1016_v32 = vmul.f32 1.442695, %v933_v34  ;;  %v4932_v40 = vld [vmem:[#allocation7_spill] sm:$0xff] }
 0x2e1   : > { %1152 = vadd.xlane.f32.xlu1 %v1151_v30  ;;  %v838_v18 = vpop.xlane.xlu0 %837  ;;  %v1145_v8 = vadd.f32 %v3636_v25, %v3632_v7  ;;  %v920_v34 = vsub.f32 %v4932_v40, %v829_v37  ;;  %v1000_v30 = vmul.f32 1.442695, %v925_v17  ;;  %v4936_v17 = vld [vmem:[#allocation9_spill] sm:$0xff] }
 0x2e2   : > { %2608 = vpow2.f32 %v1014_v31  ;;  %v926_v50 = vsub.f32 %v3323_v2, %v838_v18  ;;  %v927_v27 = vsub.f32 %v3313_v3, %v838_v18  ;;  %v4931_v2 = vld [vmem:[#allocation10_spill] sm:$0xff] }
 0x2e3   : > { %v3645_v57 = vpop.eup %2596  ;;  %2610 = vpow2.f32 %v1016_v32  ;;  %1149 = vadd.xlane.f32.xlu0 %v1148_v11  ;;  %v4933_v31 = vld [vmem:[#allocation6_spill] sm:$0xff]  ;;  %v4934_v11 = vld [vmem:[#allocation12_spill] sm:$0xff] }
 0x2e4   : > { %v3647_v39 = vpop.eup %2598  ;;  %v1002_v43 = vmul.f32 1.442695, %v926_v50  ;;  %v1004_v35 = vmul.f32 1.442695, %v927_v27  ;;  %v921_v32 = vsub.f32 %v4933_v31, %v829_v37  ;;  %v4935_v50 = vld [vmem:[#allocation11_spill] sm:$0xff]  ;;  %v4938_v31 = vld [vmem:[#allocation14_spill] sm:$0xff] }
 0x2e5   : > { %1146 = vadd.xlane.f32.xlu1 %v1145_v8  ;;  %v841_v5 = vpop.xlane.xlu0 %840  ;;  %v1136_v49 = vadd.f32 %v3647_v39, %v3645_v57 }
 0x2e6   : > { %2612 = vpow2.f32 %v1002_v43  ;;  %v928_v3 = vsub.f32 %v3341_v58, %v841_v5  ;;  %v929_v26 = vsub.f32 %v4931_v2, %v841_v5  ;;  %v916_v5 = vsub.f32 %v4936_v17, %v823_v48  ;;  %v4937_v2 = vld [vmem:[#allocation8_spill] sm:$0xff] }
 0x2e7   : > { %v3654_v33 = vpop.eup %2600  ;;  %2614 = vpow2.f32 %v1004_v35  ;;  %1137 = vadd.xlane.f32.xlu0 %v1136_v49  ;;  %v4940_v17 = vld [vmem:[#allocation16_spill] sm:$0xff] }
 0x2e8   : > { %v3656_v19 = vpop.eup %2602  ;;  %v1006_v36 = vmul.f32 1.442695, %v928_v3  ;;  %v1008_v63 = vmul.f32 1.442695, %v929_v26  ;;  %2616 = vpow2.f32 %v998_v15  ;;  %v990_v15 = vmul.f32 1.442695, %v920_v34 }
 0x2e9   : > { %v832_v18 = vpop.xlane.xlu0 %831  ;;  %v1139_v58 = vadd.f32 %v3656_v19, %v3654_v33  ;;  %v992_v3 = vmul.f32 1.442695, %v921_v32  ;;  %v917_v26 = vsub.f32 %v4937_v2, %v823_v48  ;;  %v4941_v2 = vld [vmem:[#allocation15_spill] sm:$0xff] }
 0x2ea   : > { %2618 = vpow2.f32 %v1006_v36  ;;  %v922_v8 = vsub.f32 %v4934_v11, %v832_v18  ;;  %v923_v27 = vsub.f32 %v4935_v50, %v832_v18 }
 0x2eb   : > { %v3664_v43 = vpop.eup %2604  ;;  %2620 = vpow2.f32 %v1008_v63  ;;  %1140 = vadd.xlane.f32.xlu1 %v1139_v58  ;;  %v4939_v63 = vld [vmem:[#allocation13_spill] sm:$0xff]  ;;  %v984_v48 = vmul.f32 1.442695, %v917_v26 }
 0x2ec   : > { %v3666_v35 = vpop.eup %2606  ;;  %v994_v37 = vmul.f32 1.442695, %v922_v8  ;;  %v996_v49 = vmul.f32 1.442695, %v923_v27  ;;  %2622 = vpow2.f32 %v1000_v30  ;;  %v982_v30 = vmul.f32 1.442695, %v916_v5 }
 0x2ed   : > { %v826_v40 = vpop.xlane.xlu0 %825  ;;  %v1130_v36 = vadd.f32 %v3666_v35, %v3664_v43 }
 0x2ee   : > { %2624 = vpow2.f32 %v994_v37  ;;  %v918_v18 = vsub.f32 %v4938_v31, %v826_v40  ;;  %v919_v58 = vsub.f32 %v4939_v63, %v826_v40 }
 0x2ef   : > { %v3674_v11 = vpop.eup %2608  ;;  %2626 = vpow2.f32 %v996_v49  ;;  %1131 = vadd.xlane.f32.xlu0 %v1130_v36 }
 0x2f0   : > { %v3676_v34 = vpop.eup %2610  ;;  %2628 = vpow2.f32 %v990_v15  ;;  %v986_v32 = vmul.f32 1.442695, %v918_v18  ;;  %v988_v8 = vmul.f32 1.442695, %v919_v58 }
 0x2f1   : > { %2630 = vpow2.f32 %v992_v3  ;;  %v820_v50 = vpop.xlane.xlu0 %819  ;;  %v1133_v27 = vadd.f32 %v3676_v34, %v3674_v11 }
 0x2f2   : > { %2632 = vpow2.f32 %v986_v32  ;;  %v914_v37 = vsub.f32 %v4940_v17, %v820_v50  ;;  %v915_v40 = vsub.f32 %v4941_v2, %v820_v50 }
 0x2f3   : > { %v3682_v31 = vpop.eup %2612  ;;  %2634 = vpow2.f32 %v988_v8  ;;  %1134 = vadd.xlane.f32.xlu1 %v1133_v27 }
 0x2f4   : > { %4942 = vst [vmem:[#allocation10_spill] sm:$0xff] %v3682_v31  ;;  %v3684_v49 = vpop.eup %2614  ;;  %2636 = vpow2.f32 %v982_v30  ;;  %v978_v15 = vmul.f32 1.442695, %v914_v37  ;;  %v980_v5 = vmul.f32 1.442695, %v915_v40 }
 0x2f5   : > { %2638 = vpow2.f32 %v984_v48  ;;  %v1124_v3 = vadd.f32 %v3684_v49, %v3682_v31  ;;  %v3688_v26 = vpop.eup %2616 }
 0x2f6   : > { %4943 = vst [vmem:[#allocation7_spill] sm:$0xff] %v3688_v26  ;;  %2640 = vpow2.f32 %v978_v15 }
 0x2f7   : > { %v3690_v36 = vpop.eup %2618  ;;  %2642 = vpow2.f32 %v980_v5  ;;  %1125 = vadd.xlane.f32.xlu0 %v1124_v3 }
 0x2f8   : > { %4944 = vst [vmem:[#allocation6_spill] sm:$0xff] %v3690_v36  ;;  %v3692_v18 = vpop.eup %2620 }
 0x2f9   : > { %v1127_v63 = vadd.f32 %v3692_v18, %v3690_v36  ;;  %v3696_v58 = vpop.eup %2622 }
 0x2fa   : > { %4945 = vst [vmem:[#allocation12_spill] sm:$0xff] %v3696_v58  ;;  %v1121_v50 = vadd.f32 %v3696_v58, %v3688_v26  ;;  %v4955_v58 = vld [vmem:[#allocation17_spill] sm:$0xff] }
 0x2fb   : > { %v3698_v30 = vpop.eup %2624  ;;  %1128 = vadd.xlane.f32.xlu1 %v1127_v63 }
 0x2fc   : > { %4946 = vst [vmem:[#allocation11_spill] sm:$0xff] %v3698_v30  ;;  %v3700_v32 = vpop.eup %2626 }
 0x2fd   : > { %4947 = vst [vmem:[#allocation9_spill] sm:$0xff] %v3700_v32  ;;  %v3702_v8 = vpop.eup %2628  ;;  %v1118_v48 = vadd.f32 %v3700_v32, %v3698_v30 }
 0x2fe   : > { %4948 = vst [vmem:[#allocation8_spill] sm:$0xff] %v3702_v8  ;;  %v3708_v27 = vpop.eup %2630 }
 0x2ff   : > { %4949 = vst [vmem:[#allocation14_spill] sm:$0xff] %v3708_v27  ;;  %v3710_v17 = vpop.eup %2632  ;;  %1119 = vadd.xlane.f32.xlu0 %v1118_v48  ;;  %1122 = vadd.xlane.f32.xlu1 %v1121_v50  ;;  %v1115_v15 = vadd.f32 %v3708_v27, %v3702_v8 }
 0x300   : > { %4950 = vst [vmem:[#allocation13_spill] sm:$0xff] %v3710_v17  ;;  %v3712_v37 = vpop.eup %2634 }
 0x301   : > { %4951 = vst [vmem:[#allocation16_spill] sm:$0xff] %v3712_v37  ;;  %v3714_v2 = vpop.eup %2636  ;;  %v1112_v40 = vadd.f32 %v3712_v37, %v3710_v17  ;;  %v4956_v37 = vld [vmem:[#allocation18_spill] sm:$0xff] }
 0x302   : > { %4952 = vst [vmem:[#allocation15_spill] sm:$0xff] %v3714_v2  ;;  %v3720_v5 = vpop.eup %2638 }
 0x303   : > { %4953 = vst [vmem:[#allocation21_spill] sm:$0xff] %v3720_v5  ;;  %v3722_v3 = vpop.eup %2640  ;;  %1113 = vadd.xlane.f32.xlu0 %v1112_v40  ;;  %1116 = vadd.xlane.f32.xlu1 %v1115_v15  ;;  %v1109_v26 = vadd.f32 %v3720_v5, %v3714_v2 }
 0x304   : > { %4954 = vst [vmem:[#allocation22_spill] sm:$0xff] %v3722_v3  ;;  %v3724_v63 = vpop.eup %2642 }
 0x305   : > { %v910_v48 = vpop.xlane.xlu0 %909  ;;  %v1106_v50 = vadd.f32 %v3724_v63, %v3722_v3 }
 0x306   : > { %v974_v17 = vsub.f32 %v4955_v58, %v910_v48  ;;  %v975_v30 = vsub.f32 %v4956_v37, %v910_v48 }
 0x307   : > { %1107 = vadd.xlane.f32.xlu0 %v1106_v50  ;;  %1110 = vadd.xlane.f32.xlu1 %v1109_v26 }
 0x308   : > { %v1098_v8 = vmul.f32 1.442695, %v974_v17  ;;  %v1100_v27 = vmul.f32 1.442695, %v975_v30 }
 0x309   : > { %v904_v32 = vpop.xlane.xlu0 %903  ;;  %v913_v40 = vpop.xlane.xlu1 %912 }
 0x30a   : > { %v970_v15 = vsub.f32 %v3424_v13, %v904_v32  ;;  %v971_v36 = vsub.f32 %v3414_v60, %v904_v32  ;;  %v976_v31 = vsub.f32 %v3426_v53, %v913_v40  ;;  %v977_v3 = vsub.f32 %v3428_v59, %v913_v40 }
 0x30b   : > { %2644 = vpow2.f32 %v1098_v8 }
 0x30c   : > { %v1090_v2 = vmul.f32 1.442695, %v970_v15  ;;  %v1092_v5 = vmul.f32 1.442695, %v971_v36  ;;  %v1102_v58 = vmul.f32 1.442695, %v976_v31  ;;  %2646 = vpow2.f32 %v1100_v27 }
 0x30d   : > { %v1104_v37 = vmul.f32 1.442695, %v977_v3  ;;  %v898_v48 = vpop.xlane.xlu0 %897  ;;  %v907_v26 = vpop.xlane.xlu1 %906 }
 0x30e   : > { %2648 = vpow2.f32 %v1090_v2  ;;  %v966_v30 = vsub.f32 %v3450_v61, %v898_v48  ;;  %v967_v17 = vsub.f32 %v3436_v51, %v898_v48  ;;  %v972_v13 = vsub.f32 %v3452_v4, %v907_v26 }
 0x30f   : > { %2650 = vpow2.f32 %v1092_v5  ;;  %v973_v53 = vsub.f32 %v3438_v21, %v907_v26 }
 0x310   : > { %2652 = vpow2.f32 %v1102_v58  ;;  %v1082_v59 = vmul.f32 1.442695, %v966_v30  ;;  %v1084_v60 = vmul.f32 1.442695, %v967_v17  ;;  %v1094_v32 = vmul.f32 1.442695, %v972_v13 }
 0x311   : > { %2654 = vpow2.f32 %v1104_v37  ;;  %v1096_v31 = vmul.f32 1.442695, %v973_v53  ;;  %v892_v36 = vpop.xlane.xlu0 %891  ;;  %v901_v8 = vpop.xlane.xlu1 %900 }
 0x312   : > { %2656 = vpow2.f32 %v1082_v59  ;;  %v962_v27 = vsub.f32 %v3475_v6, %v892_v36  ;;  %v963_v61 = vsub.f32 %v3460_v54, %v892_v36  ;;  %v968_v51 = vsub.f32 %v3477_v38, %v901_v8 }
 0x313   : > { %2658 = vpow2.f32 %v1084_v60  ;;  %v969_v4 = vsub.f32 %v3462_v46, %v901_v8 }
 0x314   : > { %2660 = vpow2.f32 %v1094_v32  ;;  %v1074_v21 = vmul.f32 1.442695, %v962_v27  ;;  %v1076_v2 = vmul.f32 1.442695, %v963_v61  ;;  %v1086_v5 = vmul.f32 1.442695, %v968_v51 }
 0x315   : > { %2662 = vpow2.f32 %v1096_v31  ;;  %v1088_v3 = vmul.f32 1.442695, %v969_v4  ;;  %v886_v50 = vpop.xlane.xlu0 %885  ;;  %v895_v40 = vpop.xlane.xlu1 %894 }
 0x316   : > { %2664 = vpow2.f32 %v1074_v21  ;;  %v958_v15 = vsub.f32 %v3501_v55, %v886_v50  ;;  %v959_v6 = vsub.f32 %v3486_v44, %v886_v50  ;;  %v964_v54 = vsub.f32 %v3504_v1, %v895_v40 }
 0x317   : > { %2666 = vpow2.f32 %v1076_v2  ;;  %v965_v38 = vsub.f32 %v3488_v24, %v895_v40 }
 0x318   : > { %2668 = vpow2.f32 %v1086_v5  ;;  %v1066_v46 = vmul.f32 1.442695, %v958_v15  ;;  %v1068_v58 = vmul.f32 1.442695, %v959_v6  ;;  %v1078_v37 = vmul.f32 1.442695, %v964_v54  ;;  %v3748_v48 = vpop.eup %2644 }
 0x319   : > { %2670 = vpow2.f32 %v1088_v3  ;;  %v1080_v26 = vmul.f32 1.442695, %v965_v38  ;;  %v880_v30 = vpop.xlane.xlu0 %879  ;;  %v889_v17 = vpop.xlane.xlu1 %888 }
 0x31a   : > { %v3750_v13 = vpop.eup %2646  ;;  %2672 = vpow2.f32 %v1066_v46  ;;  %v954_v44 = vsub.f32 %v3529_v62, %v880_v30  ;;  %v955_v55 = vsub.f32 %v3513_v47, %v880_v30  ;;  %v960_v1 = vsub.f32 %v3532_v16, %v889_v17 }
 0x31b   : > { %v3755_v24 = vpop.eup %2648  ;;  %2674 = vpow2.f32 %v1068_v58  ;;  %v961_v53 = vsub.f32 %v3516_v56, %v889_v17 }
 0x31c   : > { %v3758_v59 = vpop.eup %2650  ;;  %2676 = vpow2.f32 %v1078_v37  ;;  %v1058_v60 = vmul.f32 1.442695, %v954_v44  ;;  %v1060_v32 = vmul.f32 1.442695, %v955_v55  ;;  %v1070_v31 = vmul.f32 1.442695, %v960_v1 }
 0x31d   : > { %v3760_v36 = vpop.eup %2652  ;;  %2678 = vpow2.f32 %v1080_v26  ;;  %v1072_v8 = vmul.f32 1.442695, %v961_v53  ;;  %v874_v62 = vpop.xlane.xlu0 %873  ;;  %v1190_v47 = vadd.f32 %v3758_v59, %v3755_v24  ;;  %v4957_v53 = vld [vmem:[#allocation20_spill] sm:$0xff] }
 0x31e   : > { %v883_v27 = vpop.xlane.xlu1 %882  ;;  %v3764_v16 = vpop.eup %2654  ;;  %2680 = vpow2.f32 %v1058_v60  ;;  %v950_v56 = vsub.f32 %v3557_v28, %v874_v62  ;;  %v951_v61 = vsub.f32 %v3541_v14, %v874_v62 }
 0x31f   : > { %v956_v51 = vsub.f32 %v3560_v52, %v883_v27  ;;  %v3769_v4 = vpop.eup %2656  ;;  %2682 = vpow2.f32 %v1060_v32  ;;  %v957_v21 = vsub.f32 %v3544_v29, %v883_v27  ;;  %1191 = vadd.xlane.f32.xlu0 %v1190_v47  ;;  %v1199_v2 = vadd.f32 %v3764_v16, %v3760_v36  ;;  %v4958_v32 = vld [vmem:[#allocation19_spill] sm:$0xff] }
 0x320   : > { %v3774_v5 = vpop.eup %2658  ;;  %2684 = vpow2.f32 %v1070_v31  ;;  %v1050_v3 = vmul.f32 1.442695, %v950_v56  ;;  %v1052_v50 = vmul.f32 1.442695, %v951_v61  ;;  %v1196_v29 = vadd.f32 %v3750_v13, %v3748_v48 }
 0x321   : > { %v1062_v40 = vmul.f32 1.442695, %v956_v51  ;;  %v3776_v28 = vpop.eup %2660  ;;  %2686 = vpow2.f32 %v1072_v8  ;;  %v1064_v14 = vmul.f32 1.442695, %v957_v21  ;;  %1200 = vadd.xlane.f32.xlu1 %v1199_v2  ;;  %v868_v52 = vpop.xlane.xlu0 %867  ;;  %v1184_v1 = vadd.f32 %v3774_v5, %v3769_v4 }
 0x322   : > { %v877_v15 = vpop.xlane.xlu1 %876  ;;  %v3780_v6 = vpop.eup %2662  ;;  %2688 = vpow2.f32 %v1050_v3  ;;  %v946_v54 = vsub.f32 %v3582_v0, %v868_v52  ;;  %v947_v38 = vsub.f32 %v3569_v10, %v868_v52 }
 0x323   : > { %v952_v46 = vsub.f32 %v3585_v22, %v877_v15  ;;  %v3785_v58 = vpop.eup %2664  ;;  %2690 = vpow2.f32 %v1052_v50  ;;  %v953_v37 = vsub.f32 %v3572_v45, %v877_v15  ;;  %1197 = vadd.xlane.f32.xlu0 %v1196_v29  ;;  %v1193_v26 = vadd.f32 %v3780_v6, %v3776_v28 }
 0x324   : > { %v3790_v30 = vpop.eup %2666  ;;  %2692 = vpow2.f32 %v1062_v40  ;;  %v1042_v17 = vmul.f32 1.442695, %v946_v54  ;;  %v1044_v44 = vmul.f32 1.442695, %v947_v38 }
 0x325   : > { %v1054_v55 = vmul.f32 1.442695, %v952_v46  ;;  %v3792_v0 = vpop.eup %2668  ;;  %2694 = vpow2.f32 %v1064_v14  ;;  %v1056_v10 = vmul.f32 1.442695, %v953_v37  ;;  %1194 = vadd.xlane.f32.xlu1 %v1193_v26  ;;  %v1178_v51 = vadd.f32 %v3790_v30, %v3785_v58 }
 0x326   : > { %v871_v22 = vpop.xlane.xlu1 %870  ;;  %v3796_v45 = vpop.eup %2670  ;;  %2696 = vpow2.f32 %v1042_v17 }
 0x327   : > { %v948_v60 = vsub.f32 %v4957_v53, %v871_v22  ;;  %v949_v31 = vsub.f32 %v4958_v32, %v871_v22  ;;  %v3800_v8 = vpop.eup %2672  ;;  %2698 = vpow2.f32 %v1044_v44  ;;  %1185 = vadd.xlane.f32.xlu0 %v1184_v1  ;;  %v1187_v62 = vadd.f32 %v3796_v45, %v3792_v0 }
 0x328   : > { %v3804_v27 = vpop.eup %2674  ;;  %2700 = vpow2.f32 %v1054_v55 }
 0x329   : > { %v1046_v47 = vmul.f32 1.442695, %v948_v60  ;;  %v1048_v56 = vmul.f32 1.442695, %v949_v31  ;;  %v3806_v61 = vpop.eup %2676  ;;  %2702 = vpow2.f32 %v1056_v10  ;;  %1188 = vadd.xlane.f32.xlu1 %v1187_v62  ;;  %v1172_v14 = vadd.f32 %v3804_v27, %v3800_v8  ;;  %v286_v62 = vld [vmem:[%s4834_s3 + $0x10] sm:$0xff] }
 0x32a   : > { %v3810_v21 = vpop.eup %2678 }
 0x32b   : > { %2704 = vpow2.f32 %v1046_v47  ;;  %v3812_v2 = vpop.eup %2680  ;;  %1179 = vadd.xlane.f32.xlu0 %v1178_v51  ;;  %v1181_v3 = vadd.f32 %v3810_v21, %v3806_v61 }
 0x32c   : > { %2706 = vpow2.f32 %v1048_v56  ;;  %v3816_v50 = vpop.eup %2682 }
 0x32d   : > { %v3818_v40 = vpop.eup %2684  ;;  %1182 = vadd.xlane.f32.xlu1 %v1181_v3  ;;  %v1166_v46 = vadd.f32 %v3816_v50, %v3812_v2 }
 0x32e   : > { %v3822_v52 = vpop.eup %2686 }
 0x32f   : > { %v3824_v15 = vpop.eup %2688  ;;  %1173 = vadd.xlane.f32.xlu0 %v1172_v14  ;;  %v1175_v29 = vadd.f32 %v3822_v52, %v3818_v40 }
 0x330   : > { %v3828_v54 = vpop.eup %2690 }
 0x331   : > { %v3830_v38 = vpop.eup %2692  ;;  %1176 = vadd.xlane.f32.xlu1 %v1175_v29  ;;  %v1160_v10 = vadd.f32 %v3828_v54, %v3824_v15 }
 0x332   : > { %v3834_v37 = vpop.eup %2694 }
 0x333   : > { %v3836_v26 = vpop.eup %2696  ;;  %1167 = vadd.xlane.f32.xlu0 %v1166_v46  ;;  %v1169_v17 = vadd.f32 %v3834_v37, %v3830_v38 }
 0x334   : > { %4959 = vst [vmem:[#allocation17_spill] sm:$0xff] %v3836_v26  ;;  %v3840_v44 = vpop.eup %2698 }
 0x335   : > { %v3842_v55 = vpop.eup %2700  ;;  %1170 = vadd.xlane.f32.xlu1 %v1169_v17  ;;  %v1154_v32 = vadd.f32 %v3840_v44, %v3836_v26 }
 0x336   : > { %v3846_v22 = vpop.eup %2702 }
 0x337   : > { %1161 = vadd.xlane.f32.xlu0 %v1160_v10  ;;  %v1163_v53 = vadd.f32 %v3846_v22, %v3842_v55 }
 0x338   : > { %v3848_v1 = vpop.eup %2704 }
 0x339   : > { %4960 = vst [vmem:[#allocation18_spill] sm:$0xff] %v3848_v1  ;;  %v3852_v60 = vpop.eup %2706  ;;  %1164 = vadd.xlane.f32.xlu1 %v1163_v53 }
 0x33a   : > { %4961 = vst [vmem:[#allocation20_spill] sm:$0xff] %v3852_v60  ;;  %v1157_v31 = vadd.f32 %v3852_v60, %v3848_v1 }
 0x33b   : > { %1155 = vadd.xlane.f32.xlu0 %v1154_v32 }
 0x33d   : > { %1158 = vadd.xlane.f32.xlu1 %v1157_v31 }
 0x351   : > { %430 = vperm.xlu0 %2578, %v286_v62  }
 0x368   : > { %v1144_v47 = vpop.xlane.xlu0 %1143 }
 0x36a   : > { %v1153_v56 = vpop.xlane.xlu1 %1152 }
 0x36b   : > { %2708 = vrcp.f32 %v1153_v56 }
 0x36c   : > { %2710 = vrcp.f32 %v1144_v47  ;;  %v1150_v51 = vpop.xlane.xlu0 %1149 }
 0x36d   : > { %2712 = vrcp.f32 %v1150_v51 }
 0x36e   : > { %v1147_v3 = vpop.xlane.xlu1 %1146 }
 0x36f   : > { %2714 = vrcp.f32 %v1147_v3 }
 0x370   : > { %v1138_v14 = vpop.xlane.xlu0 %1137 }
 0x371   : > { %2716 = vrcp.f32 %v1138_v14 }
 0x374   : > { %v1141_v29 = vpop.xlane.xlu1 %1140 }
 0x375   : > { %2718 = vrcp.f32 %v1141_v29 }
 0x378   : > { %v2709_v46 = vpop.eup %2708  ;;  %v1132_v17 = vpop.xlane.xlu0 %1131 }
 0x379   : > { %v2711_v10 = vpop.eup %2710  ;;  %2720 = vrcp.f32 %v1132_v17  ;;  %v1249_v31 = vmul.f32 %v2709_v46, %v3628_v20  ;;  %v1248_v47 = vmul.f32 %v2709_v46, %v3624_v41 }
 0x37a   : > { %v2713_v53 = vpop.eup %2712  ;;  %v1240_v3 = vmul.f32 %v2711_v10, %v3622_v42 }
 0x37b   : > { %v1246_v32 = vmul.f32 %v2713_v53, %v3616_v9  ;;  %v1245_v62 = vmul.f32 %v2713_v53, %v3614_v23  ;;  %v1239_v23 = vmul.f32 %v2711_v10, %v3620_v12 }
 0x37c   : > { %v2715_v56 = vpop.eup %2714  ;;  %v1135_v51 = vpop.xlane.xlu1 %1134 }
 0x37d   : > { %2722 = vrcp.f32 %v1135_v51  ;;  %v1313_v14 = vpack.c.bf16 %v1249_v31, %v1246_v32  ;;  %v1312_v29 = vpack.c.bf16 %v1248_v47, %v1245_v62  ;;  %v1243_v1 = vmul.f32 %v2715_v56, %v3636_v25 }
 0x37e   : > { %v1242_v26 = vmul.f32 %v2715_v56, %v3632_v7  ;;  %v2717_v17 = vpop.eup %2716 }
 0x37f   : > { %1330 = vmatprep.subr.bf16.mxu1 %v1313_v14  ;;  %v1311_v9 = vpack.c.bf16 %v1243_v1, %v1240_v3  ;;  %v1234_v46 = vmul.f32 %v2717_v17, %v3647_v39  ;;  %v1233_v53 = vmul.f32 %v2717_v17, %v3645_v57  ;;  %v4963_v17 = vld [vmem:[#allocation6_spill] sm:$0xff] }
 0x380   : > { %v1126_v60 = vpop.xlane.xlu0 %1125  ;;  %1331 = vmatpush1.bf16.msra.mxu1 %v1312_v29  ;;  %v1310_v20 = vpack.c.bf16 %v1242_v26, %v1239_v23 }
 0x381   : > { %1332 = vmatprep.subr.bf16.mxu1 %v1311_v9  ;;  %2724 = vrcp.f32 %v1126_v60 }
 0x382   : > { %v2719_v41 = vpop.eup %2718 }
 0x383   : > { %v1237_v42 = vmul.f32 %v2719_v41, %v3656_v19  ;;  %v1236_v25 = vmul.f32 %v2719_v41, %v3654_v33 }
 0x384   : > { %1333 = vmatpush1.bf16.msra.mxu1 %v1310_v20  ;;  %v1129_v7 = vpop.xlane.xlu1 %1128 }
 0x385   : > { %2726 = vrcp.f32 %v1129_v7  ;;  %v1309_v1 = vpack.c.bf16 %v1237_v42, %v1234_v46  ;;  %v1308_v32 = vpack.c.bf16 %v1236_v25, %v1233_v53  ;;  %v4964_v42 = vld [vmem:[#allocation9_spill] sm:$0xff]  ;;  %v4965_v25 = vld [vmem:[#allocation11_spill] sm:$0xff] }
 0x386   : > { %v2721_v31 = vpop.eup %2720 }
 0x387   : > { %1334 = vmatprep.subr.bf16.mxu1 %v1309_v1  ;;  %v1228_v39 = vmul.f32 %v2721_v31, %v3666_v35  ;;  %v1227_v57 = vmul.f32 %v2721_v31, %v3664_v43  ;;  %v4966_v1 = vld [vmem:[#allocation12_spill] sm:$0xff]  ;;  %v4967_v31 = vld [vmem:[#allocation7_spill] sm:$0xff] }
 0x388   : > { %v1120_v12 = vpop.xlane.xlu0 %1119  ;;  %1335 = vmatpush1.bf16.msra.mxu1 %v1308_v32  ;;  %v1123_v10 = vpop.xlane.xlu1 %1122 }
 0x389   : > { %2728 = vrcp.f32 %v1120_v12 }
 0x38a   : > { %v2723_v26 = vpop.eup %2722  ;;  %2730 = vrcp.f32 %v1123_v10 }
 0x38b   : > { %v1231_v19 = vmul.f32 %v2723_v26, %v3676_v34  ;;  %v1230_v33 = vmul.f32 %v2723_v26, %v3674_v11  ;;  %v4962_v34 = vld [vmem:[#allocation10_spill] sm:$0xff] }
 0x38c   : > { %v1114_v60 = vpop.xlane.xlu0 %1113  ;;  %v1117_v62 = vpop.xlane.xlu1 %1116 }
 0x38d   : > { %2732 = vrcp.f32 %v1114_v60  ;;  %v1307_v47 = vpack.c.bf16 %v1231_v19, %v1228_v39  ;;  %v1306_v56 = vpack.c.bf16 %v1230_v33, %v1227_v57  ;;  %v4968_v39 = vld [vmem:[#allocation16_spill] sm:$0xff]  ;;  %v4969_v57 = vld [vmem:[#allocation13_spill] sm:$0xff]  ;;  %v4970_v60 = vld [vmem:[#allocation14_spill] sm:$0xff] }
 0x38e   : > { %2734 = vrcp.f32 %v1117_v62  ;;  %v2725_v51 = vpop.eup %2724 }
 0x38f   : > { %1336 = vmatprep.subr.bf16.mxu1 %v1307_v47  ;;  %v1222_v35 = vmul.f32 %v2725_v51, %v3684_v49  ;;  %v1221_v11 = vmul.f32 %v2725_v51, %v4962_v34  ;;  %v4971_v47 = vld [vmem:[#allocation8_spill] sm:$0xff] }
 0x390   : > { %v1108_v3 = vpop.xlane.xlu0 %1107  ;;  %1337 = vmatpush1.bf16.msra.mxu1 %v1306_v56  ;;  %v1111_v14 = vpop.xlane.xlu1 %1110 }
 0x391   : > { %2736 = vrcp.f32 %v1108_v3 }
 0x392   : > { %v2727_v29 = vpop.eup %2726  ;;  %2738 = vrcp.f32 %v1111_v14 }
 0x393   : > { %v1225_v43 = vmul.f32 %v2727_v29, %v3692_v18  ;;  %v1224_v9 = vmul.f32 %v2727_v29, %v4963_v17 }
 0x395   : > { %v1305_v23 = vpack.c.bf16 %v1225_v43, %v1222_v35  ;;  %v1304_v41 = vpack.c.bf16 %v1224_v9, %v1221_v11  ;;  %v4972_v43 = vld [vmem:[#allocation22_spill] sm:$0xff]  ;;  %v4973_v11 = vld [vmem:[#allocation21_spill] sm:$0xff]  ;;  %v4974_v9 = vld [vmem:[#allocation15_spill] sm:$0xff] }
 0x396   : > { %v2729_v20 = vpop.eup %2728 }
 0x397   : > { %v2731_v46 = vpop.eup %2730  ;;  %1338 = vmatprep.subr.bf16.mxu1 %v1305_v23  ;;  %v1216_v53 = vmul.f32 %v2729_v20, %v4964_v42  ;;  %v1215_v7 = vmul.f32 %v2729_v20, %v4965_v25 }
 0x398   : > { %1339 = vmatpush1.bf16.msra.mxu1 %v1304_v41  ;;  %v1219_v32 = vmul.f32 %v2731_v46, %v4966_v1  ;;  %v1218_v49 = vmul.f32 %v2731_v46, %v4967_v31 }
 0x39a   : > { %v2733_v12 = vpop.eup %2732  ;;  %v1303_v18 = vpack.c.bf16 %v1219_v32, %v1216_v53  ;;  %v1302_v10 = vpack.c.bf16 %v1218_v49, %v1215_v7 }
 0x39b   : > { %v2735_v26 = vpop.eup %2734  ;;  %v1210_v19 = vmul.f32 %v2733_v12, %v4968_v39  ;;  %v1209_v33 = vmul.f32 %v2733_v12, %v4969_v57 }
 0x39c   : > { %1340 = vmatprep.subr.bf16.mxu1 %v1303_v18  ;;  %v1213_v62 = vmul.f32 %v2735_v26, %v4970_v60  ;;  %v1212_v56 = vmul.f32 %v2735_v26, %v4971_v47 }
 0x39d   : > { %1341 = vmatpush1.bf16.msra.mxu1 %v1302_v10 }
 0x39e   : > { %v2737_v51 = vpop.eup %2736  ;;  %v1301_v3 = vpack.c.bf16 %v1213_v62, %v1210_v19  ;;  %v1300_v14 = vpack.c.bf16 %v1212_v56, %v1209_v33 }
 0x39f   : > { %v2739_v29 = vpop.eup %2738  ;;  %v1204_v35 = vmul.f32 %v2737_v51, %v3724_v63  ;;  %v1203_v34 = vmul.f32 %v2737_v51, %v4972_v43 }
 0x3a0   : > { %1342 = vmatprep.subr.bf16.mxu1 %v1301_v3  ;;  %v1207_v17 = vmul.f32 %v2739_v29, %v4973_v11  ;;  %v1206_v23 = vmul.f32 %v2739_v29, %v4974_v9 }
 0x3a1   : > { %1343 = vmatpush1.bf16.msra.mxu1 %v1300_v14 }
 0x3a2   : > { %v1299_v41 = vpack.c.bf16 %v1207_v17, %v1204_v35  ;;  %v1298_v20 = vpack.c.bf16 %v1206_v23, %v1203_v34 }
 0x3a4   : > { %1344 = vmatprep.subr.bf16.mxu1 %v1299_v41 }
 0x3a5   : > { %1345 = vmatpush1.bf16.msra.mxu1 %v1298_v20 }
 0x3a8   : > { %v1192_v46 = vpop.xlane.xlu0 %1191 }
 0x3aa   : > { %v1201_v42 = vpop.xlane.xlu1 %1200 }
 0x3ab   : > { %2740 = vrcp.f32 %v1201_v42 }
 0x3ac   : > { %2742 = vrcp.f32 %v1192_v46  ;;  %v1198_v53 = vpop.xlane.xlu0 %1197 }
 0x3ad   : > { %2744 = vrcp.f32 %v1198_v53 }
 0x3ae   : > { %v1195_v25 = vpop.xlane.xlu1 %1194 }
 0x3af   : > { %2746 = vrcp.f32 %v1195_v25 }
 0x3b0   : > { %v1186_v63 = vpop.xlane.xlu0 %1185 }
 0x3b1   : > { %2748 = vrcp.f32 %v1186_v63 }
 0x3b2   : > { %v1189_v7 = vpop.xlane.xlu1 %1188 }
 0x3b3   : > { %2750 = vrcp.f32 %v1189_v7 }
 0x3b4   : > { %v1180_v1 = vpop.xlane.xlu0 %1179 }
 0x3b5   : > { %2752 = vrcp.f32 %v1180_v1 }
 0x3b6   : > { %v1183_v32 = vpop.xlane.xlu1 %1182 }
 0x3b7   : > { %2754 = vrcp.f32 %v1183_v32 }
 0x3b8   : > { %v2741_v31 = vpop.eup %2740  ;;  %v1174_v49 = vpop.xlane.xlu0 %1173 }
 0x3b9   : > { %v2743_v12 = vpop.eup %2742  ;;  %2756 = vrcp.f32 %v1174_v49  ;;  %v1297_v26 = vmul.f32 %v2741_v31, %v3764_v16  ;;  %v1296_v57 = vmul.f32 %v2741_v31, %v3760_v36  ;;  %v4976_v31 = vld [vmem:[#allocation5_spill] sm:$0xff] }
 0x3ba   : > { %v2745_v18 = vpop.eup %2744  ;;  %v1177_v10 = vpop.xlane.xlu1 %1176  ;;  %v1288_v62 = vmul.f32 %v2743_v12, %v3758_v59  ;;  %v1287_v35 = vmul.f32 %v2743_v12, %v3755_v24 }
 0x3bb   : > { %2758 = vrcp.f32 %v1177_v10  ;;  %v1294_v39 = vmul.f32 %v2745_v18, %v3750_v13  ;;  %v1293_v19 = vmul.f32 %v2745_v18, %v3748_v48 }
 0x3bc   : > { %v2747_v33 = vpop.eup %2746  ;;  %v1168_v60 = vpop.xlane.xlu0 %1167 }
 0x3bd   : > { %2760 = vrcp.f32 %v1168_v60  ;;  %v1329_v47 = vpack.c.bf16 %v1297_v26, %v1294_v39  ;;  %v1328_v56 = vpack.c.bf16 %v1296_v57, %v1293_v19  ;;  %v1291_v51 = vmul.f32 %v2747_v33, %v3780_v6 }
 0x3be   : > { %v2749_v3 = vpop.eup %2748  ;;  %v1171_v14 = vpop.xlane.xlu1 %1170  ;;  %v1290_v16 = vmul.f32 %v2747_v33, %v3776_v28 }
 0x3bf   : > { %2762 = vrcp.f32 %v1171_v14  ;;  %1346 = vmatprep.subr.bf16.mxu1 %v1329_v47  ;;  %v1327_v13 = vpack.c.bf16 %v1291_v51, %v1288_v62  ;;  %v1282_v48 = vmul.f32 %v2749_v3, %v3774_v5  ;;  %v1281_v11 = vmul.f32 %v2749_v3, %v3769_v4  ;;  %v4977_v47 = vld [vmem:[#allocation4_spill] sm:$0xff] }
 0x3c0   : > { %v2751_v29 = vpop.eup %2750  ;;  %v1162_v36 = vpop.xlane.xlu0 %1161  ;;  %1347 = vmatpush2.bf16.msra.mxu1 %v1328_v56  ;;  %v1326_v34 = vpack.c.bf16 %v1290_v16, %v1287_v35  ;;  %v4980_v16 = vld [vmem:[#allocation18_spill] sm:$0xff] }
 0x3c1   : > { %2764 = vrcp.f32 %v1162_v36  ;;  %1348 = vmatprep.subr.bf16.mxu1 %v1327_v13  ;;  %v1285_v59 = vmul.f32 %v2751_v29, %v3796_v45  ;;  %v1284_v28 = vmul.f32 %v2751_v29, %v3792_v0  ;;  %v4981_v29 = vmov 0.0   ;;  %v287_v36 = vld [vmem:[%s4835_s4] sm:$0xff] }
 0x3c2   : > { %v2753_v43 = vpop.eup %2752  ;;  %v1165_v6 = vpop.xlane.xlu1 %1164  ;;  %1373 = vperm.xlu1 %2579, %v287_v36  }
 0x3c3   : > { %2766 = vrcp.f32 %v1165_v6  ;;  %v1325_v17 = vpack.c.bf16 %v1285_v59, %v1282_v48  ;;  %v1276_v5 = vmul.f32 %v2753_v43, %v3790_v30  ;;  %v1324_v20 = vpack.c.bf16 %v1284_v28, %v1281_v11 }
 0x3c4   : > { %v2755_v9 = vpop.eup %2754  ;;  %v1156_v23 = vpop.xlane.xlu0 %1155  ;;  %1349 = vmatpush2.bf16.msra.mxu1 %v1326_v34  ;;  %v1275_v46 = vmul.f32 %v2753_v43, %v3785_v58  ;;  %v283_v43 = vld [vmem:[%s4833_s2] sm:$0xff] }
 0x3c5   : > { %2768 = vrcp.f32 %v1156_v23  ;;  %1350 = vmatprep.subr.bf16.mxu1 %v1325_v17  ;;  %v1279_v24 = vmul.f32 %v2755_v9, %v3810_v21  ;;  %v1278_v4 = vmul.f32 %v2755_v9, %v3806_v61 }
 0x3c6   : > { %v2757_v41 = vpop.eup %2756  ;;  %v1159_v45 = vpop.xlane.xlu1 %1158 }
 0x3c7   : > { %2770 = vrcp.f32 %v1159_v45  ;;  %v1323_v0 = vpack.c.bf16 %v1279_v24, %v1276_v5  ;;  %v1270_v42 = vmul.f32 %v2757_v41, %v3804_v27  ;;  %v1322_v63 = vpack.c.bf16 %v1278_v4, %v1275_v46  ;;  %v2966_v4 = vld [vmem:[%s4832_s1] sm:$0xff] }
 0x3c8   : > { %v2759_v53 = vpop.eup %2758  ;;  %1351 = vmatpush2.bf16.msra.mxu1 %v1324_v20  ;;  %v1269_v21 = vmul.f32 %v2757_v41, %v3800_v8  ;;  %v2964_v41 = vld [vmem:[%s3045_s10 + $0x8] sm:$0xff]  ;;  %v2965_v20 = vld [vmem:[%s3045_s10] sm:$0xff] }
 0x3c9   : > { %1352 = vmatprep.subr.bf16.mxu1 %v1323_v0  ;;  %v1273_v30 = vmul.f32 %v2759_v53, %v3822_v52  ;;  %v1272_v7 = vmul.f32 %v2759_v53, %v3818_v40  ;;  %v2967_v0 = vld [vmem:[%s4832_s1 + $0x8] sm:$0xff]  ;;  %v4985_v53 = vmov 0  }
 0x3ca   : > { %v2761_v25 = vpop.eup %2760 }
 0x3cb   : > { %v1321_v1 = vpack.c.bf16 %v1273_v30, %v1270_v42  ;;  %v1264_v58 = vmul.f32 %v2761_v25, %v3816_v50  ;;  %v1320_v12 = vpack.c.bf16 %v1272_v7, %v1269_v21  ;;  %v1263_v18 = vmul.f32 %v2761_v25, %v3812_v2  ;;  %v2968_v42 = vld [vmem:[%s4832_s1 + $0x10] sm:$0xff]  ;;  %v4986_v25 = vld [vmem:[#allocation2_spill] sm:$0xff] }
 0x3cc   : > { %v2763_v32 = vpop.eup %2762  ;;  %v3914_v61 = vpop.permute.xlu0 %430  ;;  %1353 = vmatpush2.bf16.msra.mxu1 %v1322_v63 }
 0x3cd   : > { %4975 = vst [vmem:[#allocation19_spill] sm:$0xff] %v3914_v61  ;;  %1354 = vmatprep.subr.bf16.mxu1 %v1321_v1  ;;  %v1267_v27 = vmul.f32 %v2763_v32, %v3834_v37  ;;  %v524_v49 = vadd.f32 %v4976_v31, %v3914_v61  ;;  %v1266_v8 = vmul.f32 %v2763_v32, %v3830_v38  ;;  %v4987_v31 = vld [vmem:[#allocation3_spill] sm:$0xff] }
 0x3ce   : > { %v2765_v52 = vpop.eup %2764  ;;  %v522_v56 = vadd.f32 %v4977_v47, %v3914_v61 }
 0x3cf   : > { %v1319_v40 = vpack.c.bf16 %v1267_v27, %v1264_v58  ;;  %v531_v10 = vmax.f32 %v524_v49, 0.0  ;;  %v1258_v50 = vmul.f32 %v2765_v52, %v3828_v54  ;;  %v1318_v57 = vpack.c.bf16 %v1266_v8, %v1263_v18  ;;  %v4978_v54 = vld [vmem:[#allocation20_spill] sm:$0xff] }
 0x3d0   : > { %v2767_v26 = vpop.eup %2766  ;;  %1355 = vmatpush2.bf16.msra.mxu1 %v1320_v12  ;;  %v1257_v33 = vmul.f32 %v2765_v52, %v3824_v15 }
 0x3d1   : > { %1356 = vmatprep.subr.bf16.mxu1 %v1319_v40  ;;  %v537_v39 = vpack.c.bf16 %v531_v10, %v531_v10  ;;  %v1261_v19 = vmul.f32 %v2767_v26, %v3846_v22  ;;  %v1260_v60 = vmul.f32 %v2767_v26, %v3842_v55  ;;  %v4979_v22 = vld [vmem:[#allocation17_spill] sm:$0xff]  ;;  %v530_v55 = vmax.f32 %v522_v56, 0.0 }
 0x3d2   : > { %v2769_v37 = vpop.eup %2768 }
 0x3d3   : > { %1362 = vmatprep.mubr.bf16.mxu1 %v537_v39  ;;  %v1317_v2 = vpack.c.bf16 %v1261_v19, %v1258_v50  ;;  %v1252_v38 = vmul.f32 %v2769_v37, %v3840_v44  ;;  %v1316_v3 = vpack.c.bf16 %v1260_v60, %v1257_v33  ;;  %v1251_v14 = vmul.f32 %v2769_v37, %v4979_v22 }
 0x3d4   : > { %v2771_v62 = vpop.eup %2770  ;;  %1357 = vmatpush2.bf16.msra.mxu1 %v1318_v57  ;;  %v536_v44 = vpack.c.bf16 %v530_v55, %v530_v55 }
 0x3d5   : > { %1358 = vmatprep.subr.bf16.mxu1 %v1317_v2  ;;  %v1255_v51 = vmul.f32 %v2771_v62, %v4978_v54  ;;  %v1254_v13 = vmul.f32 %v2771_v62, %v4980_v16 }
 0x3d7   : > { %v1315_v15 = vpack.c.bf16 %v1255_v51, %v1252_v38  ;;  %v1314_v48 = vpack.c.bf16 %v1254_v13, %v1251_v14 }
 0x3d8   : > { %1359 = vmatpush2.bf16.msra.mxu1 %v1316_v3 }
 0x3d9   : > { %1360 = vmatprep.subr.bf16.mxu1 %v1315_v15 }
 0x3dc   : > { %1361 = vmatpush2.bf16.msra.mxu1 %v1314_v48 }
 0x3df   : > { %1363 = vmatmul.mubr.bf16.vlgmr.msra.gmra.mxu1 %v536_v44 }
 0x3e0   : > { %2445 = vmatprep.mubr.f32.mxu1 %v4981_v29 }
 0x43d   : > { %v3940_v11 = vpop.permute.xlu1 %1373 }
 0x43e   : > { %4982 = vst [vmem:[#allocation10_spill] sm:$0xff] %v3940_v11 }
 0x49f   : > { %v1364_v35 = vpop.f32.mrf.mxu1 }
 0x4a1   : > { %v1366_v59 = vpop.f32.mrf.mxu1 }
 0x4a2   : > { %1409 = vmatprep.subr.mxu0 %v1366_v59 }
 0x4a3   : > { %v1368_v6 = vpop.f32.mrf.mxu1  ;;  %1410 = vmatpush1.msra.mxu0 %v1364_v35 }
 0x4a4   : > { %2542 = vmatmul.mubr.msk.f32.vlgmr.msra.gmra.mxu0 %vm433_vm0, %v283_v43 }
 0x4a5   : > { %v1369_v34 = vpop.f32.mrf.mxu1  ;;  %1518 = vmatprep.mubr.f32.mxu0 %v4981_v29 }
 0x564   : > { %v1445_v28 = vpop.f32.mrf.mxu0 }
 0x565   : > { %v1446_v17 = vadd.f32 %v1445_v28, %v3940_v11 }
 0x566   : > { %v1447_v5 = vpop.f32.mrf.mxu0 }
 0x567   : > { %v1448_v9 = vadd.f32 %v1447_v5, %v3940_v11  ;;  %v1450_v23 = vmax.f32 %v1446_v17, 0.0  ;;  %v412_v11 = vld [vmem:[%s4837_s6 + $0x1e0] sm:$0xff] }
 0x569   : > { %v1451_v24 = vmax.f32 %v1448_v9, 0.0  ;;  %v3948_v46 = vadd.f32 %v2965_v20, %v1450_v23 }
 0x56b   : > { %v3945_v45 = vadd.f32 %v2964_v41, %v1451_v24  ;;  %4984 = vst [vmem:[#allocation9_spill] sm:$0xff] %v3948_v46 }
 0x56d   : > { %4983 = vst [vmem:[#allocation6_spill] sm:$0xff] %v3945_v45  ;;  %1484 = vmatprep.subr.mxu0 %v3945_v45 }
 0x56e   : > { %1485 = vmatpush1.msra.mxu0 %v3948_v46 }
 0x56f   : > { %2543 = vmatmul.mubr.msk.f32.vlgmr.msra.gmra.mxu0 %vm433_vm0, %v2966_v4 }
 0x570   : > { %1524 = vmatprep.mubr.f32.mxu0 %v4981_v29 }
 0x573   : > { %2544 = vmatmul.mubr.msk.f32.gmra.mxu0 %vm433_vm0, %v2967_v0 }
 0x574   : > { %1530 = vmatprep.mubr.f32.mxu0 %v4981_v29 }
 0x577   : > { %2545 = vmatmul.mubr.msk.f32.gmra.mxu0 %vm433_vm0, %v2968_v42 }
 0x578   : > { %1667 = vmatprep.mubr.bf16.mxu0 %v4985_v53 }
 0x62f   : > { %v1520_v30 = vpop.f32.mrf.mxu0 }
 0x630   : > { %v1521_v63 = vadd.f32 %v1520_v30, %v4986_v25 }
 0x631   : > { %v1522_v21 = vpop.f32.mrf.mxu0 }
 0x632   : > { %v1537_v7 = vmax.f32 %v1521_v63, 0.0  ;;  %v1523_v1 = vadd.f32 %v1522_v21, %v4986_v25 }
 0x633   : > { %v1526_v58 = vpop.f32.mrf.mxu0 }
 0x634   : > { %v1543_v32 = vpack.c.bf16 %v1537_v7, %v1537_v7  ;;  %v1538_v27 = vmax.f32 %v1523_v1, 0.0  ;;  %v1527_v49 = vadd.f32 %v1526_v58, %v4987_v31 }
 0x635   : > { %v1528_v52 = vpop.f32.mrf.mxu0 }
 0x636   : > { %v1544_v12 = vpack.c.bf16 %v1538_v27, %v1538_v27  ;;  %v1539_v18 = vmax.f32 %v1527_v49, 0.0  ;;  %v1529_v8 = vadd.f32 %v1528_v52, %v4987_v31  ;;  %1549 = vxpose.xlu1.c.b16.start.end [1/1] (short) %v1543_v32, 128  ;;  %v380_v27 = vld [vmem:[%s4837_s6 + $0xe0] sm:$0xff]  ;;  %v381_v49 = vld [vmem:[%s4837_s6 + $0xe8] sm:$0xff] }
 0x637   : > { %v3999_v22 = vpop.f32.mrf.mxu0  ;;  %v377_v52 = vld [vmem:[%s4837_s6 + $0xc8] sm:$0xff] }
 0x638   : > { %v1545_v40 = vpack.c.bf16 %v1539_v18, %v1539_v18  ;;  %v1540_v10 = vmax.f32 %v1529_v8, 0.0  ;;  %1565 = vxpose.xlu0.c.b16.start.end [1/1] (short) %v1544_v12, 128  ;;  %4988 = vst [vmem:[#allocation11_spill] sm:$0xff] %v3999_v22 }
 0x639   : > { %v1534_v14 = vpop.f32.mrf.mxu0 }
 0x63a   : > { %v1546_v26 = vpack.c.bf16 %v1540_v10, %v1540_v10  ;;  %v1630_v50 = vsel %vm618_vm1, %v1545_v40, 0  ;;  %v1535_v13 = vadd.f32 %v1534_v14, %v3914_v61  ;;  %v376_v40 = vld [vmem:[%s4837_s6 + $0xc0] sm:$0xff]  ;;  %v382_v10 = vld [vmem:[%s4837_s6 + $0xf0] sm:$0xff]  ;;  %v409_v61 = vld [vmem:[%s4837_s6 + $0x1c8] sm:$0xff] }
 0x63c   : > { %2546 = vmatprep.subr.msk.bf16.mxu0 %vm618_vm1, %v1546_v26  ;;  %v1542_v15 = vmax.f32 %v1535_v13, 0.0  ;;  %v375_v13 = vld [vmem:[%s4837_s6 + $0xb8] sm:$0xff] }
 0x63d   : > { %1650 = vmatpush1.bf16.msra.mxu0 %v1630_v50  ;;  %v383_v50 = vld [vmem:[%s4837_s6 + $0xf8] sm:$0xff] }
 0x63e   : > { %v1548_v48 = vpack.c.bf16 %v1542_v15, %v1542_v15 }
 0x698   : > { %v1557_v39 = vpop.trf.xlu1 }
 0x699   : > { %2547 = vmatmul.mubr.msk.bf16.vlgmr.msra.gmra.mxu0 %vm433_vm0, %v1557_v39 }
 0x69a   : > { %1677 = vmatprep.mubr.bf16.mxu0 %v4985_v53  ;;  %v1573_v62 = vpop.trf.xlu0 }
 0x69c   : > { %v1558_v19 = vpop.trf.xlu1 }
 0x69e   : > { %v1574_v47 = vpop.trf.xlu0 }
 0x6a0   : > { %v1559_v37 = vpop.trf.xlu1 }
 0x6a1   : > { %2548 = vmatmul.mubr.msk.bf16.gmra.mxu0 %vm433_vm0, %v1558_v19 }
 0x6a2   : > { %1687 = vmatprep.mubr.bf16.mxu0 %v4985_v53  ;;  %v1575_v56 = vpop.trf.xlu0 }
 0x6a4   : > { %v1560_v57 = vpop.trf.xlu1 }
 0x6a6   : > { %v1576_v54 = vpop.trf.xlu0 }
 0x6a8   : > { %v1561_v33 = vpop.trf.xlu1 }
 0x6a9   : > { %2549 = vmatmul.mubr.msk.bf16.gmra.mxu0 %vm433_vm0, %v1559_v37  ;;  %v373_v37 = vld [vmem:[%s4837_s6 + $0xa8] sm:$0xff] }
 0x6aa   : > { %1697 = vmatprep.mubr.bf16.mxu0 %v4985_v53  ;;  %v1577_v51 = vpop.trf.xlu0 }
 0x6ac   : > { %v1562_v60 = vpop.trf.xlu1 }
 0x6ae   : > { %v1578_v3 = vpop.trf.xlu0 }
 0x6b0   : > { %v1563_v2 = vpop.trf.xlu1 }
 0x6b1   : > { %2550 = vmatmul.mubr.msk.bf16.gmra.mxu0 %vm433_vm0, %v1560_v57  ;;  %v379_v57 = vld [vmem:[%s4837_s6 + $0xd8] sm:$0xff] }
 0x6b2   : > { %1707 = vmatprep.mubr.bf16.mxu0 %v4985_v53  ;;  %v1579_v16 = vpop.trf.xlu0 }
 0x6b4   : > { %v1564_v38 = vpop.trf.xlu1 }
 0x6b6   : > { %v1580_v55 = vpop.trf.xlu0 }
 0x6b9   : > { %2551 = vmatmul.mubr.msk.bf16.gmra.mxu0 %vm433_vm0, %v1561_v33 }
 0x6ba   : > { %1717 = vmatprep.mubr.bf16.mxu0 %v4985_v53 }
 0x6c1   : > { %2552 = vmatmul.mubr.msk.bf16.gmra.mxu0 %vm433_vm0, %v1562_v60 }
 0x6c2   : > { %1727 = vmatprep.mubr.bf16.mxu0 %v4985_v53 }
 0x6c9   : > { %2553 = vmatmul.mubr.msk.bf16.gmra.mxu0 %vm433_vm0, %v1563_v2 }
 0x6ca   : > { %1737 = vmatprep.mubr.bf16.mxu0 %v4985_v53 }
 0x6d1   : > { %2554 = vmatmul.mubr.msk.bf16.gmra.mxu0 %vm433_vm0, %v1564_v38 }
 0x6d2   : > { %1747 = vmatprep.mubr.bf16.mxu0 %v4985_v53 }
 0x6d9   : > { %2555 = vmatmul.mubr.msk.bf16.gmra.mxu0 %vm433_vm0, %v1573_v62  ;;  %v372_v62 = vld [vmem:[%s4837_s6 + $0xa0] sm:$0xff] }
 0x6da   : > { %1757 = vmatprep.mubr.bf16.mxu0 %v4985_v53 }
 0x6e1   : > { %2556 = vmatmul.mubr.msk.bf16.gmra.mxu0 %vm433_vm0, %v1574_v47  ;;  %v378_v47 = vld [vmem:[%s4837_s6 + $0xd0] sm:$0xff] }
 0x6e2   : > { %1767 = vmatprep.mubr.bf16.mxu0 %v4985_v53 }
 0x6e9   : > { %2557 = vmatmul.mubr.msk.bf16.gmra.mxu0 %vm433_vm0, %v1575_v56 }
 0x6ea   : > { %1777 = vmatprep.mubr.bf16.mxu0 %v4985_v53 }
 0x6f1   : > { %2558 = vmatmul.mubr.msk.bf16.gmra.mxu0 %vm433_vm0, %v1576_v54 }
 0x6f2   : > { %1787 = vmatprep.mubr.bf16.mxu0 %v4985_v53 }
 0x6f9   : > { %2559 = vmatmul.mubr.msk.bf16.gmra.mxu0 %vm433_vm0, %v1577_v51 }
 0x6fa   : > { %1797 = vmatprep.mubr.bf16.mxu0 %v4985_v53 }
 0x701   : > { %2560 = vmatmul.mubr.msk.bf16.gmra.mxu0 %vm433_vm0, %v1578_v3 }
 0x702   : > { %1807 = vmatprep.mubr.bf16.mxu0 %v4985_v53 }
 0x709   : > { %2561 = vmatmul.mubr.msk.bf16.gmra.mxu0 %vm433_vm0, %v1579_v16  ;;  %v369_v16 = vld [vmem:[%s4837_s6 + $0x88] sm:$0xff] }
 0x70a   : > { %1817 = vmatprep.mubr.bf16.mxu0 %v4985_v53 }
 0x711   : > { %2562 = vmatmul.mubr.msk.bf16.gmra.mxu0 %vm433_vm0, %v1580_v55 }
 0x712   : > { %2372 = vmatprep.mubr.bf16.mxu0 %v1548_v48 }
 0x759   : > { %v4007_v44 = vpop.f32.mrf.mxu0 }
 0x75b   : > { %v4009_v29 = vpop.f32.mrf.mxu0 }
 0x75d   : > { %v4011_v36 = vpop.f32.mrf.mxu0 }
 0x75f   : > { %v4013_v35 = vpop.f32.mrf.mxu0 }
 0x761   : > { %v4015_v59 = vpop.f32.mrf.mxu0 }
 0x763   : > { %v4017_v43 = vpop.f32.mrf.mxu0 }
 0x765   : > { %v4019_v6 = vpop.f32.mrf.mxu0 }
 0x767   : > { %v4021_v34 = vpop.f32.mrf.mxu0 }
 0x769   : > { %v4023_v28 = vpop.f32.mrf.mxu0 }
 0x76b   : > { %v4025_v17 = vpop.f32.mrf.mxu0 }
 0x76d   : > { %v4027_v5 = vpop.f32.mrf.mxu0 }
 0x76f   : > { %v4029_v9 = vpop.f32.mrf.mxu0 }
 0x771   : > { %v4031_v23 = vpop.f32.mrf.mxu0 }
 0x773   : > { %v4033_v24 = vpop.f32.mrf.mxu0 }
 0x775   : > { %v4035_v41 = vpop.f32.mrf.mxu0 }
 0x777   : > { %v4037_v20 = vpop.f32.mrf.mxu0 }
 0x779   : > { %v1709_v4 = vpop.f32.mrf.mxu0 }
 0x77b   : > { %v1711_v0 = vpop.f32.mrf.mxu0 }
 0x77d   : > { %v4039_v42 = vpop.f32.mrf.mxu0 }
 0x77f   : > { %v1715_v53 = vpop.f32.mrf.mxu0 }
 0x781   : > { %v1719_v30 = vpop.f32.mrf.mxu0 }
 0x782   : > { %v4103_v55 = vadd.f32 %v1719_v30, %v372_v62  ;;  %v366_v62 = vld [vmem:[%s4837_s6 + $0x70] sm:$0xff] }
 0x783   : > { %v1721_v25 = vpop.f32.mrf.mxu0 }
 0x784   : > { %v4087_v54 = vadd.f32 %v1721_v25, %v373_v37  ;;  %v368_v25 = vld [vmem:[%s4837_s6 + $0x80] sm:$0xff]  ;;  %v367_v37 = vld [vmem:[%s4837_s6 + $0x78] sm:$0xff] }
 0x785   : > { %v1723_v63 = vpop.f32.mrf.mxu0 }
 0x786   : > { %v1858_v30 = vmax.f32 %v4103_v55, %v4087_v54 }
 0x787   : > { %v1725_v21 = vpop.f32.mrf.mxu0 }
 0x789   : > { %v1729_v7 = vpop.f32.mrf.mxu0 }
 0x78a   : > { %v4073_v60 = vadd.f32 %v1729_v7, %v376_v40  ;;  %v374_v7 = vld [vmem:[%s4837_s6 + $0xb0] sm:$0xff] }
 0x78b   : > { %v1731_v1 = vpop.f32.mrf.mxu0  ;;  %v370_v40 = vld [vmem:[%s4837_s6 + $0x90] sm:$0xff] }
 0x78c   : > { %v4063_v39 = vadd.f32 %v1731_v1, %v377_v52 }
 0x78d   : > { %v1733_v58 = vpop.f32.mrf.mxu0 }
 0x78e   : > { %v1864_v14 = vmax.f32 %v4073_v60, %v4063_v39  ;;  %v4105_v48 = vadd.f32 %v1733_v58, %v378_v47 }
 0x78f   : > { %v1735_v32 = vpop.f32.mrf.mxu0 }
 0x790   : > { %v4089_v51 = vadd.f32 %v1735_v32, %v379_v57  ;;  %v4115_v32 = vadd.f32 %v1711_v0, %v369_v16  ;;  %v4131_v0 = vadd.f32 %v1709_v4, %v368_v25  ;;  %v357_v16 = vld [vmem:[%s4837_s6 + $0x28] sm:$0xff] }
 0x791   : > { %v1739_v31 = vpop.f32.mrf.mxu0 }
 0x792   : > { %v4050_v18 = vadd.f32 %v1739_v31, %v380_v27  ;;  %v4119_v27 = vadd.f32 %v1725_v21, %v375_v13  ;;  %v1867_v58 = vmax.f32 %v4105_v48, %v4089_v51  ;;  %v365_v31 = vld [vmem:[%s4837_s6 + $0x68] sm:$0xff]  ;;  %v364_v21 = vld [vmem:[%s4837_s6 + $0x60] sm:$0xff]  ;;  %v1852_v4 = vmax.f32 %v4131_v0, %v4115_v32  ;;  %v363_v13 = vld [vmem:[%s4837_s6 + $0x58] sm:$0xff] }
 0x793   : > { %v1741_v12 = vpop.f32.mrf.mxu0 }
 0x794   : > { %v4052_v8 = vadd.f32 %v1741_v12, %v381_v49  ;;  %v371_v49 = vld [vmem:[%s4837_s6 + $0x98] sm:$0xff]  ;;  %v4133_v12 = vadd.f32 %v1723_v63, %v374_v7  ;;  %v4196_v7 = vadd.f32 %v4035_v41, %v366_v62  ;;  %v4212_v41 = vadd.f32 %v4029_v9, %v363_v13  ;;  %v352_v9 = vld [vmem:[%s4837_s6] sm:$0xff] }
 0x795   : > { %v1743_v26 = vpop.f32.mrf.mxu0  ;;  %v4148_v63 = vadd.f32 %v1715_v53, %v371_v49  ;;  %v360_v53 = vld [vmem:[%s4837_s6 + $0x40] sm:$0xff] }
 0x796   : > { %v1870_v19 = vmax.f32 %v4050_v18, %v4052_v8  ;;  %v4075_v2 = vadd.f32 %v1743_v26, %v382_v10  ;;  %v4144_v26 = vadd.f32 %v4033_v24, %v365_v31  ;;  %v4161_v24 = vadd.f32 %v4031_v23, %v364_v21  ;;  %4991 = vst [vmem:[#allocation16_spill] sm:$0xff] %v4212_v41  ;;  %v353_v21 = vld [vmem:[%s4837_s6 + $0x8] sm:$0xff] }
 0x797   : > { %v1745_v33 = vpop.f32.mrf.mxu0  ;;  %v4207_v31 = vadd.f32 %v4017_v43, %v357_v16  ;;  %v4254_v16 = vadd.f32 %v4007_v44, %v352_v9 }
 0x798   : > { %v4077_v38 = vadd.f32 %v1745_v33, %v383_v50  ;;  %1871 = vmax.xlane.f32.xlu0 %v1870_v19  ;;  %v1861_v50 = vmax.f32 %v4133_v12, %v4119_v27  ;;  %v361_v19 = vld [vmem:[%s4837_s6 + $0x48] sm:$0xff]  ;;  %v4164_v33 = vadd.f32 %v4039_v42, %v370_v40  ;;  %v1846_v23 = vmax.f32 %v4161_v24, %v4144_v26  ;;  %v359_v40 = vld [vmem:[%s4837_s6 + $0x38] sm:$0xff] }
 0x799   : > { %v4085_v56 = vpop.f32.mrf.mxu0  ;;  %v4180_v42 = vadd.f32 %v4037_v20, %v367_v37  ;;  %v356_v20 = vld [vmem:[%s4837_s6 + $0x20] sm:$0xff]  ;;  %4990 = vst [vmem:[#allocation7_spill] sm:$0xff] %v4207_v31  ;;  %4996 = vst [vmem:[#allocation21_spill] sm:$0xff] %v4254_v16 }
 0x79a   : > { %v1873_v3 = vmax.f32 %v4075_v2, %v4077_v38  ;;  %v4225_v43 = vadd.f32 %v4015_v59, %v356_v20 }
 0x79b   : > { %v4101_v15 = vpop.f32.mrf.mxu0  ;;  %v1849_v49 = vmax.f32 %v4196_v7, %v4180_v42 }
 0x79c   : > { %1874 = vmax.xlane.f32.xlu1 %v1873_v3  ;;  %1865 = vmax.xlane.f32.xlu0 %v1864_v14  ;;  %v4175_v3 = vadd.f32 %v4025_v17, %v361_v19  ;;  %v1855_v14 = vmax.f32 %v4164_v33, %v4148_v63  ;;  %v4193_v17 = vadd.f32 %v4023_v28, %v360_v53  ;;  %v358_v19 = vld [vmem:[%s4837_s6 + $0x30] sm:$0xff] }
 0x79d   : > { %v4113_v1 = vpop.f32.mrf.mxu0  ;;  %4992 = vst [vmem:[#allocation13_spill] sm:$0xff] %v4225_v43  ;;  %v4239_v53 = vadd.f32 %v4009_v29, %v353_v21  ;;  %v1834_v59 = vmax.f32 %v4225_v43, %v4207_v31  ;;  %v4257_v29 = vadd.f32 %v4019_v6, %v358_v19  ;;  %v415_v31 = vld [vmem:[%s4837_s6 + $0x1f8] sm:$0xff] }
 0x79e   : > { %4989 = vst [vmem:[#allocation12_spill] sm:$0xff] %v4175_v3  ;;  %v1840_v28 = vmax.f32 %v4193_v17, %v4175_v3 }
 0x79f   : > { %v4129_v52 = vpop.f32.mrf.mxu0  ;;  %4994 = vst [vmem:[#allocation8_spill] sm:$0xff] %v4239_v53  ;;  %4997 = vst [vmem:[#allocation15_spill] sm:$0xff] %v4257_v29  ;;  %v1828_v20 = vmax.f32 %v4254_v16, %v4239_v53  ;;  %v408_v16 = vld [vmem:[%s4837_s6 + $0x1c0] sm:$0xff] }
 0x7a0   : > { %1868 = vmax.xlane.f32.xlu1 %v1867_v58  ;;  %1859 = vmax.xlane.f32.xlu0 %v1858_v30  ;;  %v362_v30 = vld [vmem:[%s4837_s6 + $0x50] sm:$0xff] }
 0x7a1   : > { %v4141_v10 = vpop.f32.mrf.mxu0 }
 0x7a3   : > { %v4158_v57 = vpop.f32.mrf.mxu0 }
 0x7a4   : > { %1862 = vmax.xlane.f32.xlu1 %v1861_v50  ;;  %1853 = vmax.xlane.f32.xlu0 %v1852_v4  ;;  %v4228_v50 = vadd.f32 %v4027_v5, %v362_v30  ;;  %v4244_v5 = vadd.f32 %v4021_v34, %v359_v40  ;;  %v354_v34 = vld [vmem:[%s4837_s6 + $0x10] sm:$0xff] }
 0x7a5   : > { %v4172_v47 = vpop.f32.mrf.mxu0  ;;  %v4274_v6 = vadd.f32 %v4011_v36, %v354_v34 }
 0x7a6   : > { %4993 = vst [vmem:[#allocation14_spill] sm:$0xff] %v4228_v50  ;;  %4995 = vst [vmem:[#allocation22_spill] sm:$0xff] %v4244_v5  ;;  %v1843_v62 = vmax.f32 %v4228_v50, %v4212_v41  ;;  %v1837_v44 = vmax.f32 %v4257_v29, %v4244_v5  ;;  %v414_v5 = vld [vmem:[%s4837_s6 + $0x1f0] sm:$0xff] }
 0x7a7   : > { %v4190_v25 = vpop.f32.mrf.mxu0  ;;  %4999 = vst [vmem:[#allocation4_spill] sm:$0xff] %v4274_v6 }
 0x7a8   : > { %1856 = vmax.xlane.f32.xlu1 %v1855_v14  ;;  %1847 = vmax.xlane.f32.xlu0 %v1846_v23  ;;  %v355_v23 = vld [vmem:[%s4837_s6 + $0x18] sm:$0xff] }
 0x7a9   : > { %v4204_v58 = vpop.f32.mrf.mxu0  ;;  %v4267_v30 = vadd.f32 %v4013_v35, %v355_v23 }
 0x7ab   : > { %v4222_v4 = vpop.f32.mrf.mxu0  ;;  %4998 = vst [vmem:[#allocation5_spill] sm:$0xff] %v4267_v30  ;;  %v1831_v21 = vmax.f32 %v4274_v6, %v4267_v30 }
 0x7ac   : > { %1850 = vmax.xlane.f32.xlu1 %v1849_v49  ;;  %1841 = vmax.xlane.f32.xlu0 %v1840_v28 }
 0x7ad   : > { %v4236_v37 = vpop.f32.mrf.mxu0 }
 0x7af   : > { %v4251_v14 = vpop.f32.mrf.mxu0 }
 0x7b0   : > { %1844 = vmax.xlane.f32.xlu1 %v1843_v62  ;;  %1835 = vmax.xlane.f32.xlu0 %v1834_v59 }
 0x7b1   : > { %v4262_v13 = vpop.f32.mrf.mxu0 }
 0x7b3   : > { %v4271_v28 = vpop.f32.mrf.mxu0 }
 0x7b4   : > { %1838 = vmax.xlane.f32.xlu1 %v1837_v44  ;;  %1829 = vmax.xlane.f32.xlu0 %v1828_v20 }
 0x7b5   : > { %v4276_v49 = vpop.f32.mrf.mxu0 }
 0x7b7   : > { %v4280_v40 = vpop.f32.mrf.mxu0 }
 0x7b8   : > { %1832 = vmax.xlane.f32.xlu1 %v1831_v21  ;;  %v413_v21 = vld [vmem:[%s4837_s6 + $0x1e8] sm:$0xff] }
 0x7b9   : > { %v1789_v35 = vpop.f32.mrf.mxu0 }
 0x7bb   : > { %v1791_v9 = vpop.f32.mrf.mxu0 }
 0x7bd   : > { %v4282_v19 = vpop.f32.mrf.mxu0 }
 0x7bf   : > { %v1795_v59 = vpop.f32.mrf.mxu0 }
 0x7c1   : > { %v1799_v62 = vpop.f32.mrf.mxu0 }
 0x7c3   : > { %v1801_v23 = vpop.f32.mrf.mxu0 }
 0x7c5   : > { %v1803_v45 = vpop.f32.mrf.mxu0 }
 0x7c7   : > { %v1805_v36 = vpop.f32.mrf.mxu0 }
 0x7c9   : > { %v1809_v34 = vpop.f32.mrf.mxu0 }
 0x7ca   : > { %v4316_v41 = vadd.f32 %v1809_v34, %v408_v16 }
 0x7cb   : > { %v1811_v44 = vpop.f32.mrf.mxu0 }
 0x7cc   : > { %v4306_v43 = vadd.f32 %v1811_v44, %v409_v61  ;;  %v404_v61 = vld [vmem:[%s4837_s6 + $0x1a0] sm:$0xff]  ;;  %v410_v44 = vld [vmem:[%s4837_s6 + $0x1d0] sm:$0xff] }
 0x7cd   : > { %v1813_v20 = vpop.f32.mrf.mxu0  ;;  %v4342_v34 = vadd.f32 %v1799_v62, %v404_v61 }
 0x7cf   : > { %v1815_v46 = vpop.f32.mrf.mxu0 }
 0x7d1   : > { %v1819_v22 = vpop.f32.mrf.mxu0 }
 0x7d2   : > { %v4293_v6 = vadd.f32 %v1819_v22, %v412_v11  ;;  %v405_v22 = vld [vmem:[%s4837_s6 + $0x1a8] sm:$0xff] }
 0x7d3   : > { %v1821_v30 = vpop.f32.mrf.mxu0 }
 0x7d4   : > { %5000 = vst [vmem:[#allocation20_spill] sm:$0xff] %v4293_v6  ;;  %v4295_v53 = vadd.f32 %v1821_v30, %v413_v21  ;;  %v411_v30 = vld [vmem:[%s4837_s6 + $0x1d8] sm:$0xff] }
 0x7d5   : > { %v1823_v29 = vpop.f32.mrf.mxu0  ;;  %v4332_v16 = vadd.f32 %v1815_v46, %v411_v30  ;;  %v400_v46 = vld [vmem:[%s4837_s6 + $0x180] sm:$0xff] }
 0x7d6   : > { %5001 = vst [vmem:[#allocation17_spill] sm:$0xff] %v4295_v53  ;;  %v1918_v11 = vmax.f32 %v4293_v6, %v4295_v53  ;;  %v4318_v50 = vadd.f32 %v1823_v29, %v414_v5  ;;  %v4328_v53 = vadd.f32 %v1801_v23, %v405_v22  ;;  %v1912_v6 = vmax.f32 %v4316_v41, %v4306_v43  ;;  %v401_v5 = vld [vmem:[%s4837_s6 + $0x188] sm:$0xff]  ;;  %v407_v29 = vld [vmem:[%s4837_s6 + $0x1b8] sm:$0xff] }
 0x7d7   : > { %v1825_v21 = vpop.f32.mrf.mxu0  ;;  %v4344_v23 = vadd.f32 %v1813_v20, %v410_v44  ;;  %v4352_v22 = vadd.f32 %v1791_v9, %v401_v5  ;;  %v403_v20 = vld [vmem:[%s4837_s6 + $0x198] sm:$0xff]  ;;  %v4366_v61 = vadd.f32 %v1789_v35, %v400_v46  ;;  %v402_v44 = vld [vmem:[%s4837_s6 + $0x190] sm:$0xff] }
 0x7d8   : > { %v4320_v3 = vadd.f32 %v1825_v21, %v415_v31  ;;  %1919 = vmax.xlane.f32.xlu0 %v1918_v11  ;;  %v406_v11 = vld [vmem:[%s4837_s6 + $0x1b0] sm:$0xff]  ;;  %v1906_v30 = vmax.f32 %v4342_v34, %v4328_v53  ;;  %v4356_v21 = vadd.f32 %v1805_v36, %v407_v29  ;;  %v396_v36 = vld [vmem:[%s4837_s6 + $0x160] sm:$0xff]  ;;  %v4381_v35 = vadd.f32 %v1795_v59, %v403_v20  ;;  %v393_v29 = vld [vmem:[%s4837_s6 + $0x148] sm:$0xff] }
 0x7d9   : > { %v1915_v62 = vmax.f32 %v4344_v23, %v4332_v16  ;;  %v4368_v9 = vadd.f32 %v1803_v45, %v406_v11  ;;  %v1900_v5 = vmax.f32 %v4366_v61, %v4352_v22  ;;  %v399_v46 = vld [vmem:[%s4837_s6 + $0x178] sm:$0xff]  ;;  %v4392_v11 = vadd.f32 %v4262_v13, %v396_v36  ;;  %v392_v59 = vld [vmem:[%s4837_s6 + $0x140] sm:$0xff]  ;;  %v389_v20 = vld [vmem:[%s4837_s6 + $0x128] sm:$0xff] }
 0x7da   : > { %v1921_v31 = vmax.f32 %v4318_v50, %v4320_v3  ;;  %v395_v36 = vld [vmem:[%s4837_s6 + $0x158] sm:$0xff] }
 0x7db   : > { %v1909_v45 = vmax.f32 %v4368_v9, %v4356_v21 }
 0x7dc   : > { %1922 = vmax.xlane.f32.xlu1 %v1921_v31  ;;  %1913 = vmax.xlane.f32.xlu0 %v1912_v6  ;;  %v397_v6 = vld [vmem:[%s4837_s6 + $0x168] sm:$0xff] }
 0x7dd   : > { %v4377_v31 = vadd.f32 %v4271_v28, %v397_v6  ;;  %v4395_v28 = vadd.f32 %v4282_v19, %v402_v44  ;;  %v4409_v6 = vadd.f32 %v4280_v40, %v399_v46  ;;  %v388_v40 = vld [vmem:[%s4837_s6 + $0x120] sm:$0xff]  ;;  %v385_v46 = vld [vmem:[%s4837_s6 + $0x108] sm:$0xff] }
 0x7df   : > { %v1894_v13 = vmax.f32 %v4392_v11, %v4377_v31  ;;  %v1903_v19 = vmax.f32 %v4395_v28, %v4381_v35 }
 0x7e0   : > { %1916 = vmax.xlane.f32.xlu1 %v1915_v62  ;;  %1907 = vmax.xlane.f32.xlu0 %v1906_v30  ;;  %v398_v30 = vld [vmem:[%s4837_s6 + $0x170] sm:$0xff]  ;;  %v4404_v62 = vadd.f32 %v4222_v4, %v393_v29  ;;  %v4420_v4 = vadd.f32 %v4204_v58, %v392_v59  ;;  %v4437_v29 = vadd.f32 %v4251_v14, %v395_v36  ;;  %v391_v59 = vld [vmem:[%s4837_s6 + $0x138] sm:$0xff]  ;;  %v384_v14 = vld [vmem:[%s4837_s6 + $0x100] sm:$0xff] }
 0x7e1   : > { %v4423_v44 = vadd.f32 %v4276_v49, %v398_v30  ;;  %v387_v36 = vld [vmem:[%s4837_s6 + $0x118] sm:$0xff] }
 0x7e2   : > { %v1888_v58 = vmax.f32 %v4420_v4, %v4404_v62 }
 0x7e3   : > { %v1897_v49 = vmax.f32 %v4423_v44, %v4409_v6 }
 0x7e4   : > { %1910 = vmax.xlane.f32.xlu1 %v1909_v45  ;;  %1901 = vmax.xlane.f32.xlu0 %v1900_v5  ;;  %v394_v5 = vld [vmem:[%s4837_s6 + $0x150] sm:$0xff]  ;;  %v4432_v45 = vadd.f32 %v4158_v57, %v389_v20  ;;  %v4448_v57 = vadd.f32 %v4141_v10, %v388_v40  ;;  %v4465_v20 = vadd.f32 %v4190_v25, %v391_v59 }
 0x7e5   : > { %v4451_v30 = vadd.f32 %v4236_v37, %v394_v5  ;;  %v4473_v40 = vadd.f32 %v4085_v56, %v384_v14 }
 0x7e6   : > { %v1882_v10 = vmax.f32 %v4448_v57, %v4432_v45 }
 0x7e7   : > { %v1891_v37 = vmax.f32 %v4451_v30, %v4437_v29 }
 0x7e8   : > { %1904 = vmax.xlane.f32.xlu1 %v1903_v19  ;;  %1895 = vmax.xlane.f32.xlu0 %v1894_v13  ;;  %v390_v13 = vld [vmem:[%s4837_s6 + $0x130] sm:$0xff]  ;;  %v4460_v19 = vadd.f32 %v4101_v15, %v385_v46 }
 0x7e9   : > { %v4476_v5 = vadd.f32 %v4172_v47, %v390_v13  ;;  %v386_v15 = vld [vmem:[%s4837_s6 + $0x110] sm:$0xff] }
 0x7ea   : > { %v1876_v25 = vmax.f32 %v4473_v40, %v4460_v19  ;;  %v4489_v56 = vadd.f32 %v4113_v1, %v386_v15 }
 0x7ec   : > { %1898 = vmax.xlane.f32.xlu1 %v1897_v49  ;;  %1889 = vmax.xlane.f32.xlu0 %v1888_v58  ;;  %v4484_v58 = vadd.f32 %v4129_v52, %v387_v36  ;;  %v1885_v49 = vmax.f32 %v4476_v5, %v4465_v20  ;;  %5003 = vst [vmem:[#allocation2_spill] sm:$0xff] %v4489_v56 }
 0x7ee   : > { %5002 = vst [vmem:[#allocation18_spill] sm:$0xff] %v4484_v58  ;;  %v1879_v47 = vmax.f32 %v4489_v56, %v4484_v58 }
 0x7f0   : > { %1892 = vmax.xlane.f32.xlu1 %v1891_v37  ;;  %1883 = vmax.xlane.f32.xlu0 %v1882_v10 }
 0x7f4   : > { %1886 = vmax.xlane.f32.xlu1 %v1885_v49  ;;  %1877 = vmax.xlane.f32.xlu0 %v1876_v25 }
 0x7f8   : > { %1880 = vmax.xlane.f32.xlu1 %v1879_v47 }
 0x821   : > { %v1872_v46 = vpop.xlane.xlu0 %1871 }
 0x822   : > { %v1952_v59 = vsub.f32 %v4050_v18, %v1872_v46  ;;  %v1953_v14 = vsub.f32 %v4052_v8, %v1872_v46 }
 0x824   : > { %v2044_v13 = vmul.f32 1.442695, %v1952_v59  ;;  %v2046_v52 = vmul.f32 1.442695, %v1953_v14 }
 0x825   : > { %v1875_v10 = vpop.xlane.xlu1 %1874  ;;  %v1866_v37 = vpop.xlane.xlu0 %1865 }
 0x826   : > { %2772 = vpow2.f32 %v2044_v13  ;;  %v1954_v36 = vsub.f32 %v4075_v2, %v1875_v10  ;;  %v1955_v1 = vsub.f32 %v4077_v38, %v1875_v10  ;;  %v1948_v15 = vsub.f32 %v4073_v60, %v1866_v37 }
 0x827   : > { %2774 = vpow2.f32 %v2046_v52  ;;  %v1949_v25 = vsub.f32 %v4063_v39, %v1866_v37 }
 0x828   : > { %v2048_v49 = vmul.f32 1.442695, %v1954_v36  ;;  %v2050_v47 = vmul.f32 1.442695, %v1955_v1  ;;  %v2036_v58 = vmul.f32 1.442695, %v1948_v15 }
 0x829   : > { %v2038_v18 = vmul.f32 1.442695, %v1949_v25  ;;  %v1869_v56 = vpop.xlane.xlu1 %1868  ;;  %v1860_v8 = vpop.xlane.xlu0 %1859 }
 0x82a   : > { %2776 = vpow2.f32 %v2048_v49  ;;  %v1950_v46 = vsub.f32 %v4105_v48, %v1869_v56  ;;  %v1951_v59 = vsub.f32 %v4089_v51, %v1869_v56  ;;  %v1944_v2 = vsub.f32 %v4103_v55, %v1860_v8 }
 0x82b   : > { %2778 = vpow2.f32 %v2050_v47  ;;  %v1945_v38 = vsub.f32 %v4087_v54, %v1860_v8 }
 0x82c   : > { %2780 = vpow2.f32 %v2036_v58  ;;  %v2040_v60 = vmul.f32 1.442695, %v1950_v46  ;;  %v2042_v14 = vmul.f32 1.442695, %v1951_v59  ;;  %v2028_v39 = vmul.f32 1.442695, %v1944_v2 }
 0x82d   : > { %2782 = vpow2.f32 %v2038_v18  ;;  %v2030_v13 = vmul.f32 1.442695, %v1945_v38  ;;  %v1863_v52 = vpop.xlane.xlu1 %1862  ;;  %v1854_v10 = vpop.xlane.xlu0 %1853 }
 0x82e   : > { %2784 = vpow2.f32 %v2040_v60  ;;  %v1946_v37 = vsub.f32 %v4133_v12, %v1863_v52  ;;  %v1947_v48 = vsub.f32 %v4119_v27, %v1863_v52  ;;  %v1940_v51 = vsub.f32 %v4131_v0, %v1854_v10  ;;  %v5004_v60 = vld [vmem:[#allocation12_spill] sm:$0xff] }
 0x82f   : > { %2786 = vpow2.f32 %v2042_v14  ;;  %v1941_v55 = vsub.f32 %v4115_v32, %v1854_v10 }
 0x830   : > { %2788 = vpow2.f32 %v2028_v39  ;;  %v2032_v54 = vmul.f32 1.442695, %v1946_v37  ;;  %v2034_v58 = vmul.f32 1.442695, %v1947_v48  ;;  %v2020_v56 = vmul.f32 1.442695, %v1940_v51 }
 0x831   : > { %2790 = vpow2.f32 %v2030_v13  ;;  %v2022_v36 = vmul.f32 1.442695, %v1941_v55  ;;  %v1857_v1 = vpop.xlane.xlu1 %1856  ;;  %v1848_v15 = vpop.xlane.xlu0 %1847  ;;  %v5005_v55 = vld [vmem:[#allocation14_spill] sm:$0xff] }
 0x832   : > { %2792 = vpow2.f32 %v2032_v54  ;;  %v1942_v25 = vsub.f32 %v4164_v33, %v1857_v1  ;;  %v1943_v12 = vsub.f32 %v4148_v63, %v1857_v1  ;;  %v1936_v27 = vsub.f32 %v4161_v24, %v1848_v15 }
 0x833   : > { %v4510_v49 = vpop.eup %2772  ;;  %2794 = vpow2.f32 %v2034_v58  ;;  %v1937_v32 = vsub.f32 %v4144_v26, %v1848_v15  ;;  %v5006_v58 = vld [vmem:[#allocation16_spill] sm:$0xff] }
 0x834   : > { %v4513_v0 = vpop.eup %2774  ;;  %2796 = vpow2.f32 %v2020_v56  ;;  %v2024_v47 = vmul.f32 1.442695, %v1942_v25  ;;  %v2026_v18 = vmul.f32 1.442695, %v1943_v12  ;;  %v2012_v8 = vmul.f32 1.442695, %v1936_v27 }
 0x835   : > { %2798 = vpow2.f32 %v2022_v36  ;;  %v2014_v46 = vmul.f32 1.442695, %v1937_v32  ;;  %v1851_v59 = vpop.xlane.xlu1 %1850  ;;  %v1842_v2 = vpop.xlane.xlu0 %1841  ;;  %v2158_v63 = vadd.f32 %v4513_v0, %v4510_v49  ;;  %v5007_v36 = vld [vmem:[#allocation13_spill] sm:$0xff]  ;;  %v5008_v25 = vld [vmem:[#allocation7_spill] sm:$0xff] }
 0x836   : > { %2800 = vpow2.f32 %v2024_v47  ;;  %v1938_v24 = vsub.f32 %v4196_v7, %v1851_v59  ;;  %v1939_v33 = vsub.f32 %v4180_v42, %v1851_v59  ;;  %v1932_v26 = vsub.f32 %v4193_v17, %v1842_v2 }
 0x837   : > { %v4520_v38 = vpop.eup %2776  ;;  %2802 = vpow2.f32 %v2026_v18  ;;  %v1933_v14 = vsub.f32 %v5004_v60, %v1842_v2  ;;  %2159 = vadd.xlane.f32.xlu0 %v2158_v63 }
 0x838   : > { %v4523_v39 = vpop.eup %2778  ;;  %2804 = vpow2.f32 %v2012_v8  ;;  %v2016_v13 = vmul.f32 1.442695, %v1938_v24  ;;  %v2018_v52 = vmul.f32 1.442695, %v1939_v33  ;;  %v2004_v10 = vmul.f32 1.442695, %v1932_v26 }
 0x839   : > { %v4525_v37 = vpop.eup %2780  ;;  %2806 = vpow2.f32 %v2014_v46  ;;  %v2006_v7 = vmul.f32 1.442695, %v1933_v14  ;;  %v1845_v48 = vpop.xlane.xlu1 %1844  ;;  %v2161_v17 = vadd.f32 %v4523_v39, %v4520_v38  ;;  %v5009_v26 = vld [vmem:[#allocation15_spill] sm:$0xff]  ;;  %v5010_v14 = vld [vmem:[#allocation22_spill] sm:$0xff] }
 0x83a   : > { %v1836_v42 = vpop.xlane.xlu0 %1835  ;;  %v4529_v51 = vpop.eup %2782  ;;  %2808 = vpow2.f32 %v2016_v13  ;;  %v1934_v54 = vsub.f32 %v5005_v55, %v1845_v48  ;;  %v1935_v56 = vsub.f32 %v5006_v58, %v1845_v48 }
 0x83b   : > { %v1928_v1 = vsub.f32 %v5007_v36, %v1836_v42  ;;  %v4534_v15 = vpop.eup %2784  ;;  %2810 = vpow2.f32 %v2018_v52  ;;  %v1929_v12 = vsub.f32 %v5008_v25, %v1836_v42  ;;  %2162 = vadd.xlane.f32.xlu1 %v2161_v17  ;;  %v2152_v27 = vadd.f32 %v4529_v51, %v4525_v37  ;;  %v5011_v52 = vld [vmem:[#allocation21_spill] sm:$0xff] }
 0x83c   : > { %v4539_v32 = vpop.eup %2786  ;;  %2812 = vpow2.f32 %v2004_v10  ;;  %v2008_v47 = vmul.f32 1.442695, %v1934_v54  ;;  %v2010_v18 = vmul.f32 1.442695, %v1935_v56 }
 0x83d   : > { %v1996_v8 = vmul.f32 1.442695, %v1928_v1  ;;  %v4541_v46 = vpop.eup %2788  ;;  %2814 = vpow2.f32 %v2006_v7  ;;  %v1998_v59 = vmul.f32 1.442695, %v1929_v12  ;;  %2153 = vadd.xlane.f32.xlu0 %v2152_v27  ;;  %v1839_v2 = vpop.xlane.xlu1 %1838  ;;  %v2155_v24 = vadd.f32 %v4539_v32, %v4534_v15  ;;  %v5012_v7 = vld [vmem:[#allocation8_spill] sm:$0xff] }
 0x83e   : > { %v1830_v63 = vpop.xlane.xlu0 %1829  ;;  %v4545_v33 = vpop.eup %2790  ;;  %2816 = vpow2.f32 %v2008_v47  ;;  %v1930_v60 = vsub.f32 %v5009_v26, %v1839_v2  ;;  %v1931_v13 = vsub.f32 %v5010_v14, %v1839_v2  ;;  %v5013_v47 = vld [vmem:[#allocation4_spill] sm:$0xff]  ;;  %v5014_v2 = vld [vmem:[#allocation5_spill] sm:$0xff] }
 0x83f   : > { %v1924_v10 = vsub.f32 %v5011_v52, %v1830_v63  ;;  %v4550_v48 = vpop.eup %2792  ;;  %2818 = vpow2.f32 %v2010_v18  ;;  %v1925_v42 = vsub.f32 %v5012_v7, %v1830_v63  ;;  %2156 = vadd.xlane.f32.xlu1 %v2155_v24  ;;  %v2146_v17 = vadd.f32 %v4545_v33, %v4541_v46 }
 0x840   : > { %v4555_v55 = vpop.eup %2794  ;;  %2820 = vpow2.f32 %v1996_v8  ;;  %v2000_v54 = vmul.f32 1.442695, %v1930_v60  ;;  %v2002_v58 = vmul.f32 1.442695, %v1931_v13 }
 0x841   : > { %v1988_v56 = vmul.f32 1.442695, %v1924_v10  ;;  %v4557_v36 = vpop.eup %2796  ;;  %2822 = vpow2.f32 %v1998_v59  ;;  %v1990_v1 = vmul.f32 1.442695, %v1925_v42  ;;  %2147 = vadd.xlane.f32.xlu0 %v2146_v17  ;;  %v1833_v25 = vpop.xlane.xlu1 %1832  ;;  %v2149_v12 = vadd.f32 %v4555_v55, %v4550_v48 }
 0x842   : > { %v4561_v27 = vpop.eup %2798  ;;  %2824 = vpow2.f32 %v2000_v54  ;;  %v1926_v18 = vsub.f32 %v5013_v47, %v1833_v25  ;;  %v1927_v63 = vsub.f32 %v5014_v2, %v1833_v25 }
 0x843   : > { %v4565_v8 = vpop.eup %2800  ;;  %2826 = vpow2.f32 %v2002_v58  ;;  %2150 = vadd.xlane.f32.xlu1 %v2149_v12  ;;  %v2140_v59 = vadd.f32 %v4561_v27, %v4557_v36 }
 0x844   : > { %v4569_v24 = vpop.eup %2802  ;;  %2828 = vpow2.f32 %v1988_v56  ;;  %v1992_v26 = vmul.f32 1.442695, %v1926_v18  ;;  %v1994_v60 = vmul.f32 1.442695, %v1927_v63 }
 0x845   : > { %v4571_v14 = vpop.eup %2804  ;;  %2830 = vpow2.f32 %v1990_v1  ;;  %2141 = vadd.xlane.f32.xlu0 %v2140_v59  ;;  %v2143_v13 = vadd.f32 %v4569_v24, %v4565_v8 }
 0x846   : > { %v4575_v52 = vpop.eup %2806  ;;  %2832 = vpow2.f32 %v1992_v26 }
 0x847   : > { %v4577_v10 = vpop.eup %2808  ;;  %2834 = vpow2.f32 %v1994_v60  ;;  %2144 = vadd.xlane.f32.xlu1 %v2143_v13  ;;  %v2134_v7 = vadd.f32 %v4575_v52, %v4571_v14 }
 0x848   : > { %5015 = vst [vmem:[#allocation3_spill] sm:$0xff] %v4577_v10  ;;  %v4581_v42 = vpop.eup %2810 }
 0x849   : > { %v4583_v17 = vpop.eup %2812  ;;  %2135 = vadd.xlane.f32.xlu0 %v2134_v7  ;;  %v2137_v54 = vadd.f32 %v4581_v42, %v4577_v10 }
 0x84a   : > { %5016 = vst [vmem:[#allocation12_spill] sm:$0xff] %v4583_v17  ;;  %v4587_v58 = vpop.eup %2814 }
 0x84b   : > { %5017 = vst [vmem:[#allocation14_spill] sm:$0xff] %v4587_v58  ;;  %v4589_v56 = vpop.eup %2816  ;;  %2138 = vadd.xlane.f32.xlu1 %v2137_v54  ;;  %v2128_v1 = vadd.f32 %v4587_v58, %v4583_v17 }
 0x84c   : > { %5018 = vst [vmem:[#allocation16_spill] sm:$0xff] %v4589_v56  ;;  %v4593_v25 = vpop.eup %2818 }
 0x84d   : > { %5019 = vst [vmem:[#allocation13_spill] sm:$0xff] %v4593_v25  ;;  %v4595_v12 = vpop.eup %2820  ;;  %2129 = vadd.xlane.f32.xlu0 %v2128_v1  ;;  %v2131_v47 = vadd.f32 %v4593_v25, %v4589_v56  ;;  %v5029_v56 = vld [vmem:[#allocation17_spill] sm:$0xff] }
 0x84e   : > { %5020 = vst [vmem:[#allocation7_spill] sm:$0xff] %v4595_v12  ;;  %v4599_v18 = vpop.eup %2822 }
 0x84f   : > { %5021 = vst [vmem:[#allocation15_spill] sm:$0xff] %v4599_v18  ;;  %v4601_v2 = vpop.eup %2824  ;;  %2132 = vadd.xlane.f32.xlu1 %v2131_v47  ;;  %v2122_v63 = vadd.f32 %v4599_v18, %v4595_v12 }
 0x850   : > { %5022 = vst [vmem:[#allocation22_spill] sm:$0xff] %v4601_v2  ;;  %v4605_v59 = vpop.eup %2826 }
 0x851   : > { %5023 = vst [vmem:[#allocation21_spill] sm:$0xff] %v4605_v59  ;;  %v4607_v26 = vpop.eup %2828  ;;  %2123 = vadd.xlane.f32.xlu0 %v2122_v63  ;;  %v2125_v60 = vadd.f32 %v4605_v59, %v4601_v2  ;;  %v5028_v63 = vld [vmem:[#allocation20_spill] sm:$0xff] }
 0x852   : > { %5024 = vst [vmem:[#allocation8_spill] sm:$0xff] %v4607_v26  ;;  %v4611_v13 = vpop.eup %2830 }
 0x853   : > { %5025 = vst [vmem:[#allocation4_spill] sm:$0xff] %v4611_v13  ;;  %v4613_v7 = vpop.eup %2832  ;;  %2126 = vadd.xlane.f32.xlu1 %v2125_v60  ;;  %v2116_v54 = vadd.f32 %v4611_v13, %v4607_v26 }
 0x854   : > { %5026 = vst [vmem:[#allocation5_spill] sm:$0xff] %v4613_v7  ;;  %v4617_v1 = vpop.eup %2834 }
 0x855   : > { %5027 = vst [vmem:[#allocation23_spill] sm:$0xff] %v4617_v1  ;;  %2117 = vadd.xlane.f32.xlu0 %v2116_v54  ;;  %v2119_v47 = vadd.f32 %v4617_v1, %v4613_v7 }
 0x857   : > { %2120 = vadd.xlane.f32.xlu1 %v2119_v47 }
 0x861   : > { %v1920_v12 = vpop.xlane.xlu0 %1919 }
 0x862   : > { %v1984_v18 = vsub.f32 %v5028_v63, %v1920_v12  ;;  %v1985_v2 = vsub.f32 %v5029_v56, %v1920_v12 }
 0x864   : > { %v2108_v59 = vmul.f32 1.442695, %v1984_v18  ;;  %v2110_v17 = vmul.f32 1.442695, %v1985_v2 }
 0x865   : > { %v1923_v25 = vpop.xlane.xlu1 %1922  ;;  %v1914_v58 = vpop.xlane.xlu0 %1913 }
 0x866   : > { %2836 = vpow2.f32 %v2108_v59  ;;  %v1986_v60 = vsub.f32 %v4318_v50, %v1923_v25  ;;  %v1987_v26 = vsub.f32 %v4320_v3, %v1923_v25  ;;  %v1980_v54 = vsub.f32 %v4316_v41, %v1914_v58 }
 0x867   : > { %2838 = vpow2.f32 %v2110_v17  ;;  %v1981_v7 = vsub.f32 %v4306_v43, %v1914_v58 }
 0x868   : > { %v2112_v47 = vmul.f32 1.442695, %v1986_v60  ;;  %v2114_v1 = vmul.f32 1.442695, %v1987_v26  ;;  %v2100_v13 = vmul.f32 1.442695, %v1980_v54 }
 0x869   : > { %v2102_v63 = vmul.f32 1.442695, %v1981_v7  ;;  %v1917_v10 = vpop.xlane.xlu1 %1916  ;;  %v1908_v56 = vpop.xlane.xlu0 %1907 }
 0x86a   : > { %2840 = vpow2.f32 %v2112_v47  ;;  %v1982_v12 = vsub.f32 %v4344_v23, %v1917_v10  ;;  %v1983_v18 = vsub.f32 %v4332_v16, %v1917_v10  ;;  %v1976_v50 = vsub.f32 %v4342_v34, %v1908_v56 }
 0x86b   : > { %2842 = vpow2.f32 %v2114_v1  ;;  %v1977_v3 = vsub.f32 %v4328_v53, %v1908_v56 }
 0x86c   : > { %2844 = vpow2.f32 %v2100_v13  ;;  %v2104_v41 = vmul.f32 1.442695, %v1982_v12  ;;  %v2106_v17 = vmul.f32 1.442695, %v1983_v18  ;;  %v2092_v43 = vmul.f32 1.442695, %v1976_v50 }
 0x86d   : > { %2846 = vpow2.f32 %v2102_v63  ;;  %v2094_v58 = vmul.f32 1.442695, %v1977_v3  ;;  %v1911_v25 = vpop.xlane.xlu1 %1910  ;;  %v1902_v2 = vpop.xlane.xlu0 %1901 }
 0x86e   : > { %2848 = vpow2.f32 %v2104_v41  ;;  %v1978_v59 = vsub.f32 %v4368_v9, %v1911_v25  ;;  %v1979_v23 = vsub.f32 %v4356_v21, %v1911_v25  ;;  %v1972_v16 = vsub.f32 %v4366_v61, %v1902_v2 }
 0x86f   : > { %2850 = vpow2.f32 %v2106_v17  ;;  %v1973_v34 = vsub.f32 %v4352_v22, %v1902_v2 }
 0x870   : > { %2852 = vpow2.f32 %v2092_v43  ;;  %v2096_v53 = vmul.f32 1.442695, %v1978_v59  ;;  %v2098_v10 = vmul.f32 1.442695, %v1979_v23  ;;  %v2084_v26 = vmul.f32 1.442695, %v1972_v16 }
 0x871   : > { %2854 = vpow2.f32 %v2094_v58  ;;  %v2086_v13 = vmul.f32 1.442695, %v1973_v34  ;;  %v1905_v7 = vpop.xlane.xlu1 %1904  ;;  %v1896_v1 = vpop.xlane.xlu0 %1895 }
 0x872   : > { %2856 = vpow2.f32 %v2096_v53  ;;  %v1974_v60 = vsub.f32 %v4395_v28, %v1905_v7  ;;  %v1975_v9 = vsub.f32 %v4381_v35, %v1905_v7  ;;  %v1968_v21 = vsub.f32 %v4392_v11, %v1896_v1 }
 0x873   : > { %v4638_v54 = vpop.eup %2836  ;;  %2858 = vpow2.f32 %v2098_v10  ;;  %v1969_v22 = vsub.f32 %v4377_v31, %v1896_v1 }
 0x874   : > { %v4641_v61 = vpop.eup %2838  ;;  %2860 = vpow2.f32 %v2084_v26  ;;  %v2088_v47 = vmul.f32 1.442695, %v1974_v60  ;;  %v2090_v63 = vmul.f32 1.442695, %v1975_v9  ;;  %v2076_v56 = vmul.f32 1.442695, %v1968_v21 }
 0x875   : > { %2862 = vpow2.f32 %v2086_v13  ;;  %v2078_v12 = vmul.f32 1.442695, %v1969_v22  ;;  %v1899_v18 = vpop.xlane.xlu1 %1898  ;;  %v1890_v50 = vpop.xlane.xlu0 %1889  ;;  %v2206_v35 = vadd.f32 %v4641_v61, %v4638_v54 }
 0x876   : > { %2864 = vpow2.f32 %v2088_v47  ;;  %v1970_v11 = vsub.f32 %v4423_v44, %v1899_v18  ;;  %v1971_v28 = vsub.f32 %v4409_v6, %v1899_v18  ;;  %v1964_v31 = vsub.f32 %v4420_v4, %v1890_v50 }
 0x877   : > { %v4648_v3 = vpop.eup %2840  ;;  %2866 = vpow2.f32 %v2090_v63  ;;  %v1965_v41 = vsub.f32 %v4404_v62, %v1890_v50  ;;  %2207 = vadd.xlane.f32.xlu0 %v2206_v35 }
 0x878   : > { %v4651_v17 = vpop.eup %2842  ;;  %2868 = vpow2.f32 %v2076_v56  ;;  %v2080_v43 = vmul.f32 1.442695, %v1970_v11  ;;  %v2082_v58 = vmul.f32 1.442695, %v1971_v28  ;;  %v2068_v25 = vmul.f32 1.442695, %v1964_v31 }
 0x879   : > { %v4653_v2 = vpop.eup %2844  ;;  %2870 = vpow2.f32 %v2078_v12  ;;  %v2070_v44 = vmul.f32 1.442695, %v1965_v41  ;;  %v1893_v59 = vpop.xlane.xlu1 %1892  ;;  %v2209_v4 = vadd.f32 %v4651_v17, %v4648_v3  ;;  %v5030_v41 = vld [vmem:[#allocation2_spill] sm:$0xff] }
 0x87a   : > { %v1884_v6 = vpop.xlane.xlu0 %1883  ;;  %v4657_v23 = vpop.eup %2846  ;;  %2872 = vpow2.f32 %v2080_v43  ;;  %v1966_v62 = vsub.f32 %v4451_v30, %v1893_v59  ;;  %v1967_v16 = vsub.f32 %v4437_v29, %v1893_v59 }
 0x87b   : > { %v1960_v34 = vsub.f32 %v4448_v57, %v1884_v6  ;;  %v4662_v53 = vpop.eup %2848  ;;  %2874 = vpow2.f32 %v2082_v58  ;;  %v1961_v10 = vsub.f32 %v4432_v45, %v1884_v6  ;;  %2210 = vadd.xlane.f32.xlu1 %v2209_v4  ;;  %v2200_v26 = vadd.f32 %v4657_v23, %v4653_v2  ;;  %v5031_v58 = vld [vmem:[#allocation18_spill] sm:$0xff] }
 0x87c   : > { %v4667_v13 = vpop.eup %2850  ;;  %2876 = vpow2.f32 %v2068_v25  ;;  %v2072_v7 = vmul.f32 1.442695, %v1966_v62  ;;  %v2074_v1 = vmul.f32 1.442695, %v1967_v16 }
 0x87d   : > { %v2060_v60 = vmul.f32 1.442695, %v1960_v34  ;;  %v4669_v30 = vpop.eup %2852  ;;  %2878 = vpow2.f32 %v2070_v44  ;;  %v2062_v29 = vmul.f32 1.442695, %v1961_v10  ;;  %2201 = vadd.xlane.f32.xlu0 %v2200_v26  ;;  %v1887_v57 = vpop.xlane.xlu1 %1886  ;;  %v2203_v45 = vadd.f32 %v4667_v13, %v4662_v53 }
 0x87e   : > { %v1878_v9 = vpop.xlane.xlu0 %1877  ;;  %v4673_v21 = vpop.eup %2854  ;;  %2880 = vpow2.f32 %v2072_v7  ;;  %v1962_v22 = vsub.f32 %v4476_v5, %v1887_v57  ;;  %v1963_v47 = vsub.f32 %v4465_v20, %v1887_v57 }
 0x87f   : > { %v1956_v63 = vsub.f32 %v4473_v40, %v1878_v9  ;;  %v4678_v56 = vpop.eup %2856  ;;  %2882 = vpow2.f32 %v2074_v1  ;;  %v1957_v12 = vsub.f32 %v4460_v19, %v1878_v9  ;;  %2204 = vadd.xlane.f32.xlu1 %v2203_v45  ;;  %v2194_v18 = vadd.f32 %v4673_v21, %v4669_v30 }
 0x880   : > { %v4683_v50 = vpop.eup %2858  ;;  %2884 = vpow2.f32 %v2060_v60  ;;  %v2064_v35 = vmul.f32 1.442695, %v1962_v22  ;;  %v2066_v11 = vmul.f32 1.442695, %v1963_v47 }
 0x881   : > { %v2052_v28 = vmul.f32 1.442695, %v1956_v63  ;;  %v4685_v5 = vpop.eup %2860  ;;  %2886 = vpow2.f32 %v2062_v29  ;;  %v2054_v20 = vmul.f32 1.442695, %v1957_v12  ;;  %2195 = vadd.xlane.f32.xlu0 %v2194_v18  ;;  %v1881_v40 = vpop.xlane.xlu1 %1880  ;;  %v2197_v31 = vadd.f32 %v4683_v50, %v4678_v56 }
 0x882   : > { %v4689_v19 = vpop.eup %2862  ;;  %2888 = vpow2.f32 %v2064_v35  ;;  %v1958_v43 = vsub.f32 %v5030_v41, %v1881_v40  ;;  %v1959_v25 = vsub.f32 %v5031_v58, %v1881_v40 }
 0x883   : > { %v4693_v44 = vpop.eup %2864  ;;  %2890 = vpow2.f32 %v2066_v11  ;;  %2198 = vadd.xlane.f32.xlu1 %v2197_v31  ;;  %v2188_v59 = vadd.f32 %v4689_v19, %v4685_v5 }
 0x884   : > { %v4697_v6 = vpop.eup %2866  ;;  %2892 = vpow2.f32 %v2052_v28  ;;  %v2056_v4 = vmul.f32 1.442695, %v1958_v43  ;;  %v2058_v62 = vmul.f32 1.442695, %v1959_v25 }
 0x885   : > { %v4699_v16 = vpop.eup %2868  ;;  %2894 = vpow2.f32 %v2054_v20  ;;  %2189 = vadd.xlane.f32.xlu0 %v2188_v59  ;;  %v2191_v34 = vadd.f32 %v4697_v6, %v4693_v44 }
 0x886   : > { %v4703_v10 = vpop.eup %2870  ;;  %2896 = vpow2.f32 %v2056_v4 }
 0x887   : > { %v4705_v26 = vpop.eup %2872  ;;  %2898 = vpow2.f32 %v2058_v62  ;;  %2192 = vadd.xlane.f32.xlu1 %v2191_v34  ;;  %v2182_v7 = vadd.f32 %v4703_v10, %v4699_v16 }
 0x888   : > { %v4709_v1 = vpop.eup %2874 }
 0x889   : > { %v4711_v60 = vpop.eup %2876  ;;  %2183 = vadd.xlane.f32.xlu0 %v2182_v7  ;;  %v2185_v29 = vadd.f32 %v4709_v1, %v4705_v26 }
 0x88a   : > { %v4715_v57 = vpop.eup %2878 }
 0x88b   : > { %v4717_v9 = vpop.eup %2880  ;;  %2186 = vadd.xlane.f32.xlu1 %v2185_v29  ;;  %v2176_v45 = vadd.f32 %v4715_v57, %v4711_v60 }
 0x88c   : > { %v4721_v22 = vpop.eup %2882 }
 0x88d   : > { %v4723_v47 = vpop.eup %2884  ;;  %2177 = vadd.xlane.f32.xlu0 %v2176_v45  ;;  %v2179_v63 = vadd.f32 %v4721_v22, %v4717_v9 }
 0x88e   : > { %v4727_v12 = vpop.eup %2886 }
 0x88f   : > { %v4729_v18 = vpop.eup %2888  ;;  %2180 = vadd.xlane.f32.xlu1 %v2179_v63  ;;  %v2170_v35 = vadd.f32 %v4727_v12, %v4723_v47 }
 0x890   : > { %v4733_v11 = vpop.eup %2890 }
 0x891   : > { %v4735_v28 = vpop.eup %2892  ;;  %2171 = vadd.xlane.f32.xlu0 %v2170_v35  ;;  %v2173_v20 = vadd.f32 %v4733_v11, %v4729_v18 }
 0x892   : > { %v4739_v40 = vpop.eup %2894 }
 0x893   : > { %v4741_v31 = vpop.eup %2896  ;;  %2174 = vadd.xlane.f32.xlu1 %v2173_v20  ;;  %v2164_v41 = vadd.f32 %v4739_v40, %v4735_v28 }
 0x894   : > { %5032 = vst [vmem:[#allocation20_spill] sm:$0xff] %v4741_v31  ;;  %v4745_v43 = vpop.eup %2898 }
 0x895   : > { %2165 = vadd.xlane.f32.xlu0 %v2164_v41  ;;  %v2167_v58 = vadd.f32 %v4745_v43, %v4741_v31 }
 0x897   : > { %2168 = vadd.xlane.f32.xlu1 %v2167_v58 }
 0x8c0   : > { %v2160_v25 = vpop.xlane.xlu0 %2159 }
 0x8c1   : > { %2900 = vrcp.f32 %v2160_v25 }
 0x8c4   : > { %v2163_v59 = vpop.xlane.xlu1 %2162 }
 0x8c5   : > { %2902 = vrcp.f32 %v2163_v59 }
 0x8c6   : > { %v2154_v4 = vpop.xlane.xlu0 %2153 }
 0x8c7   : > { %2904 = vrcp.f32 %v2154_v4 }
 0x8c8   : > { %v2157_v62 = vpop.xlane.xlu1 %2156 }
 0x8c9   : > { %2906 = vrcp.f32 %v2157_v62 }
 0x8ca   : > { %v2148_v34 = vpop.xlane.xlu0 %2147 }
 0x8cb   : > { %2908 = vrcp.f32 %v2148_v34 }
 0x8cc   : > { %v2151_v7 = vpop.xlane.xlu1 %2150 }
 0x8cd   : > { %2910 = vrcp.f32 %v2151_v7 }
 0x8ce   : > { %v2142_v29 = vpop.xlane.xlu0 %2141  ;;  %v2901_v45 = vpop.eup %2900 }
 0x8cf   : > { %2912 = vrcp.f32 %v2142_v29  ;;  %v2256_v41 = vmul.f32 %v2901_v45, %v4513_v0  ;;  %v2255_v25 = vmul.f32 %v2901_v45, %v4510_v49 }
 0x8d0   : > { %v2145_v63 = vpop.xlane.xlu1 %2144 }
 0x8d1   : > { %2914 = vrcp.f32 %v2145_v63 }
 0x8d2   : > { %v2903_v35 = vpop.eup %2902  ;;  %v2136_v20 = vpop.xlane.xlu0 %2135 }
 0x8d3   : > { %2916 = vrcp.f32 %v2136_v20  ;;  %v2259_v58 = vmul.f32 %v2903_v35, %v4523_v39  ;;  %v2258_v59 = vmul.f32 %v2903_v35, %v4520_v38 }
 0x8d4   : > { %v2905_v4 = vpop.eup %2904  ;;  %v2139_v62 = vpop.xlane.xlu1 %2138 }
 0x8d5   : > { %2918 = vrcp.f32 %v2139_v62  ;;  %v2323_v34 = vpack.c.bf16 %v2259_v58, %v2256_v41  ;;  %v2322_v7 = vpack.c.bf16 %v2258_v59, %v2255_v25  ;;  %v2250_v63 = vmul.f32 %v2905_v4, %v4529_v51 }
 0x8d6   : > { %v2907_v31 = vpop.eup %2906  ;;  %v2130_v29 = vpop.xlane.xlu0 %2129  ;;  %v2249_v20 = vmul.f32 %v2905_v4, %v4525_v37 }
 0x8d7   : > { %2920 = vrcp.f32 %v2130_v29  ;;  %2340 = vmatprep.subr.bf16.mxu0 %v2323_v34  ;;  %v2253_v0 = vmul.f32 %v2907_v31, %v4539_v32  ;;  %v2252_v39 = vmul.f32 %v2907_v31, %v4534_v15 }
 0x8d8   : > { %v2909_v49 = vpop.eup %2908  ;;  %v2133_v45 = vpop.xlane.xlu1 %2132  ;;  %2341 = vmatpush1.bf16.msra.mxu0 %v2322_v7 }
 0x8d9   : > { %2922 = vrcp.f32 %v2133_v45  ;;  %v2321_v38 = vpack.c.bf16 %v2253_v0, %v2250_v63  ;;  %v2320_v35 = vpack.c.bf16 %v2252_v39, %v2249_v20  ;;  %v2244_v25 = vmul.f32 %v2909_v49, %v4545_v33  ;;  %v5033_v45 = vld [vmem:[#allocation3_spill] sm:$0xff] }
 0x8da   : > { %v2911_v41 = vpop.eup %2910  ;;  %v2124_v58 = vpop.xlane.xlu0 %2123  ;;  %v2243_v32 = vmul.f32 %v2909_v49, %v4541_v46 }
 0x8db   : > { %2924 = vrcp.f32 %v2124_v58  ;;  %2342 = vmatprep.subr.bf16.mxu0 %v2321_v38  ;;  %v2247_v51 = vmul.f32 %v2911_v41, %v4555_v55  ;;  %v2246_v37 = vmul.f32 %v2911_v41, %v4550_v48  ;;  %v5034_v41 = vld [vmem:[#allocation14_spill] sm:$0xff] }
 0x8dc   : > { %v2913_v59 = vpop.eup %2912  ;;  %v2127_v15 = vpop.xlane.xlu1 %2126  ;;  %2343 = vmatpush1.bf16.msra.mxu0 %v2320_v35 }
 0x8dd   : > { %2926 = vrcp.f32 %v2127_v15  ;;  %v2319_v31 = vpack.c.bf16 %v2247_v51, %v2244_v25  ;;  %v2318_v4 = vpack.c.bf16 %v2246_v37, %v2243_v32  ;;  %v2238_v7 = vmul.f32 %v2913_v59, %v4561_v27  ;;  %v5035_v25 = vld [vmem:[#allocation13_spill] sm:$0xff]  ;;  %v5036_v32 = vld [vmem:[#allocation12_spill] sm:$0xff] }
 0x8de   : > { %v2915_v62 = vpop.eup %2914  ;;  %v2118_v34 = vpop.xlane.xlu0 %2117  ;;  %v2237_v55 = vmul.f32 %v2913_v59, %v4557_v36  ;;  %v5037_v59 = vld [vmem:[#allocation16_spill] sm:$0xff] }
 0x8df   : > { %2928 = vrcp.f32 %v2118_v34  ;;  %2344 = vmatprep.subr.bf16.mxu0 %v2319_v31  ;;  %v2241_v33 = vmul.f32 %v2915_v62, %v4569_v24  ;;  %v2240_v46 = vmul.f32 %v2915_v62, %v4565_v8  ;;  %v5039_v34 = vld [vmem:[#allocation21_spill] sm:$0xff] }
 0x8e0   : > { %v2917_v29 = vpop.eup %2916  ;;  %v2121_v48 = vpop.xlane.xlu1 %2120  ;;  %2345 = vmatpush1.bf16.msra.mxu0 %v2318_v4  ;;  %v5038_v4 = vld [vmem:[#allocation15_spill] sm:$0xff] }
 0x8e1   : > { %2930 = vrcp.f32 %v2121_v48  ;;  %v2317_v63 = vpack.c.bf16 %v2241_v33, %v2238_v7  ;;  %v2316_v0 = vpack.c.bf16 %v2240_v46, %v2237_v55  ;;  %v2232_v39 = vmul.f32 %v2917_v29, %v4575_v52  ;;  %v5040_v33 = vld [vmem:[#allocation7_spill] sm:$0xff]  ;;  %v5041_v46 = vld [vmem:[#allocation22_spill] sm:$0xff] }
 0x8e2   : > { %v2919_v20 = vpop.eup %2918  ;;  %v2231_v49 = vmul.f32 %v2917_v29, %v4571_v14 }
 0x8e3   : > { %2346 = vmatprep.subr.bf16.mxu0 %v2317_v63  ;;  %v2235_v27 = vmul.f32 %v2919_v20, %v4581_v42  ;;  %v2234_v24 = vmul.f32 %v2919_v20, %v5033_v45 }
 0x8e4   : > { %v2921_v38 = vpop.eup %2920  ;;  %2347 = vmatpush1.bf16.msra.mxu0 %v2316_v0 }
 0x8e5   : > { %v2315_v36 = vpack.c.bf16 %v2235_v27, %v2232_v39  ;;  %v2314_v8 = vpack.c.bf16 %v2234_v24, %v2231_v49  ;;  %v2226_v58 = vmul.f32 %v2921_v38, %v5034_v41  ;;  %v2225_v37 = vmul.f32 %v2921_v38, %v5036_v32  ;;  %v5042_v39 = vld [vmem:[#allocation4_spill] sm:$0xff]  ;;  %v5043_v49 = vld [vmem:[#allocation23_spill] sm:$0xff] }
 0x8e6   : > { %v2923_v35 = vpop.eup %2922  ;;  %v5044_v24 = vld [vmem:[#allocation8_spill] sm:$0xff] }
 0x8e7   : > { %2348 = vmatprep.subr.bf16.mxu0 %v2315_v36  ;;  %v2229_v51 = vmul.f32 %v2923_v35, %v5035_v25  ;;  %v2228_v52 = vmul.f32 %v2923_v35, %v5037_v59  ;;  %v5045_v36 = vld [vmem:[#allocation5_spill] sm:$0xff] }
 0x8e8   : > { %v2925_v15 = vpop.eup %2924  ;;  %2349 = vmatpush1.bf16.msra.mxu0 %v2314_v8 }
 0x8e9   : > { %v2313_v42 = vpack.c.bf16 %v2229_v51, %v2226_v58  ;;  %v2312_v14 = vpack.c.bf16 %v2228_v52, %v2225_v37  ;;  %v2220_v62 = vmul.f32 %v2925_v15, %v5038_v4  ;;  %v2219_v55 = vmul.f32 %v2925_v15, %v5040_v33 }
 0x8ea   : > { %v2927_v31 = vpop.eup %2926 }
 0x8eb   : > { %2350 = vmatprep.subr.bf16.mxu0 %v2313_v42  ;;  %v2223_v7 = vmul.f32 %v2927_v31, %v5039_v34  ;;  %v2222_v29 = vmul.f32 %v2927_v31, %v5041_v46 }
 0x8ec   : > { %v2929_v48 = vpop.eup %2928  ;;  %2351 = vmatpush1.bf16.msra.mxu0 %v2312_v14 }
 0x8ed   : > { %v2311_v63 = vpack.c.bf16 %v2223_v7, %v2220_v62  ;;  %v2310_v0 = vpack.c.bf16 %v2222_v29, %v2219_v55  ;;  %v2214_v27 = vmul.f32 %v2929_v48, %v5042_v39  ;;  %v2213_v38 = vmul.f32 %v2929_v48, %v5044_v24 }
 0x8ee   : > { %v2931_v20 = vpop.eup %2930 }
 0x8ef   : > { %2352 = vmatprep.subr.bf16.mxu0 %v2311_v63  ;;  %v2217_v45 = vmul.f32 %v2931_v20, %v5043_v49  ;;  %v2216_v8 = vmul.f32 %v2931_v20, %v5045_v36 }
 0x8f0   : > { %2353 = vmatpush1.bf16.msra.mxu0 %v2310_v0 }
 0x8f1   : > { %v2309_v35 = vpack.c.bf16 %v2217_v45, %v2214_v27  ;;  %v2308_v41 = vpack.c.bf16 %v2216_v8, %v2213_v38 }
 0x8f3   : > { %2354 = vmatprep.subr.bf16.mxu0 %v2309_v35 }
 0x8f4   : > { %2355 = vmatpush1.bf16.msra.mxu0 %v2308_v41 }
 0x900   : > { %v2208_v58 = vpop.xlane.xlu0 %2207 }
 0x901   : > { %2932 = vrcp.f32 %v2208_v58 }
 0x904   : > { %v2211_v25 = vpop.xlane.xlu1 %2210 }
 0x905   : > { %2934 = vrcp.f32 %v2211_v25 }
 0x906   : > { %v2202_v51 = vpop.xlane.xlu0 %2201 }
 0x907   : > { %2936 = vrcp.f32 %v2202_v51 }
 0x908   : > { %v2205_v32 = vpop.xlane.xlu1 %2204 }
 0x909   : > { %2938 = vrcp.f32 %v2205_v32 }
 0x90a   : > { %v2196_v37 = vpop.xlane.xlu0 %2195 }
 0x90b   : > { %2940 = vrcp.f32 %v2196_v37 }
 0x90c   : > { %v2199_v59 = vpop.xlane.xlu1 %2198 }
 0x90d   : > { %2942 = vrcp.f32 %v2199_v59 }
 0x90e   : > { %v2190_v52 = vpop.xlane.xlu0 %2189  ;;  %v2933_v15 = vpop.eup %2932 }
 0x90f   : > { %2944 = vrcp.f32 %v2190_v52  ;;  %v2304_v4 = vmul.f32 %v2933_v15, %v4641_v61  ;;  %v2303_v34 = vmul.f32 %v2933_v15, %v4638_v54 }
 0x910   : > { %v2193_v42 = vpop.xlane.xlu1 %2192 }
 0x911   : > { %2946 = vrcp.f32 %v2193_v42 }
 0x912   : > { %v2935_v14 = vpop.eup %2934  ;;  %v2184_v31 = vpop.xlane.xlu0 %2183 }
 0x913   : > { %2948 = vrcp.f32 %v2184_v31  ;;  %v2307_v62 = vmul.f32 %v2935_v14, %v4651_v17  ;;  %v2306_v7 = vmul.f32 %v2935_v14, %v4648_v3 }
 0x914   : > { %v2937_v33 = vpop.eup %2936  ;;  %v2187_v55 = vpop.xlane.xlu1 %2186 }
 0x915   : > { %2950 = vrcp.f32 %v2187_v55  ;;  %v2339_v46 = vpack.c.bf16 %v2307_v62, %v2304_v4  ;;  %v2338_v29 = vpack.c.bf16 %v2306_v7, %v2303_v34  ;;  %v2298_v0 = vmul.f32 %v2937_v33, %v4657_v23 }
 0x916   : > { %v2939_v48 = vpop.eup %2938  ;;  %v2178_v63 = vpop.xlane.xlu0 %2177  ;;  %v2297_v20 = vmul.f32 %v2937_v33, %v4653_v2 }
 0x917   : > { %2952 = vrcp.f32 %v2178_v63  ;;  %2356 = vmatprep.subr.bf16.mxu0 %v2339_v46  ;;  %v2301_v61 = vmul.f32 %v2939_v48, %v4667_v13  ;;  %v2300_v17 = vmul.f32 %v2939_v48, %v4662_v53 }
 0x918   : > { %v2941_v54 = vpop.eup %2940  ;;  %v2181_v39 = vpop.xlane.xlu1 %2180  ;;  %2357 = vmatpush2.bf16.msra.mxu0 %v2338_v29 }
 0x919   : > { %2954 = vrcp.f32 %v2181_v39  ;;  %v2337_v3 = vpack.c.bf16 %v2301_v61, %v2298_v0  ;;  %v2336_v27 = vpack.c.bf16 %v2300_v17, %v2297_v20  ;;  %v2292_v24 = vmul.f32 %v2941_v54, %v4673_v21 }
 0x91a   : > { %v2943_v49 = vpop.eup %2942  ;;  %v2172_v45 = vpop.xlane.xlu0 %2171  ;;  %v2291_v13 = vmul.f32 %v2941_v54, %v4669_v30 }
 0x91b   : > { %2956 = vrcp.f32 %v2172_v45  ;;  %2358 = vmatprep.subr.bf16.mxu0 %v2337_v3  ;;  %v2295_v23 = vmul.f32 %v2943_v49, %v4683_v50  ;;  %v2294_v2 = vmul.f32 %v2943_v49, %v4678_v56 }
 0x91c   : > { %v2945_v38 = vpop.eup %2944  ;;  %v2175_v53 = vpop.xlane.xlu1 %2174  ;;  %2359 = vmatpush2.bf16.msra.mxu0 %v2336_v27  ;;  %v5049_v27 = vld [vmem:[#allocation10_spill] sm:$0xff] }
 0x91d   : > { %2958 = vrcp.f32 %v2175_v53  ;;  %v2335_v36 = vpack.c.bf16 %v2295_v23, %v2292_v24  ;;  %v2334_v8 = vpack.c.bf16 %v2294_v2, %v2291_v13  ;;  %v2286_v58 = vmul.f32 %v2945_v38, %v4689_v19  ;;  %v5050_v13 = vld [vmem:[#allocation9_spill] sm:$0xff]  ;;  %v5051_v53 = vld [vmem:[#allocation6_spill] sm:$0xff] }
 0x91e   : > { %v2947_v35 = vpop.eup %2946  ;;  %v2166_v41 = vpop.xlane.xlu0 %2165  ;;  %v2285_v50 = vmul.f32 %v2945_v38, %v4685_v5 }
 0x91f   : > { %2960 = vrcp.f32 %v2166_v41  ;;  %2360 = vmatprep.subr.bf16.mxu0 %v2335_v36  ;;  %v2289_v21 = vmul.f32 %v2947_v35, %v4697_v6  ;;  %v2288_v30 = vmul.f32 %v2947_v35, %v4693_v44 }
 0x920   : > { %v2949_v25 = vpop.eup %2948  ;;  %v2169_v56 = vpop.xlane.xlu1 %2168  ;;  %2361 = vmatpush2.bf16.msra.mxu0 %v2334_v8 }
 0x921   : > { %2962 = vrcp.f32 %v2169_v56  ;;  %v2333_v51 = vpack.c.bf16 %v2289_v21, %v2286_v58  ;;  %v2332_v32 = vpack.c.bf16 %v2288_v30, %v2285_v50  ;;  %v2280_v59 = vmul.f32 %v2949_v25, %v4703_v10 }
 0x922   : > { %v2951_v37 = vpop.eup %2950  ;;  %v2279_v52 = vmul.f32 %v2949_v25, %v4699_v16 }
 0x923   : > { %2362 = vmatprep.subr.bf16.mxu0 %v2333_v51  ;;  %v2283_v19 = vmul.f32 %v2951_v37, %v4709_v1  ;;  %v2282_v6 = vmul.f32 %v2951_v37, %v4705_v26 }
 0x924   : > { %v2953_v15 = vpop.eup %2952  ;;  %2363 = vmatpush2.bf16.msra.mxu0 %v2332_v32 }
 0x925   : > { %v2331_v5 = vpack.c.bf16 %v2283_v19, %v2280_v59  ;;  %v2330_v44 = vpack.c.bf16 %v2282_v6, %v2279_v52  ;;  %v2274_v14 = vmul.f32 %v2953_v15, %v4715_v57  ;;  %v2273_v4 = vmul.f32 %v2953_v15, %v4711_v60  ;;  %v5047_v60 = vld [vmem:[#allocation11_spill] sm:$0xff] }
 0x926   : > { %v2955_v42 = vpop.eup %2954 }
 0x927   : > { %2364 = vmatprep.subr.bf16.mxu0 %v2331_v5  ;;  %v2277_v31 = vmul.f32 %v2955_v42, %v4721_v22  ;;  %v2276_v10 = vmul.f32 %v2955_v42, %v4717_v9  ;;  %v5046_v22 = vld [vmem:[#allocation19_spill] sm:$0xff] }
 0x928   : > { %v2957_v62 = vpop.eup %2956  ;;  %2365 = vmatpush2.bf16.msra.mxu0 %v2330_v44  ;;  %v1533_v46 = vadd.f32 %v5047_v60, %v5046_v22 }
 0x929   : > { %v2329_v1 = vpack.c.bf16 %v2277_v31, %v2274_v14  ;;  %v2328_v16 = vpack.c.bf16 %v2276_v10, %v2273_v4  ;;  %v2268_v26 = vmul.f32 %v2957_v62, %v4727_v12  ;;  %v2267_v33 = vmul.f32 %v2957_v62, %v4723_v47 }
 0x92a   : > { %v2959_v34 = vpop.eup %2958  ;;  %v1541_v47 = vmax.f32 %v1533_v46, 0.0 }
 0x92b   : > { %2366 = vmatprep.subr.bf16.mxu0 %v2329_v1  ;;  %v2271_v7 = vmul.f32 %v2959_v34, %v4733_v11  ;;  %v2270_v57 = vmul.f32 %v2959_v34, %v4729_v18  ;;  %v5048_v11 = vld [vmem:[#allocation20_spill] sm:$0xff] }
 0x92c   : > { %v2961_v55 = vpop.eup %2960  ;;  %2367 = vmatpush2.bf16.msra.mxu0 %v2328_v16  ;;  %v1547_v17 = vpack.c.bf16 %v1541_v47, %v1541_v47 }
 0x92d   : > { %v2327_v9 = vpack.c.bf16 %v2271_v7, %v2268_v26  ;;  %v2326_v29 = vpack.c.bf16 %v2270_v57, %v2267_v33  ;;  %v2262_v63 = vmul.f32 %v2961_v55, %v4739_v40  ;;  %v2261_v12 = vmul.f32 %v2961_v55, %v4735_v28  ;;  %v2969_v28 = vld [vmem:[%s4833_s2] sm:$0xff] }
 0x92e   : > { %v2963_v48 = vpop.eup %2962 }
 0x92f   : > { %2368 = vmatprep.subr.bf16.mxu0 %v2327_v9  ;;  %v2265_v0 = vmul.f32 %v2963_v48, %v4745_v43  ;;  %v2264_v61 = vmul.f32 %v2963_v48, %v5048_v11 }
 0x930   : > { %2369 = vmatpush2.bf16.msra.mxu0 %v2326_v29 }
 0x931   : > { %v2325_v18 = vpack.c.bf16 %v2265_v0, %v2262_v63  ;;  %v2324_v20 = vpack.c.bf16 %v2264_v61, %v2261_v12 }
 0x933   : > { %2370 = vmatprep.subr.bf16.mxu0 %v2325_v18 }
 0x934   : > { %2371 = vmatpush2.bf16.msra.mxu0 %v2324_v20 }
 0x937   : > { %2373 = vmatmul.mubr.bf16.vlgmr.msra.gmra.mxu0 %v1547_v17 }
 0x9f7   : > { %v2374_v54 = vpop.f32.mrf.mxu0 }
 0x9f9   : > { %v2376_v39 = vpop.f32.mrf.mxu0 }
 0x9fa   : > { %2411 = vmatprep.subr.mxu1 %v2376_v39 }
 0x9fb   : > { %v2378_v3 = vpop.f32.mrf.mxu0  ;;  %2412 = vmatpush1.msra.mxu1 %v2374_v54 }
 0x9fc   : > { %2563 = vmatmul.mubr.msk.f32.vlgmr.msra.gmra.mxu1 %vm433_vm0, %v2969_v28 }
 0x9fd   : > { %v2379_v40 = vpop.f32.mrf.mxu0 }
 0xabc   : > { %v2447_v43 = vpop.f32.mrf.mxu1 }
 0xabd   : > { %v2448_v49 = vadd.f32 %v2447_v43, %v5049_v27 }
 0xabe   : > { %v2449_v45 = vpop.f32.mrf.mxu1 }
 0xabf   : > { %v2452_v24 = vmax.f32 %v2448_v49, 0.0  ;;  %v2450_v23 = vadd.f32 %v2449_v45, %v5049_v27 }
 0xac1   : > { %v2454_v2 = vadd.f32 %v2452_v24, %v5050_v13  ;;  %v2453_v38 = vmax.f32 %v2450_v23, 0.0 }
 0xac3   : > { %2456 = vst [vmem:[%s278_s16] sm:$0xff] %v2454_v2  ;;  %v2455_v36 = vadd.f32 %v2453_v38, %v5051_v53 }
 0xac5   : > { %2457 = vst [vmem:[%s278_s16 + $0x8] sm:$0xff] %v2455_v36 }
 0xac6 PF: > { %s17_s24 = sadd.s32 1, %s2976_s24  }
 0xac7   : > { %p14_p4 = scmp.ge.s32.totalorder %s17_s24, 4  }
 0xac9   :  { %16 = sbr.rel (!%p14_p4) target bundleno = 1 (0x1), region = 78 }

</bundles_post_ra>
